<compile_context>
chip_gen: v7x
topology: tpu7x:2x2x1
jax: 0.10.0
libtpu: 0.0.40
codegen_flags: <defaults>
</compile_context>

<pallas_src>
import math
import functools

import jax
import jax.numpy as jnp
from jax import lax
from jax.experimental import pallas as pl
from jax.experimental.pallas import tpu as pltpu

_MASK_VALUE = -1e30  # large-finite mask (avoids -inf NaN corner cases)


def _flash_fwd_kernel(q_ref, k_ref, v_ref, o_ref,
                      m_sc, l_sc, acc_sc,
                      *, scale, causal, tq, tk):
    """Online-softmax flash attention forward.

    grid = (B*H, Sq // tq, Sk // tk); the last axis is the KV reduction axis.
    q_ref/k_ref/v_ref blocks are (1, tile, D); scratch holds the running max,
    running denom and un-normalized accumulator across KV tiles.
    """
    qi = pl.program_id(1)
    ki = pl.program_id(2)

    @pl.when(ki == 0)
    def _init():
        m_sc[...] = jnp.full_like(m_sc, _MASK_VALUE)
        l_sc[...] = jnp.zeros_like(l_sc)
        acc_sc[...] = jnp.zeros_like(acc_sc)

    def _scores():
        # bf16 x bf16 -> f32 on the MXU; contraction on the last dims of q/k
        # (no transpose materialized). Scale applied to the f32 scores.
        s = lax.dot_general(q_ref[0], k_ref[0],
                            (((1,), (1,)), ((), ())),
                            preferred_element_type=jnp.float32)  # (tq, tk)
        return s * scale

    def _update(s):
        m_prev = m_sc[...]                                     # (tq, 1)
        m_new = jnp.maximum(m_prev, s.max(axis=-1, keepdims=True))
        alpha = jnp.exp(m_prev - m_new)                        # rescale factor
        p = jnp.exp(s - m_new)                                 # (tq, tk) f32
        l_sc[...] = alpha * l_sc[...] + p.sum(axis=-1, keepdims=True)
        # PV matmul in the input dtype (bf16/fp16) with f32 accumulation.
        acc_sc[...] = alpha * acc_sc[...] + jnp.dot(
            p.astype(v_ref.dtype), v_ref[0],
            preferred_element_type=jnp.float32)
        m_sc[...] = m_new

    if causal:
        row_start = qi * tq
        col_start = ki * tk
        # Tile has at least one unmasked entry (max row >= min col).
        live = col_start <= row_start + (tq - 1)
        # Tile intersects the causal boundary (min row < max col) -> needs mask.
        diag = row_start < col_start + (tk - 1)

        @pl.when(live & diag)
        def _diag_tile():
            s = _scores()
            row = row_start + lax.broadcasted_iota(jnp.int32, (tq, tk), 0)
            col = col_start + lax.broadcasted_iota(jnp.int32, (tq, tk), 1)
            _update(jnp.where(row >= col, s, _MASK_VALUE))

        @pl.when(live & jnp.logical_not(diag))
        def _interior_tile():
            _update(_scores())
        # Tiles fully above the diagonal: skipped entirely (no matmul, no exp,
        # and the clamped KV index_map avoids the DMA too).
    else:
        _update(_scores())

    @pl.when(ki == pl.num_programs(2) - 1)
    def _finalize():
        inv_l = pl.reciprocal(l_sc[...], approx=True)
        o_ref[0] = (acc_sc[...] * inv_l).astype(o_ref.dtype)


def flash_self_attention(q, k, v, *, causal=False, softmax_scale=None,
                         block_q=256, block_k=512):
    """Equivalent of FlashSelfAttention.forward (eval mode: dropout_p = 0).

    q, k, v: (B, S, H, D), fp16/bf16.  Returns (B, Sq, H, D) in the same dtype.
    """
    assert q.dtype in (jnp.float16, jnp.bfloat16)
    B, Sq, H, D = q.shape
    _, Sk, _, _ = k.shape
    scale = softmax_scale if softmax_scale is not None else 1.0 / math.sqrt(D)
    # Inference semantics of the reference module: causal only if Sq == Sk,
    # dropout disabled.
    is_causal = bool(causal) and (Sq == Sk)

    tq = min(block_q, Sq)
    tk = min(block_k, Sk)
    assert Sq % tq == 0 and Sk % tk == 0, "sequence must divide the block size"

    # Fold heads into batch: (B, S, H, D) -> (B*H, S, D).
    qh = jnp.transpose(q, (0, 2, 1, 3)).reshape(B * H, Sq, D)
    kh = jnp.transpose(k, (0, 2, 1, 3)).reshape(B * H, Sk, D)
    vh = jnp.transpose(v, (0, 2, 1, 3)).reshape(B * H, Sk, D)

    if is_causal:
        # Clamp the KV block index so fully-masked (skipped) iterations
        # re-request the previous block and Pallas elides the redundant DMA.
        def kv_index_map(b, qi, ki):
            return (b, jnp.minimum(ki, (qi * tq + tq - 1) // tk), 0)
    else:
        def kv_index_map(b, qi, ki):
            return (b, ki, 0)

    kernel = functools.partial(_flash_fwd_kernel, scale=scale,
                               causal=is_causal, tq=tq, tk=tk)

    out = pl.pallas_call(
        kernel,
        out_shape=jax.ShapeDtypeStruct((B * H, Sq, D), q.dtype),
        grid_spec=pltpu.PrefetchScalarGridSpec(
            num_scalar_prefetch=0,
            grid=(B * H, Sq // tq, Sk // tk),
            in_specs=[
                pl.BlockSpec((1, tq, D), lambda b, qi, ki: (b, qi, 0)),
                pl.BlockSpec((1, tk, D), kv_index_map),
                pl.BlockSpec((1, tk, D), kv_index_map),
            ],
            out_specs=pl.BlockSpec((1, tq, D), lambda b, qi, ki: (b, qi, 0)),
            scratch_shapes=[
                pltpu.VMEM((tq, 1), jnp.float32),   # running max
                pltpu.VMEM((tq, 1), jnp.float32),   # running denom
                pltpu.VMEM((tq, D), jnp.float32),   # un-normalized accumulator
            ],
        ),
        compiler_params=pltpu.CompilerParams(
            dimension_semantics=("parallel", "parallel", "arbitrary"),
            # Safe on v5e/v6e (128 MiB phys) and v7x (64 MiB phys); our blocks
            # use only ~1-2 MiB, this just gives the pipeliner headroom.
            vmem_limit_bytes=32 * 1024 * 1024,
        ),
    )(qh, kh, vh)

    return jnp.transpose(out.reshape(B, H, Sq, D), (0, 2, 1, 3))


def _reference_attention(q, k, v, causal, softmax_scale=None):
    """Pure-JAX reference (f32) with the same (B, S, H, D) convention."""
    B, Sq, H, D = q.shape
    Sk = k.shape[1]
    scale = softmax_scale if softmax_scale is not None else 1.0 / math.sqrt(D)
    qf = q.astype(jnp.float32)
    kf = k.astype(jnp.float32)
    vf = v.astype(jnp.float32)
    s = jnp.einsum("bqhd,bkhd->bhqk", qf, kf) * scale
    if causal and Sq == Sk:
        mask = jnp.tril(jnp.ones((Sq, Sk), dtype=bool))
        s = jnp.where(mask[None, None], s, -jnp.inf)
    p = jax.nn.softmax(s, axis=-1)
    return jnp.einsum("bhqk,bkhd->bqhd", p, vf)


if __name__ == "__main__":
    B, S, H, D = 2, 256, 2, 64
    key = jax.random.PRNGKey(0)
    kq, kk, kv = jax.random.split(key, 3)
    q = jax.random.normal(kq, (B, S, H, D), dtype=jnp.float32).astype(jnp.bfloat16)
    k = jax.random.normal(kk, (B, S, H, D), dtype=jnp.float32).astype(jnp.bfloat16)
    v = jax.random.normal(kv, (B, S, H, D), dtype=jnp.float32).astype(jnp.bfloat16)

    configs = [
        dict(causal=False),                          # default (large) blocks
        dict(causal=True),                           # default blocks, diagonal tile
        dict(causal=True, block_q=64, block_k=128),  # exercises skip/diag/interior
        dict(causal=False, block_q=128, block_k=64), # multi-KV-tile online softmax
    ]
    ok = True
    for cfg in configs:
        out = flash_self_attention(q, k, v, **cfg)
        out = jax.block_until_ready(out)
        ref = _reference_attention(q, k, v, cfg.get("causal", False))
        err = jnp.max(jnp.abs(out.astype(jnp.float32) - ref))
        ok &= bool(err < 5e-2)

    if ok:
        print("KERNEL_OK")
    else:
        print("KERNEL_MISMATCH")
</pallas_src>

<mosaic_0001>
module attributes {stable_mosaic.version = 11 : i64} {
  func.func @_flash_fwd_kernel(%arg0: i32, %arg1: i32, %arg2: i32, %arg3: memref<1x256x64xbf16, #tpu.memory_space<vmem>>, %arg4: memref<1x256x64xbf16, #tpu.memory_space<vmem>>, %arg5: memref<1x256x64xbf16, #tpu.memory_space<vmem>>, %arg6: memref<1x256x64xbf16, #tpu.memory_space<vmem>>, %arg7: memref<256x1xf32, #tpu.memory_space<vmem>>, %arg8: memref<256x1xf32, #tpu.memory_space<vmem>>, %arg9: memref<256x64xf32, #tpu.memory_space<vmem>>) attributes {dimension_semantics = [#tpu.dimension_semantics<parallel>, #tpu.dimension_semantics<parallel>, #tpu.dimension_semantics<arbitrary>], iteration_bounds = array<i64: 4, 1, 1>, scalar_prefetch = 0 : i64, scratch_operands = 3 : i64, tpu.core_type = #tpu.core_type<tc>, window_params = [{transform_indices = @transform_0, window_bounds = array<i64: 1, 256, 64>}, {transform_indices = @transform_1, window_bounds = array<i64: 1, 256, 64>}, {transform_indices = @transform_2, window_bounds = array<i64: 1, 256, 64>}, {transform_indices = @transform_3, window_bounds = array<i64: 1, 256, 64>}]} {
    %c0_i32 = arith.constant 0 : i32
    %0 = arith.cmpi eq, %arg2, %c0_i32 : i32
    %1 = arith.extui %0 : i1 to i32
    %c0_i32_0 = arith.constant 0 : i32
    %2 = arith.cmpi ne, %1, %c0_i32_0 : i32
    scf.if %2 {
      %cst_27 = arith.constant -1.000000e+30 : f32
      %38 = vector.broadcast %cst_27 : f32 to vector<256x1xf32>
      %c0_28 = arith.constant 0 : index
      %c0_29 = arith.constant 0 : index
      %39 = vector.load %arg7[%c0_28, %c0_29] : memref<256x1xf32, #tpu.memory_space<vmem>>, vector<256x1xf32>
      tpu.vector_store %arg7[%c0_28, %c0_29], %38 {strides = array<i32>} : memref<256x1xf32, #tpu.memory_space<vmem>>, vector<256x1xf32>,
      %cst_30 = arith.constant 0.000000e+00 : f32
      %40 = vector.broadcast %cst_30 : f32 to vector<256x1xf32>
      %c0_31 = arith.constant 0 : index
      %c0_32 = arith.constant 0 : index
      %41 = vector.load %arg8[%c0_31, %c0_32] : memref<256x1xf32, #tpu.memory_space<vmem>>, vector<256x1xf32>
      tpu.vector_store %arg8[%c0_31, %c0_32], %40 {strides = array<i32>} : memref<256x1xf32, #tpu.memory_space<vmem>>, vector<256x1xf32>,
      %cst_33 = arith.constant 0.000000e+00 : f32
      %42 = vector.broadcast %cst_33 : f32 to vector<256x64xf32>
      %c0_34 = arith.constant 0 : index
      %c0_35 = arith.constant 0 : index
      %43 = vector.load %arg9[%c0_34, %c0_35] : memref<256x64xf32, #tpu.memory_space<vmem>>, vector<256x64xf32>
      tpu.vector_store %arg9[%c0_34, %c0_35], %42 {strides = array<i32>} : memref<256x64xf32, #tpu.memory_space<vmem>>, vector<256x64xf32>,
    } else {
    }
    %c0 = arith.constant 0 : index
    %c0_1 = arith.constant 0 : index
    %c0_2 = arith.constant 0 : index
    %3 = vector.load %arg3[%c0, %c0_1, %c0_2] : memref<1x256x64xbf16, #tpu.memory_space<vmem>>, vector<1x256x64xbf16>
    %4 = vector.shape_cast %3 : vector<1x256x64xbf16> to vector<256x64xbf16>
    %c0_3 = arith.constant 0 : index
    %c0_4 = arith.constant 0 : index
    %c0_5 = arith.constant 0 : index
    %5 = vector.load %arg4[%c0_3, %c0_4, %c0_5] : memref<1x256x64xbf16, #tpu.memory_space<vmem>>, vector<1x256x64xbf16>
    %6 = vector.shape_cast %5 : vector<1x256x64xbf16> to vector<256x64xbf16>
    %cst = arith.constant dense<0.000000e+00> : vector<256x256xf32>
    %7 = tpu.matmul %4, %6, %cst {dimension_numbers = #tpu.dot_dimension_numbers<[1], [1], [0], [0], [0, 0, 1, 0], [], []>} : vector<256x64xbf16>, vector<256x64xbf16>, vector<256x256xf32> -> vector<256x256xf32>
    %cst_6 = arith.constant 1.250000e-01 : f32
    %8 = vector.broadcast %cst_6 : f32 to vector<256x256xf32>
    %9 = arith.mulf %7, %8 : vector<256x256xf32>
    %c0_7 = arith.constant 0 : index
    %c0_8 = arith.constant 0 : index
    %10 = vector.load %arg7[%c0_7, %c0_8] : memref<256x1xf32, #tpu.memory_space<vmem>>, vector<256x1xf32>
    %cst_9 = arith.constant dense<0xFF800000> : vector<256xf32>
    %11 = vector.multi_reduction <maximumf>, %9, %cst_9 [1] : vector<256x256xf32> to vector<256xf32>
    %12 = vector.shape_cast %11 : vector<256xf32> to vector<256x1xf32>
    %13 = arith.maximumf %10, %12 : vector<256x1xf32>
    %14 = arith.subf %10, %13 : vector<256x1xf32>
    %15 = math.exp %14 : vector<256x1xf32>
    %16 = vector.broadcast %13 : vector<256x1xf32> to vector<256x256xf32>
    %17 = arith.subf %9, %16 : vector<256x256xf32>
    %18 = math.exp %17 : vector<256x256xf32>
    %c0_10 = arith.constant 0 : index
    %c0_11 = arith.constant 0 : index
    %19 = vector.load %arg8[%c0_10, %c0_11] : memref<256x1xf32, #tpu.memory_space<vmem>>, vector<256x1xf32>
    %20 = arith.mulf %15, %19 : vector<256x1xf32>
    %cst_12 = arith.constant dense<0.000000e+00> : vector<256xf32>
    %21 = vector.multi_reduction <add>, %18, %cst_12 [1] : vector<256x256xf32> to vector<256xf32>
    %22 = vector.shape_cast %21 : vector<256xf32> to vector<256x1xf32>
    %23 = arith.addf %20, %22 : vector<256x1xf32>
    %c0_13 = arith.constant 0 : index
    %c0_14 = arith.constant 0 : index
    %24 = vector.load %arg8[%c0_13, %c0_14] : memref<256x1xf32, #tpu.memory_space<vmem>>, vector<256x1xf32>
    tpu.vector_store %arg8[%c0_13, %c0_14], %23 {strides = array<i32>} : memref<256x1xf32, #tpu.memory_space<vmem>>, vector<256x1xf32>,
    %c0_15 = arith.constant 0 : index
    %c0_16 = arith.constant 0 : index
    %25 = vector.load %arg9[%c0_15, %c0_16] : memref<256x64xf32, #tpu.memory_space<vmem>>, vector<256x64xf32>
    %26 = vector.broadcast %15 : vector<256x1xf32> to vector<256x64xf32>
    %27 = arith.mulf %26, %25 : vector<256x64xf32>
    %28 = arith.truncf %18 : vector<256x256xf32> to vector<256x256xbf16>
    %c0_17 = arith.constant 0 : index
    %c0_18 = arith.constant 0 : index
    %c0_19 = arith.constant 0 : index
    %29 = vector.load %arg5[%c0_17, %c0_18, %c0_19] : memref<1x256x64xbf16, #tpu.memory_space<vmem>>, vector<1x256x64xbf16>
    %30 = vector.shape_cast %29 : vector<1x256x64xbf16> to vector<256x64xbf16>
    %cst_20 = arith.constant dense<0.000000e+00> : vector<256x64xf32>
    %31 = tpu.matmul %28, %30, %cst_20 {dimension_numbers = #tpu.dot_dimension_numbers<[1], [0], [0], [1], [0, 0, 1, 1], [], []>} : vector<256x256xbf16>, vector<256x64xbf16>, vector<256x64xf32> -> vector<256x64xf32>
    %32 = arith.addf %27, %31 : vector<256x64xf32>
    %c0_21 = arith.constant 0 : index
    %c0_22 = arith.constant 0 : index
    %33 = vector.load %arg9[%c0_21, %c0_22] : memref<256x64xf32, #tpu.memory_space<vmem>>, vector<256x64xf32>
    tpu.vector_store %arg9[%c0_21, %c0_22], %32 {strides = array<i32>} : memref<256x64xf32, #tpu.memory_space<vmem>>, vector<256x64xf32>,
    %c0_23 = arith.constant 0 : index
    %c0_24 = arith.constant 0 : index
    %34 = vector.load %arg7[%c0_23, %c0_24] : memref<256x1xf32, #tpu.memory_space<vmem>>, vector<256x1xf32>
    tpu.vector_store %arg7[%c0_23, %c0_24], %13 {strides = array<i32>} : memref<256x1xf32, #tpu.memory_space<vmem>>, vector<256x1xf32>,
    %c0_i32_25 = arith.constant 0 : i32
    %35 = arith.cmpi eq, %arg2, %c0_i32_25 : i32
    %36 = arith.extui %35 : i1 to i32
    %c0_i32_26 = arith.constant 0 : i32
    %37 = arith.cmpi ne, %36, %c0_i32_26 : i32
    scf.if %37 {
      %c0_27 = arith.constant 0 : index
      %c0_28 = arith.constant 0 : index
      %38 = vector.load %arg8[%c0_27, %c0_28] : memref<256x1xf32, #tpu.memory_space<vmem>>, vector<256x1xf32>
      %39 = tpu.reciprocal %38 {approx = true} : vector<256x1xf32> -> vector<256x1xf32>
      %c0_29 = arith.constant 0 : index
      %c0_30 = arith.constant 0 : index
      %40 = vector.load %arg9[%c0_29, %c0_30] : memref<256x64xf32, #tpu.memory_space<vmem>>, vector<256x64xf32>
      %41 = vector.broadcast %39 : vector<256x1xf32> to vector<256x64xf32>
      %42 = arith.mulf %40, %41 : vector<256x64xf32>
      %43 = arith.truncf %42 : vector<256x64xf32> to vector<256x64xbf16>
      %c0_31 = arith.constant 0 : index
      %c0_32 = arith.constant 0 : index
      %c0_33 = arith.constant 0 : index
      %44 = vector.load %arg6[%c0_31, %c0_32, %c0_33] : memref<1x256x64xbf16, #tpu.memory_space<vmem>>, vector<1x256x64xbf16>
      %45 = vector.shape_cast %44 : vector<1x256x64xbf16> to vector<256x64xbf16>
      %46 = vector.shape_cast %43 : vector<256x64xbf16> to vector<1x256x64xbf16>
      tpu.vector_store %arg6[%c0_31, %c0_32, %c0_33], %46 {strides = array<i32>} : memref<1x256x64xbf16, #tpu.memory_space<vmem>>, vector<1x256x64xbf16>,
    } else {
    }
    return
  }
  func.func @transform_0(%arg0: i32, %arg1: i32, %arg2: i32) -> (i32, i32, i32) {
    %c0_i32 = arith.constant 0 : i32
    %c0_i32_0 = arith.constant 0 : i32
    return %arg0, %arg1, %c0_i32 : i32, i32, i32
  }
  func.func @transform_1(%arg0: i32, %arg1: i32, %arg2: i32) -> (i32, i32, i32) {
    %c0_i32 = arith.constant 0 : i32
    %c0_i32_0 = arith.constant 0 : i32
    return %arg0, %arg2, %c0_i32 : i32, i32, i32
  }
  func.func @transform_2(%arg0: i32, %arg1: i32, %arg2: i32) -> (i32, i32, i32) {
    %c0_i32 = arith.constant 0 : i32
    %c0_i32_0 = arith.constant 0 : i32
    return %arg0, %arg2, %c0_i32 : i32, i32, i32
  }
  func.func @transform_3(%arg0: i32, %arg1: i32, %arg2: i32) -> (i32, i32, i32) {
    %c0_i32 = arith.constant 0 : i32
    %c0_i32_0 = arith.constant 0 : i32
    return %arg0, %arg1, %c0_i32 : i32, i32, i32
  }
}

</mosaic_0001>

<bundles_post_ra>
// kernel: tpu_custom_call.1
= control target key start
LH: loop header
LB: loop body
LE: loop exit
PB: predicated region body
PF: predicated region fallthrough
CT: control target
= control target key end

     0   :  { %s3717_s12 = smov 0   ;;  %s3719_s13 = smov 0   ;;  %s5198_s0 = inlined_call_operand.vmem [shape: bf16[4,256,64], index: 0, kind: input, shape index: {}]   ;;  %s5199_s1 = inlined_call_operand.vmem [shape: bf16[4,256,64], index: 1, kind: input, shape index: {}]   ;;  %s5200_s2 = inlined_call_operand.vmem [shape: bf16[4,256,64], index: 2, kind: input, shape index: {}]   ;;  %s5201_s3 = inlined_call_operand.vmem [shape: bf16[4,256,64], index: 3, kind: output, shape index: {}]  }
   0x1   :  { %s3721_s14 = smov 0  }
   0x2 LB: > { %s32_s15 = sadd.s32 1, %s3688_s13  ;;  %p3026_p0 = scmp.ge.s32.totalorder %s3692_s14, 1  ;;  %s3692_s14 = sphi %s3721_s14, %s13_s14   ;;  %s3688_s13 = sphi %s3719_s13, %s5473_s13   ;;  %s3684_s12 = sphi %s3717_s12, %s5472_s12  }
   0x3   : > { %p34_p1 = scmp.ge.s32.totalorder %s32_s15, 4  ;;  %p199_p2 = scmp.lt.s32.totalorder %s3692_s14, 5 }
   0x5   : > { %s5475_s15 = smov (%p34_p1, %s32_s15), 0  ;;  %p200_p3 = pnand %p3026_p0, %p199_p2 }
   0x7   : > { %203 = sbr.rel (%p200_p3) target bundleno = 1023 (0x3ff), region = 32 }
   0xe   : > { %p250_p4 = scmp.lt.s32.totalorder %s3684_s12, 3  ;;  %vm359_vm0 = vcmask 523264   ;;  %vm294_vm1 = vcmask 7168   ;;  %v3694_v43 = vmov -1e+30   ;;  %vm2863_vm2 = vcmask 519168  }
   0xf   : > { %295 = vst.msk [vmem:[#allocation2] sm:$0xff] %vm294_vm1, %v3694_v43  ;;  %296 = vst.msk [vmem:[#allocation2 + $0x8] sm:$0xff] %vm294_vm1, %v3694_v43 }
  0x10   : > { %s5477_s12 = smov (!%p250_p4, %s3684_s12), 3  ;;  %297 = vst.msk [vmem:[#allocation2 + $0x10] sm:$0xff] %vm294_vm1, %v3694_v43  ;;  %298 = vst.msk [vmem:[#allocation2 + $0x18] sm:$0xff] %vm294_vm1, %v3694_v43 }
  0x11   : > { %s3735_s16 = sshll.u32 %s5477_s12, 7  ;;  %299 = vst.msk [vmem:[#allocation2 + $0x20] sm:$0xff] %vm294_vm1, %v3694_v43  ;;  %300 = vst.msk [vmem:[#allocation2 + $0x28] sm:$0xff] %vm294_vm1, %v3694_v43 }
  0x12   : > { %s3741_s19 = scalar_lea.vmem %s5199_s1, %s3735_s16  ;;  %s3758_s22 = scalar_lea.vmem %s5198_s0, %s3735_s16  ;;  %301 = vst.msk [vmem:[#allocation2 + $0x30] sm:$0xff] %vm294_vm1, %v3694_v43  ;;  %302 = vst.msk [vmem:[#allocation2 + $0x38] sm:$0xff] %vm294_vm1, %v3694_v43 }
  0x13   : > { %v3366_v0 = vld [vmem:[%s3741_s19 + $0x40] sm:$0xff]   ;;  %v3368_v2 = vld [vmem:[%s3741_s19 + $0x48] sm:$0xff]   ;;  %v3370_v6 = vld [vmem:[%s3741_s19 + $0x50] sm:$0xff]   ;;  %303 = vst.msk [vmem:[#allocation2 + $0x40] sm:$0xff] %vm294_vm1, %v3694_v43  ;;  %s4188_s25 = scalar_lea.vmem %s5200_s2, %s3735_s16  ;;  %s5123_s28 = scalar_lea.vmem %s5201_s3, %s3735_s16 }
  0x14   : > { %v3367_v1 = vld [vmem:[%s3741_s19] sm:$0xff]   ;;  %3329 = vmatprep.subr.msk.bf16.mxu0 %vm359_vm0, %v3366_v0  ;;  %v3369_v4 = vld [vmem:[%s3741_s19 + $0x8] sm:$0xff]   ;;  %v3371_v7 = vld [vmem:[%s3741_s19 + $0x10] sm:$0xff]   ;;  %304 = vst.msk [vmem:[#allocation2 + $0x48] sm:$0xff] %vm294_vm1, %v3694_v43 }
  0x15   : > { %v666_v3 = vsel %vm359_vm0, %v3367_v1, 0  ;;  %v669_v5 = vsel %vm359_vm0, %v3369_v4, 0  ;;  %v3382_v8 = vld [vmem:[%s3758_s22] sm:$0xff]   ;;  %v672_v9 = vsel %vm359_vm0, %v3371_v7, 0  ;;  %v3372_v10 = vld [vmem:[%s3741_s19 + $0x58] sm:$0xff]   ;;  %v3376_v16 = vld [vmem:[%s3741_s19 + $0x68] sm:$0xff]  }
  0x16   : > { %3170 = vmatpush3.bf16.xpose.msra.mxu0 %v666_v3  ;;  %3185 = vmatprep.mubr.msk.bf16.mxu0 %vm359_vm0, %v3382_v8  ;;  %v3373_v11 = vld [vmem:[%s3741_s19 + $0x18] sm:$0xff]   ;;  %v3374_v13 = vld [vmem:[%s3741_s19 + $0x60] sm:$0xff]   ;;  %v3377_v17 = vld [vmem:[%s3741_s19 + $0x28] sm:$0xff]   ;;  %305 = vst.msk [vmem:[#allocation2 + $0x50] sm:$0xff] %vm294_vm1, %v3694_v43 }
  0x17   : > { %3330 = vmatprep.subr.msk.bf16.mxu0 %vm359_vm0, %v3368_v2  ;;  %v675_v12 = vsel %vm359_vm0, %v3373_v11, 0  ;;  %v3375_v14 = vld [vmem:[%s3741_s19 + $0x20] sm:$0xff]   ;;  %v681_v18 = vsel %vm359_vm0, %v3377_v17, 0  ;;  %v3378_v19 = vld [vmem:[%s3741_s19 + $0x70] sm:$0xff]   ;;  %v3380_v22 = vld [vmem:[%s3741_s19 + $0x78] sm:$0xff]   ;;  %306 = vst.msk [vmem:[#allocation2 + $0x58] sm:$0xff] %vm294_vm1, %v3694_v43 }
  0x18   : > { %v678_v15 = vsel %vm359_vm0, %v3375_v14, 0  ;;  %v3379_v20 = vld [vmem:[%s3741_s19 + $0x30] sm:$0xff]   ;;  %v3381_v23 = vld [vmem:[%s3741_s19 + $0x38] sm:$0xff]   ;;  %v3383_v25 = vld [vmem:[%s3758_s22 + $0x8] sm:$0xff]   ;;  %307 = vst.msk [vmem:[#allocation2 + $0x60] sm:$0xff] %vm294_vm1, %v3694_v43 }
  0x19   : > { %v684_v21 = vsel %vm359_vm0, %v3379_v20, 0  ;;  %v687_v24 = vsel %vm359_vm0, %v3381_v23, 0  ;;  %v3384_v26 = vld [vmem:[%s3758_s22 + $0x10] sm:$0xff]   ;;  %v3385_v27 = vld [vmem:[%s3758_s22 + $0x18] sm:$0xff]   ;;  %v3386_v28 = vld [vmem:[%s3758_s22 + $0x20] sm:$0xff]   ;;  %308 = vst.msk [vmem:[#allocation2 + $0x68] sm:$0xff] %vm294_vm1, %v3694_v43 }
  0x1a   : > { %v3387_v29 = vld [vmem:[%s3758_s22 + $0x28] sm:$0xff]   ;;  %v3388_v30 = vld [vmem:[%s3758_s22 + $0x30] sm:$0xff]   ;;  %v3389_v31 = vld [vmem:[%s3758_s22 + $0x38] sm:$0xff]   ;;  %309 = vst.msk [vmem:[#allocation2 + $0x70] sm:$0xff] %vm294_vm1, %v3694_v43 }
  0x1b   : > { %v3390_v32 = vld [vmem:[%s3758_s22 + $0x40] sm:$0xff]   ;;  %v3391_v33 = vld [vmem:[%s3758_s22 + $0x48] sm:$0xff]   ;;  %v3392_v34 = vld [vmem:[%s3758_s22 + $0x50] sm:$0xff]   ;;  %310 = vst.msk [vmem:[#allocation2 + $0x78] sm:$0xff] %vm294_vm1, %v3694_v43 }
  0x1c   : > { %v3393_v35 = vld [vmem:[%s3758_s22 + $0x58] sm:$0xff]   ;;  %v3394_v36 = vld [vmem:[%s3758_s22 + $0x60] sm:$0xff]   ;;  %v3395_v37 = vld [vmem:[%s3758_s22 + $0x68] sm:$0xff]   ;;  %311 = vst.msk [vmem:[#allocation2 + $0x80] sm:$0xff] %vm294_vm1, %v3694_v43 }
  0x1d   : > { %v3396_v38 = vld [vmem:[%s3758_s22 + $0x70] sm:$0xff]   ;;  %v3397_v39 = vld [vmem:[%s3758_s22 + $0x78] sm:$0xff]   ;;  %312 = vst.msk [vmem:[#allocation2 + $0x88] sm:$0xff] %vm294_vm1, %v3694_v43  ;;  %313 = vst.msk [vmem:[#allocation2 + $0x90] sm:$0xff] %vm294_vm1, %v3694_v43 }
  0x1e   : > { %3172 = vmatpush3.bf16.xpose.msra.mxu0 %v669_v5  ;;  %314 = vst.msk [vmem:[#allocation2 + $0x98] sm:$0xff] %vm294_vm1, %v3694_v43  ;;  %315 = vst.msk [vmem:[#allocation2 + $0xa0] sm:$0xff] %vm294_vm1, %v3694_v43 }
  0x1f   : > { %3331 = vmatprep.subr.msk.bf16.mxu0 %vm359_vm0, %v3370_v6  ;;  %316 = vst.msk [vmem:[#allocation2 + $0xa8] sm:$0xff] %vm294_vm1, %v3694_v43  ;;  %317 = vst.msk [vmem:[#allocation2 + $0xb0] sm:$0xff] %vm294_vm1, %v3694_v43  ;;  %v3695_v6 = vmov 0  }
  0x20   : > { %318 = vst.msk [vmem:[#allocation2 + $0xb8] sm:$0xff] %vm294_vm1, %v3694_v43  ;;  %319 = vst.msk [vmem:[#allocation2 + $0xc0] sm:$0xff] %vm294_vm1, %v3694_v43  ;;  %3364 = vset.pattern.permute.xlu0 %v3695_v6  ;;  %3365 = vset.pattern.permute.xlu1 %v3695_v6 }
  0x21   : > { %320 = vst.msk [vmem:[#allocation2 + $0xc8] sm:$0xff] %vm294_vm1, %v3694_v43  ;;  %321 = vst.msk [vmem:[#allocation2 + $0xd0] sm:$0xff] %vm294_vm1, %v3694_v43 }
  0x22   : > { %322 = vst.msk [vmem:[#allocation2 + $0xd8] sm:$0xff] %vm294_vm1, %v3694_v43  ;;  %323 = vst.msk [vmem:[#allocation2 + $0xe0] sm:$0xff] %vm294_vm1, %v3694_v43 }
  0x23   : > { %324 = vst.msk [vmem:[#allocation2 + $0xe8] sm:$0xff] %vm294_vm1, %v3694_v43  ;;  %325 = vst.msk [vmem:[#allocation2 + $0xf0] sm:$0xff] %vm294_vm1, %v3694_v43 }
  0x24   : > { %326 = vst.msk [vmem:[#allocation2 + $0xf8] sm:$0xff] %vm294_vm1, %v3694_v43 }
  0x26   : > { %3174 = vmatpush3.bf16.xpose.msra.mxu0 %v672_v9 }
  0x27   : > { %3332 = vmatprep.subr.msk.bf16.mxu0 %vm359_vm0, %v3372_v10 }
  0x2e   : > { %3176 = vmatpush3.bf16.xpose.msra.mxu0 %v675_v12 }
  0x2f   : > { %3333 = vmatprep.subr.msk.bf16.mxu0 %vm359_vm0, %v3374_v13 }
  0x36   : > { %3178 = vmatpush3.bf16.xpose.msra.mxu0 %v678_v15 }
  0x37   : > { %3334 = vmatprep.subr.msk.bf16.mxu0 %vm359_vm0, %v3376_v16 }
  0x3e   : > { %3180 = vmatpush3.bf16.xpose.msra.mxu0 %v681_v18  ;;  %v3696_v18 = vmov 0.0  }
  0x3f   : > { %3335 = vmatprep.subr.msk.bf16.mxu0 %vm359_vm0, %v3378_v19  ;;  %361 = vst.msk [vmem:[#allocation4 + $0x8] sm:$0xff] %vm359_vm0, %v3696_v18  ;;  %360 = vst.msk [vmem:[#allocation4] sm:$0xff] %vm359_vm0, %v3696_v18 }
  0x40   : > { %327 = vst.msk [vmem:[#allocation3] sm:$0xff] %vm294_vm1, %v3696_v18  ;;  %328 = vst.msk [vmem:[#allocation3 + $0x8] sm:$0xff] %vm294_vm1, %v3696_v18 }
  0x41   : > { %329 = vst.msk [vmem:[#allocation3 + $0x10] sm:$0xff] %vm294_vm1, %v3696_v18  ;;  %330 = vst.msk [vmem:[#allocation3 + $0x18] sm:$0xff] %vm294_vm1, %v3696_v18 }
  0x42   : > { %331 = vst.msk [vmem:[#allocation3 + $0x20] sm:$0xff] %vm294_vm1, %v3696_v18  ;;  %332 = vst.msk [vmem:[#allocation3 + $0x28] sm:$0xff] %vm294_vm1, %v3696_v18 }
  0x43   : > { %333 = vst.msk [vmem:[#allocation3 + $0x30] sm:$0xff] %vm294_vm1, %v3696_v18  ;;  %334 = vst.msk [vmem:[#allocation3 + $0x38] sm:$0xff] %vm294_vm1, %v3696_v18 }
  0x44   : > { %335 = vst.msk [vmem:[#allocation3 + $0x40] sm:$0xff] %vm294_vm1, %v3696_v18  ;;  %336 = vst.msk [vmem:[#allocation3 + $0x48] sm:$0xff] %vm294_vm1, %v3696_v18 }
  0x45   : > { %337 = vst.msk [vmem:[#allocation3 + $0x50] sm:$0xff] %vm294_vm1, %v3696_v18  ;;  %338 = vst.msk [vmem:[#allocation3 + $0x58] sm:$0xff] %vm294_vm1, %v3696_v18 }
  0x46   : > { %3182 = vmatpush3.bf16.xpose.msra.mxu0 %v684_v21  ;;  %339 = vst.msk [vmem:[#allocation3 + $0x60] sm:$0xff] %vm294_vm1, %v3696_v18  ;;  %340 = vst.msk [vmem:[#allocation3 + $0x68] sm:$0xff] %vm294_vm1, %v3696_v18 }
  0x47   : > { %3336 = vmatprep.subr.msk.bf16.mxu0 %vm359_vm0, %v3380_v22  ;;  %341 = vst.msk [vmem:[#allocation3 + $0x70] sm:$0xff] %vm294_vm1, %v3696_v18  ;;  %342 = vst.msk [vmem:[#allocation3 + $0x78] sm:$0xff] %vm294_vm1, %v3696_v18 }
  0x48   : > { %343 = vst.msk [vmem:[#allocation3 + $0x80] sm:$0xff] %vm294_vm1, %v3696_v18  ;;  %344 = vst.msk [vmem:[#allocation3 + $0x88] sm:$0xff] %vm294_vm1, %v3696_v18 }
  0x49   : > { %345 = vst.msk [vmem:[#allocation3 + $0x90] sm:$0xff] %vm294_vm1, %v3696_v18  ;;  %346 = vst.msk [vmem:[#allocation3 + $0x98] sm:$0xff] %vm294_vm1, %v3696_v18 }
  0x4a   : > { %347 = vst.msk [vmem:[#allocation3 + $0xa0] sm:$0xff] %vm294_vm1, %v3696_v18  ;;  %348 = vst.msk [vmem:[#allocation3 + $0xa8] sm:$0xff] %vm294_vm1, %v3696_v18 }
  0x4b   : > { %349 = vst.msk [vmem:[#allocation3 + $0xb0] sm:$0xff] %vm294_vm1, %v3696_v18  ;;  %350 = vst.msk [vmem:[#allocation3 + $0xb8] sm:$0xff] %vm294_vm1, %v3696_v18 }
  0x4c   : > { %351 = vst.msk [vmem:[#allocation3 + $0xc0] sm:$0xff] %vm294_vm1, %v3696_v18  ;;  %352 = vst.msk [vmem:[#allocation3 + $0xc8] sm:$0xff] %vm294_vm1, %v3696_v18 }
  0x4d   : > { %353 = vst.msk [vmem:[#allocation3 + $0xd0] sm:$0xff] %vm294_vm1, %v3696_v18  ;;  %354 = vst.msk [vmem:[#allocation3 + $0xd8] sm:$0xff] %vm294_vm1, %v3696_v18 }
  0x4e   : > { %3184 = vmatpush3.bf16.xpose.msra.mxu0 %v687_v24  ;;  %355 = vst.msk [vmem:[#allocation3 + $0xe0] sm:$0xff] %vm294_vm1, %v3696_v18  ;;  %356 = vst.msk [vmem:[#allocation3 + $0xe8] sm:$0xff] %vm294_vm1, %v3696_v18 }
  0x4f   : > { %357 = vst.msk [vmem:[#allocation3 + $0xf0] sm:$0xff] %vm294_vm1, %v3696_v18  ;;  %358 = vst.msk [vmem:[#allocation3 + $0xf8] sm:$0xff] %vm294_vm1, %v3696_v18 }
  0x50   : > { %362 = vst.msk [vmem:[#allocation4 + $0x10] sm:$0xff] %vm359_vm0, %v3696_v18  ;;  %363 = vst.msk [vmem:[#allocation4 + $0x18] sm:$0xff] %vm359_vm0, %v3696_v18 }
  0x51   : > { %364 = vst.msk [vmem:[#allocation4 + $0x20] sm:$0xff] %vm359_vm0, %v3696_v18  ;;  %365 = vst.msk [vmem:[#allocation4 + $0x28] sm:$0xff] %vm359_vm0, %v3696_v18 }
  0x52   : > { %366 = vst.msk [vmem:[#allocation4 + $0x30] sm:$0xff] %vm359_vm0, %v3696_v18  ;;  %367 = vst.msk [vmem:[#allocation4 + $0x38] sm:$0xff] %vm359_vm0, %v3696_v18 }
  0x53   : > { %368 = vst.msk [vmem:[#allocation4 + $0x40] sm:$0xff] %vm359_vm0, %v3696_v18  ;;  %369 = vst.msk [vmem:[#allocation4 + $0x48] sm:$0xff] %vm359_vm0, %v3696_v18 }
  0x54   : > { %370 = vst.msk [vmem:[#allocation4 + $0x50] sm:$0xff] %vm359_vm0, %v3696_v18  ;;  %371 = vst.msk [vmem:[#allocation4 + $0x58] sm:$0xff] %vm359_vm0, %v3696_v18 }
  0x55   : > { %3186 = vmatmul.mubr.msk.bf16.vlgmr.msra.gmra.mrb[0].mxu0 %vm359_vm0, %v3382_v8  ;;  %372 = vst.msk [vmem:[#allocation4 + $0x60] sm:$0xff] %vm359_vm0, %v3696_v18  ;;  %373 = vst.msk [vmem:[#allocation4 + $0x68] sm:$0xff] %vm359_vm0, %v3696_v18 }
  0x56   : > { %3187 = vmatprep.mubr.msk.bf16.mxu0 %vm359_vm0, %v3383_v25  ;;  %374 = vst.msk [vmem:[#allocation4 + $0x70] sm:$0xff] %vm359_vm0, %v3696_v18  ;;  %375 = vst.msk [vmem:[#allocation4 + $0x78] sm:$0xff] %vm359_vm0, %v3696_v18 }
  0x57   : > { %376 = vst.msk [vmem:[#allocation4 + $0x80] sm:$0xff] %vm359_vm0, %v3696_v18  ;;  %377 = vst.msk [vmem:[#allocation4 + $0x88] sm:$0xff] %vm359_vm0, %v3696_v18 }
  0x58   : > { %378 = vst.msk [vmem:[#allocation4 + $0x90] sm:$0xff] %vm359_vm0, %v3696_v18  ;;  %379 = vst.msk [vmem:[#allocation4 + $0x98] sm:$0xff] %vm359_vm0, %v3696_v18 }
  0x59   : > { %380 = vst.msk [vmem:[#allocation4 + $0xa0] sm:$0xff] %vm359_vm0, %v3696_v18  ;;  %381 = vst.msk [vmem:[#allocation4 + $0xa8] sm:$0xff] %vm359_vm0, %v3696_v18 }
  0x5a   : > { %382 = vst.msk [vmem:[#allocation4 + $0xb0] sm:$0xff] %vm359_vm0, %v3696_v18  ;;  %383 = vst.msk [vmem:[#allocation4 + $0xb8] sm:$0xff] %vm359_vm0, %v3696_v18 }
  0x5b   : > { %384 = vst.msk [vmem:[#allocation4 + $0xc0] sm:$0xff] %vm359_vm0, %v3696_v18  ;;  %385 = vst.msk [vmem:[#allocation4 + $0xc8] sm:$0xff] %vm359_vm0, %v3696_v18 }
  0x5c   : > { %386 = vst.msk [vmem:[#allocation4 + $0xd0] sm:$0xff] %vm359_vm0, %v3696_v18  ;;  %387 = vst.msk [vmem:[#allocation4 + $0xd8] sm:$0xff] %vm359_vm0, %v3696_v18 }
  0x5d   : > { %3188 = vmatmul.mubr.msk.bf16.gmra.mrb[4].mxu0 %vm359_vm0, %v3383_v25  ;;  %388 = vst.msk [vmem:[#allocation4 + $0xe0] sm:$0xff] %vm359_vm0, %v3696_v18  ;;  %389 = vst.msk [vmem:[#allocation4 + $0xe8] sm:$0xff] %vm359_vm0, %v3696_v18 }
  0x5e   : > { %3189 = vmatprep.mubr.msk.bf16.mxu0 %vm359_vm0, %v3384_v26  ;;  %390 = vst.msk [vmem:[#allocation4 + $0xf0] sm:$0xff] %vm359_vm0, %v3696_v18  ;;  %391 = vst.msk [vmem:[#allocation4 + $0xf8] sm:$0xff] %vm359_vm0, %v3696_v18 }
  0x65   : > { %3190 = vmatmul.mubr.msk.bf16.gmra.mrb[8].mxu0 %vm359_vm0, %v3384_v26 }
  0x66   : > { %3191 = vmatprep.mubr.msk.bf16.mxu0 %vm359_vm0, %v3385_v27 }
  0x6d   : > { %3192 = vmatmul.mubr.msk.bf16.gmra.mrb[12].mxu0 %vm359_vm0, %v3385_v27 }
  0x6e   : > { %3193 = vmatprep.mubr.msk.bf16.mxu0 %vm359_vm0, %v3386_v28 }
  0x75   : > { %3194 = vmatmul.mubr.msk.bf16.gmra.mrb[16].mxu0 %vm359_vm0, %v3386_v28 }
  0x76   : > { %3195 = vmatprep.mubr.msk.bf16.mxu0 %vm359_vm0, %v3387_v29 }
  0x7d   : > { %3196 = vmatmul.mubr.msk.bf16.gmra.mrb[20].mxu0 %vm359_vm0, %v3387_v29 }
  0x7e   : > { %3197 = vmatprep.mubr.msk.bf16.mxu0 %vm359_vm0, %v3388_v30 }
  0x85   : > { %3198 = vmatmul.mubr.msk.bf16.gmra.mrb[24].mxu0 %vm359_vm0, %v3388_v30 }
  0x86   : > { %3199 = vmatprep.mubr.msk.bf16.mxu0 %vm359_vm0, %v3389_v31 }
  0x8d   : > { %3200 = vmatmul.mubr.msk.bf16.gmra.mrb[28].mxu0 %vm359_vm0, %v3389_v31 }
  0x8e   : > { %3201 = vmatprep.mubr.msk.bf16.mxu0 %vm359_vm0, %v3390_v32 }
  0x95   : > { %3202 = vmatmul.mubr.msk.bf16.gmra.mrb[32].mxu0 %vm359_vm0, %v3390_v32 }
  0x96   : > { %3203 = vmatprep.mubr.msk.bf16.mxu0 %vm359_vm0, %v3391_v33 }
  0x9d   : > { %3204 = vmatmul.mubr.msk.bf16.gmra.mrb[36].mxu0 %vm359_vm0, %v3391_v33 }
  0x9e   : > { %3205 = vmatprep.mubr.msk.bf16.mxu0 %vm359_vm0, %v3392_v34 }
  0xa5   : > { %3206 = vmatmul.mubr.msk.bf16.gmra.mrb[40].mxu0 %vm359_vm0, %v3392_v34 }
  0xa6   : > { %3207 = vmatprep.mubr.msk.bf16.mxu0 %vm359_vm0, %v3393_v35 }
  0xad   : > { %3208 = vmatmul.mubr.msk.bf16.gmra.mrb[44].mxu0 %vm359_vm0, %v3393_v35 }
  0xae   : > { %3209 = vmatprep.mubr.msk.bf16.mxu0 %vm359_vm0, %v3394_v36 }
  0xb5   : > { %3210 = vmatmul.mubr.msk.bf16.gmra.mrb[48].mxu0 %vm359_vm0, %v3394_v36 }
  0xb6   : > { %3211 = vmatprep.mubr.msk.bf16.mxu0 %vm359_vm0, %v3395_v37 }
  0xbd   : > { %3212 = vmatmul.mubr.msk.bf16.gmra.mrb[52].mxu0 %vm359_vm0, %v3395_v37 }
  0xbe   : > { %3213 = vmatprep.mubr.msk.bf16.mxu0 %vm359_vm0, %v3396_v38 }
  0xc5   : > { %3214 = vmatmul.mubr.msk.bf16.gmra.mrb[56].mxu0 %vm359_vm0, %v3396_v38 }
  0xc6   : > { %3215 = vmatprep.mubr.msk.bf16.mxu0 %vm359_vm0, %v3397_v39 }
  0xcd   : > { %3216 = vmatmul.mubr.msk.bf16.gmra.mrb[60].mxu0 %vm359_vm0, %v3397_v39 }
 0x128   : > { %v747_v40 = vpop.f32.mrb[0].mxu0 }
 0x129   : > { %v3829_v41 = vmul.f32 0.125, %v747_v40  ;;  %v749_v42 = vpop.f32.mrb[1].mxu0 }
 0x12a   : > { %v3863_v44 = vmul.f32 0.125, %v749_v42  ;;  %v751_v45 = vpop.f32.mrb[2].mxu0 }
 0x12b   : > { %v753_v46 = vpop.f32.mrb[3].mxu0  ;;  %v3865_v47 = vmul.f32 0.125, %v751_v45 }
 0x12c   : > { %v3867_v48 = vmul.f32 0.125, %v753_v46  ;;  %v1002_v49 = vmax.f32 %v3829_v41, %v3863_v44 }
 0x12e   : > { %1003 = vmax.xlane.f32.xlu0 %v1002_v49  ;;  %v1005_v51 = vmax.f32 %v3865_v47, %v3867_v48 }
 0x130   : > { %v757_v50 = vpop.f32.mrb[4].mxu0 }
 0x131   : > { %v3873_v52 = vmul.f32 0.125, %v757_v50  ;;  %v759_v53 = vpop.f32.mrb[5].mxu0 }
 0x132   : > { %v3875_v54 = vmul.f32 0.125, %v759_v53  ;;  %1006 = vmax.xlane.f32.xlu0 %v1005_v51  ;;  %v761_v55 = vpop.f32.mrb[6].mxu0 }
 0x133   : > { %v763_v56 = vpop.f32.mrb[7].mxu0  ;;  %v3877_v57 = vmul.f32 0.125, %v761_v55 }
 0x134   : > { %v3879_v58 = vmul.f32 0.125, %v763_v56  ;;  %v1008_v59 = vmax.f32 %v3873_v52, %v3875_v54 }
 0x136   : > { %1009 = vmax.xlane.f32.xlu1 %v1008_v59  ;;  %v1011_v61 = vmax.f32 %v3877_v57, %v3879_v58 }
 0x138   : > { %v767_v60 = vpop.f32.mrb[8].mxu0 }
 0x139   : > { %v3885_v62 = vmul.f32 0.125, %v767_v60  ;;  %v769_v63 = vpop.f32.mrb[9].mxu0 }
 0x13a   : > { %v3887_v0 = vmul.f32 0.125, %v769_v63  ;;  %1012 = vmax.xlane.f32.xlu1 %v1011_v61  ;;  %v771_v1 = vpop.f32.mrb[10].mxu0 }
 0x13b   : > { %v3889_v2 = vmul.f32 0.125, %v771_v1  ;;  %v773_v3 = vpop.f32.mrb[11].mxu0 }
 0x13c   : > { %v3891_v4 = vmul.f32 0.125, %v773_v3  ;;  %v1014_v5 = vmax.f32 %v3885_v62, %v3887_v0 }
 0x13d   : > { %5283 = vst [vmem:[#allocation5_spill] sm:$0xff] %v3889_v2 }
 0x13e   : > { %5284 = vst [vmem:[#allocation6_spill] sm:$0xff] %v3891_v4  ;;  %1015 = vmax.xlane.f32.xlu0 %v1014_v5  ;;  %v1017_v7 = vmax.f32 %v3889_v2, %v3891_v4 }
 0x140   : > { %1018 = vmax.xlane.f32.xlu1 %v1017_v7  ;;  %v777_v8 = vpop.f32.mrb[12].mxu0 }
 0x141   : > { %v3897_v9 = vmul.f32 0.125, %v777_v8  ;;  %v779_v10 = vpop.f32.mrb[13].mxu0 }
 0x142   : > { %v3899_v11 = vmul.f32 0.125, %v779_v10  ;;  %v781_v12 = vpop.f32.mrb[14].mxu0 }
 0x143   : > { %5285 = vst [vmem:[#allocation7_spill] sm:$0xff] %v3897_v9  ;;  %v3901_v13 = vmul.f32 0.125, %v781_v12  ;;  %v783_v14 = vpop.f32.mrb[15].mxu0 }
 0x144   : > { %5286 = vst [vmem:[#allocation8_spill] sm:$0xff] %v3899_v11  ;;  %v3903_v15 = vmul.f32 0.125, %v783_v14  ;;  %v1020_v16 = vmax.f32 %v3897_v9, %v3899_v11  ;;  %v4448_v11 = vld [vmem:[#allocation2 + $0xc8] sm:$0xff]  ;;  %v4462_v9 = vld [vmem:[#allocation2 + $0xd0] sm:$0xff] }
 0x145   : > { %5287 = vst [vmem:[#allocation9_spill] sm:$0xff] %v3901_v13  ;;  %5342 = vst [vmem:[#allocation64_spill] sm:$0xff] %v4448_v11 }
 0x146   : > { %5288 = vst [vmem:[#allocation10_spill] sm:$0xff] %v3903_v15  ;;  %1021 = vmax.xlane.f32.xlu0 %v1020_v16  ;;  %v1023_v17 = vmax.f32 %v3901_v13, %v3903_v15  ;;  %5345 = vst [vmem:[#allocation67_spill] sm:$0xff] %v4462_v9 }
 0x148   : > { %1024 = vmax.xlane.f32.xlu1 %v1023_v17  ;;  %v787_v19 = vpop.f32.mrb[16].mxu0 }
 0x149   : > { %v4040_v20 = vmul.f32 0.125, %v787_v19  ;;  %v789_v21 = vpop.f32.mrb[17].mxu0 }
 0x14a   : > { %v4042_v22 = vmul.f32 0.125, %v789_v21  ;;  %v791_v23 = vpop.f32.mrb[18].mxu0 }
 0x14b   : > { %5289 = vst [vmem:[#allocation11_spill] sm:$0xff] %v4040_v20  ;;  %v4044_v24 = vmul.f32 0.125, %v791_v23  ;;  %v793_v25 = vpop.f32.mrb[19].mxu0 }
 0x14c   : > { %5290 = vst [vmem:[#allocation12_spill] sm:$0xff] %v4042_v22  ;;  %v4046_v26 = vmul.f32 0.125, %v793_v25  ;;  %v1026_v27 = vmax.f32 %v4040_v20, %v4042_v22  ;;  %v4428_v20 = vld [vmem:[#allocation2 + $0xb8] sm:$0xff] }
 0x14d   : > { %5291 = vst [vmem:[#allocation13_spill] sm:$0xff] %v4044_v24  ;;  %5338 = vst [vmem:[#allocation60_spill] sm:$0xff] %v4428_v20 }
 0x14e   : > { %5292 = vst [vmem:[#allocation14_spill] sm:$0xff] %v4046_v26  ;;  %1027 = vmax.xlane.f32.xlu0 %v1026_v27  ;;  %v1029_v28 = vmax.f32 %v4044_v24, %v4046_v26 }
 0x150   : > { %1030 = vmax.xlane.f32.xlu1 %v1029_v28  ;;  %v797_v29 = vpop.f32.mrb[20].mxu0 }
 0x151   : > { %v4052_v30 = vmul.f32 0.125, %v797_v29  ;;  %v799_v31 = vpop.f32.mrb[21].mxu0 }
 0x152   : > { %v4054_v32 = vmul.f32 0.125, %v799_v31  ;;  %v801_v33 = vpop.f32.mrb[22].mxu0 }
 0x153   : > { %5293 = vst [vmem:[#allocation15_spill] sm:$0xff] %v4052_v30  ;;  %v4056_v34 = vmul.f32 0.125, %v801_v33  ;;  %v803_v35 = vpop.f32.mrb[23].mxu0 }
 0x154   : > { %5294 = vst [vmem:[#allocation16_spill] sm:$0xff] %v4054_v32  ;;  %v4058_v36 = vmul.f32 0.125, %v803_v35  ;;  %v1032_v37 = vmax.f32 %v4052_v30, %v4054_v32  ;;  %v4408_v30 = vld [vmem:[#allocation2 + $0xa8] sm:$0xff] }
 0x155   : > { %5295 = vst [vmem:[#allocation17_spill] sm:$0xff] %v4056_v34 }
 0x156   : > { %5296 = vst [vmem:[#allocation18_spill] sm:$0xff] %v4058_v36  ;;  %1033 = vmax.xlane.f32.xlu0 %v1032_v37  ;;  %v1035_v38 = vmax.f32 %v4056_v34, %v4058_v36 }
 0x158   : > { %1036 = vmax.xlane.f32.xlu1 %v1035_v38  ;;  %v807_v39 = vpop.f32.mrb[24].mxu0 }
 0x159   : > { %v4064_v40 = vmul.f32 0.125, %v807_v39  ;;  %v809_v42 = vpop.f32.mrb[25].mxu0 }
 0x15a   : > { %v4066_v43 = vmul.f32 0.125, %v809_v42  ;;  %v811_v45 = vpop.f32.mrb[26].mxu0 }
 0x15b   : > { %5297 = vst [vmem:[#allocation19_spill] sm:$0xff] %v4064_v40  ;;  %v4068_v46 = vmul.f32 0.125, %v811_v45  ;;  %v813_v49 = vpop.f32.mrb[27].mxu0 }
 0x15c   : > { %5298 = vst [vmem:[#allocation20_spill] sm:$0xff] %v4066_v43  ;;  %v4070_v50 = vmul.f32 0.125, %v813_v49  ;;  %v1038_v51 = vmax.f32 %v4064_v40, %v4066_v43  ;;  %v4388_v40 = vld [vmem:[#allocation2 + $0x98] sm:$0xff] }
 0x15d   : > { %5299 = vst [vmem:[#allocation21_spill] sm:$0xff] %v4068_v46 }
 0x15e   : > { %5300 = vst [vmem:[#allocation22_spill] sm:$0xff] %v4070_v50  ;;  %1039 = vmax.xlane.f32.xlu0 %v1038_v51  ;;  %v1041_v53 = vmax.f32 %v4068_v46, %v4070_v50 }
 0x160   : > { %1042 = vmax.xlane.f32.xlu1 %v1041_v53  ;;  %v817_v55 = vpop.f32.mrb[28].mxu0 }
 0x161   : > { %v4076_v56 = vmul.f32 0.125, %v817_v55  ;;  %v819_v59 = vpop.f32.mrb[29].mxu0 }
 0x162   : > { %v4078_v60 = vmul.f32 0.125, %v819_v59  ;;  %v821_v61 = vpop.f32.mrb[30].mxu0 }
 0x163   : > { %5301 = vst [vmem:[#allocation23_spill] sm:$0xff] %v4076_v56  ;;  %v4080_v63 = vmul.f32 0.125, %v821_v61  ;;  %v823_v1 = vpop.f32.mrb[31].mxu0 }
 0x164   : > { %5302 = vst [vmem:[#allocation24_spill] sm:$0xff] %v4078_v60  ;;  %v4082_v3 = vmul.f32 0.125, %v823_v1  ;;  %v1044_v5 = vmax.f32 %v4076_v56, %v4078_v60  ;;  %v4368_v56 = vld [vmem:[#allocation2 + $0x88] sm:$0xff] }
 0x165   : > { %5303 = vst [vmem:[#allocation25_spill] sm:$0xff] %v4080_v63 }
 0x166   : > { %5304 = vst [vmem:[#allocation26_spill] sm:$0xff] %v4082_v3  ;;  %1045 = vmax.xlane.f32.xlu0 %v1044_v5  ;;  %v1047_v6 = vmax.f32 %v4080_v63, %v4082_v3 }
 0x168   : > { %1048 = vmax.xlane.f32.xlu1 %v1047_v6  ;;  %v827_v7 = vpop.f32.mrb[32].mxu0 }
 0x169   : > { %v4088_v8 = vmul.f32 0.125, %v827_v7  ;;  %v829_v10 = vpop.f32.mrb[33].mxu0 }
 0x16a   : > { %v4090_v12 = vmul.f32 0.125, %v829_v10  ;;  %v831_v14 = vpop.f32.mrb[34].mxu0 }
 0x16b   : > { %5305 = vst [vmem:[#allocation27_spill] sm:$0xff] %v4088_v8  ;;  %v4092_v16 = vmul.f32 0.125, %v831_v14  ;;  %v833_v17 = vpop.f32.mrb[35].mxu0 }
 0x16c   : > { %5306 = vst [vmem:[#allocation28_spill] sm:$0xff] %v4090_v12  ;;  %v4094_v18 = vmul.f32 0.125, %v833_v17  ;;  %v1050_v19 = vmax.f32 %v4088_v8, %v4090_v12  ;;  %v4348_v8 = vld [vmem:[#allocation2 + $0x78] sm:$0xff] }
 0x16d   : > { %5307 = vst [vmem:[#allocation29_spill] sm:$0xff] %v4092_v16 }
 0x16e   : > { %5308 = vst [vmem:[#allocation30_spill] sm:$0xff] %v4094_v18  ;;  %1051 = vmax.xlane.f32.xlu0 %v1050_v19  ;;  %v1053_v21 = vmax.f32 %v4092_v16, %v4094_v18 }
 0x170   : > { %1054 = vmax.xlane.f32.xlu1 %v1053_v21  ;;  %v837_v23 = vpop.f32.mrb[36].mxu0 }
 0x171   : > { %v4100_v25 = vmul.f32 0.125, %v837_v23  ;;  %v839_v27 = vpop.f32.mrb[37].mxu0 }
 0x172   : > { %v4102_v28 = vmul.f32 0.125, %v839_v27  ;;  %v841_v29 = vpop.f32.mrb[38].mxu0 }
 0x173   : > { %5309 = vst [vmem:[#allocation31_spill] sm:$0xff] %v4100_v25  ;;  %v4104_v31 = vmul.f32 0.125, %v841_v29  ;;  %v843_v33 = vpop.f32.mrb[39].mxu0 }
 0x174   : > { %5310 = vst [vmem:[#allocation32_spill] sm:$0xff] %v4102_v28  ;;  %v4106_v35 = vmul.f32 0.125, %v843_v33  ;;  %v1056_v37 = vmax.f32 %v4100_v25, %v4102_v28  ;;  %v4328_v25 = vld [vmem:[#allocation2 + $0x68] sm:$0xff] }
 0x175   : > { %5311 = vst [vmem:[#allocation33_spill] sm:$0xff] %v4104_v31 }
 0x176   : > { %5312 = vst [vmem:[#allocation34_spill] sm:$0xff] %v4106_v35  ;;  %1057 = vmax.xlane.f32.xlu0 %v1056_v37  ;;  %v1059_v38 = vmax.f32 %v4104_v31, %v4106_v35 }
 0x178   : > { %1060 = vmax.xlane.f32.xlu1 %v1059_v38  ;;  %v847_v39 = vpop.f32.mrb[40].mxu0 }
 0x179   : > { %v4112_v42 = vmul.f32 0.125, %v847_v39  ;;  %v849_v45 = vpop.f32.mrb[41].mxu0 }
 0x17a   : > { %v4114_v49 = vmul.f32 0.125, %v849_v45  ;;  %v851_v51 = vpop.f32.mrb[42].mxu0 }
 0x17b   : > { %5313 = vst [vmem:[#allocation35_spill] sm:$0xff] %v4112_v42  ;;  %v4116_v53 = vmul.f32 0.125, %v851_v51  ;;  %v853_v55 = vpop.f32.mrb[43].mxu0 }
 0x17c   : > { %5314 = vst [vmem:[#allocation36_spill] sm:$0xff] %v4114_v49  ;;  %v4118_v59 = vmul.f32 0.125, %v853_v55  ;;  %v1062_v61 = vmax.f32 %v4112_v42, %v4114_v49  ;;  %v4308_v42 = vld [vmem:[#allocation2 + $0x58] sm:$0xff] }
 0x17d   : > { %5315 = vst [vmem:[#allocation37_spill] sm:$0xff] %v4116_v53 }
 0x17e   : > { %5316 = vst [vmem:[#allocation38_spill] sm:$0xff] %v4118_v59  ;;  %1063 = vmax.xlane.f32.xlu0 %v1062_v61  ;;  %v1065_v1 = vmax.f32 %v4116_v53, %v4118_v59 }
 0x180   : > { %1066 = vmax.xlane.f32.xlu1 %v1065_v1  ;;  %v857_v5 = vpop.f32.mrb[44].mxu0 }
 0x181   : > { %v4124_v6 = vmul.f32 0.125, %v857_v5  ;;  %v859_v7 = vpop.f32.mrb[45].mxu0 }
 0x182   : > { %v4126_v10 = vmul.f32 0.125, %v859_v7  ;;  %v861_v14 = vpop.f32.mrb[46].mxu0 }
 0x183   : > { %5317 = vst [vmem:[#allocation39_spill] sm:$0xff] %v4124_v6  ;;  %v4128_v17 = vmul.f32 0.125, %v861_v14  ;;  %v863_v19 = vpop.f32.mrb[47].mxu0 }
 0x184   : > { %5318 = vst [vmem:[#allocation40_spill] sm:$0xff] %v4126_v10  ;;  %v4130_v21 = vmul.f32 0.125, %v863_v19  ;;  %v1068_v23 = vmax.f32 %v4124_v6, %v4126_v10  ;;  %v4265_v6 = vld [vmem:[#allocation2 + $0x30] sm:$0xff] }
 0x185   : > { %5319 = vst [vmem:[#allocation41_spill] sm:$0xff] %v4128_v17 }
 0x186   : > { %5320 = vst [vmem:[#allocation42_spill] sm:$0xff] %v4130_v21  ;;  %1069 = vmax.xlane.f32.xlu0 %v1068_v23  ;;  %v1071_v27 = vmax.f32 %v4128_v17, %v4130_v21  ;;  %v3411_v21 = vld [vmem:[%s4188_s25 + $0x30] sm:$0xff]  }
 0x188   : > { %1072 = vmax.xlane.f32.xlu1 %v1071_v27  ;;  %v867_v29 = vpop.f32.mrb[48].mxu0 }
 0x189   : > { %v4136_v33 = vmul.f32 0.125, %v867_v29  ;;  %v869_v37 = vpop.f32.mrb[49].mxu0 }
 0x18a   : > { %v4138_v38 = vmul.f32 0.125, %v869_v37  ;;  %v871_v39 = vpop.f32.mrb[50].mxu0 }
 0x18b   : > { %5321 = vst [vmem:[#allocation43_spill] sm:$0xff] %v4136_v33  ;;  %v4140_v45 = vmul.f32 0.125, %v871_v39  ;;  %v873_v51 = vpop.f32.mrb[51].mxu0 }
 0x18c   : > { %5322 = vst [vmem:[#allocation44_spill] sm:$0xff] %v4138_v38  ;;  %v4142_v55 = vmul.f32 0.125, %v873_v51  ;;  %v1074_v61 = vmax.f32 %v4136_v33, %v4138_v38  ;;  %v4237_v33 = vld [vmem:[#allocation2 + $0x20] sm:$0xff] }
 0x18d   : > { %5323 = vst [vmem:[#allocation45_spill] sm:$0xff] %v4140_v45 }
 0x18e   : > { %5324 = vst [vmem:[#allocation46_spill] sm:$0xff] %v4142_v55  ;;  %1075 = vmax.xlane.f32.xlu0 %v1074_v61  ;;  %v1077_v1 = vmax.f32 %v4140_v45, %v4142_v55 }
 0x190   : > { %1078 = vmax.xlane.f32.xlu1 %v1077_v1  ;;  %v877_v5 = vpop.f32.mrb[52].mxu0 }
 0x191   : > { %v4148_v7 = vmul.f32 0.125, %v877_v5  ;;  %v879_v14 = vpop.f32.mrb[53].mxu0 }
 0x192   : > { %v4150_v19 = vmul.f32 0.125, %v879_v14  ;;  %v881_v23 = vpop.f32.mrb[54].mxu0 }
 0x193   : > { %5325 = vst [vmem:[#allocation47_spill] sm:$0xff] %v4148_v7  ;;  %v4152_v27 = vmul.f32 0.125, %v881_v23  ;;  %v883_v29 = vpop.f32.mrb[55].mxu0 }
 0x194   : > { %5326 = vst [vmem:[#allocation48_spill] sm:$0xff] %v4150_v19  ;;  %v4154_v37 = vmul.f32 0.125, %v883_v29  ;;  %v1080_v39 = vmax.f32 %v4148_v7, %v4150_v19 }
 0x195   : > { %5327 = vst [vmem:[#allocation49_spill] sm:$0xff] %v4152_v27 }
 0x196   : > { %5328 = vst [vmem:[#allocation50_spill] sm:$0xff] %v4154_v37  ;;  %1081 = vmax.xlane.f32.xlu0 %v1080_v39  ;;  %v1083_v51 = vmax.f32 %v4152_v27, %v4154_v37 }
 0x198   : > { %1084 = vmax.xlane.f32.xlu1 %v1083_v51  ;;  %v887_v61 = vpop.f32.mrb[56].mxu0 }
 0x199   : > { %v4160_v1 = vmul.f32 0.125, %v887_v61  ;;  %v889_v5 = vpop.f32.mrb[57].mxu0 }
 0x19a   : > { %v4162_v14 = vmul.f32 0.125, %v889_v5  ;;  %v891_v55 = vpop.f32.mrb[58].mxu0 }
 0x19b   : > { %5329 = vst [vmem:[#allocation51_spill] sm:$0xff] %v4160_v1  ;;  %v4164_v23 = vmul.f32 0.125, %v891_v55  ;;  %v893_v45 = vpop.f32.mrb[59].mxu0 }
 0x19c   : > { %5330 = vst [vmem:[#allocation52_spill] sm:$0xff] %v4162_v14  ;;  %v4166_v29 = vmul.f32 0.125, %v893_v45  ;;  %v1086_v7 = vmax.f32 %v4160_v1, %v4162_v14  ;;  %v3409_v14 = vld [vmem:[%s4188_s25 + $0x28] sm:$0xff]  }
 0x19d   : > { %5331 = vst [vmem:[#allocation53_spill] sm:$0xff] %v4164_v23 }
 0x19e   : > { %5332 = vst [vmem:[#allocation54_spill] sm:$0xff] %v4166_v29  ;;  %1087 = vmax.xlane.f32.xlu0 %v1086_v7  ;;  %v1089_v39 = vmax.f32 %v4164_v23, %v4166_v29  ;;  %v3407_v29 = vld [vmem:[%s4188_s25 + $0x20] sm:$0xff]   ;;  %v4225_v23 = vld [vmem:[#allocation2 + $0x18] sm:$0xff] }
 0x1a0   : > { %1090 = vmax.xlane.f32.xlu1 %v1089_v39  ;;  %v897_v51 = vpop.f32.mrb[60].mxu0  ;;  %v3398_v39 = vld [vmem:[%s4188_s25 + $0x40] sm:$0xff]  }
 0x1a1   : > { %v4172_v61 = vmul.f32 0.125, %v897_v51  ;;  %v899_v5 = vpop.f32.mrb[61].mxu0  ;;  %3217 = vmatprep.subr.bf16.mxu1 %v3398_v39  ;;  %v3399_v51 = vld [vmem:[%s4188_s25] sm:$0xff]  }
 0x1a2   : > { %v4174_v37 = vmul.f32 0.125, %v899_v5  ;;  %v901_v55 = vpop.f32.mrb[62].mxu0  ;;  %3218 = vmatpush3.bf16.msra.mxu1 %v3399_v51  ;;  %v4193_v5 = vld [vmem:[#allocation2] sm:$0xff] }
 0x1a3   : > { %5333 = vst [vmem:[#allocation55_spill] sm:$0xff] %v4172_v61  ;;  %v4176_v27 = vmul.f32 0.125, %v901_v55  ;;  %v903_v45 = vpop.f32.mrb[63].mxu0  ;;  %v3401_v55 = vld [vmem:[%s4188_s25 + $0x8] sm:$0xff]   ;;  %v3406_v39 = vld [vmem:[%s4188_s25 + $0x60] sm:$0xff]  }
 0x1a4   : > { %5334 = vst [vmem:[#allocation56_spill] sm:$0xff] %v4174_v37  ;;  %v4178_v19 = vmul.f32 0.125, %v903_v45  ;;  %v1092_v1 = vmax.f32 %v4172_v61, %v4174_v37  ;;  %v3402_v45 = vld [vmem:[%s4188_s25 + $0x50] sm:$0xff]   ;;  %v3405_v37 = vld [vmem:[%s4188_s25 + $0x18] sm:$0xff]  }
 0x1a5   : > { %5335 = vst [vmem:[#allocation57_spill] sm:$0xff] %v4176_v27 }
 0x1a6   : > { %5336 = vst [vmem:[#allocation58_spill] sm:$0xff] %v4178_v19  ;;  %1093 = vmax.xlane.f32.xlu0 %v1092_v1  ;;  %v1095_v7 = vmax.f32 %v4176_v27, %v4178_v19  ;;  %v3400_v1 = vld [vmem:[%s4188_s25 + $0x48] sm:$0xff]   ;;  %v3403_v27 = vld [vmem:[%s4188_s25 + $0x10] sm:$0xff]  }
 0x1a7   : > { %3219 = vmatprep.subr.bf16.mxu1 %v3400_v1  ;;  %v4197_v19 = vld [vmem:[#allocation2 + $0x8] sm:$0xff]  ;;  %v3404_v1 = vld [vmem:[%s4188_s25 + $0x58] sm:$0xff]  }
 0x1a8   : > { %1096 = vmax.xlane.f32.xlu1 %v1095_v7  ;;  %3220 = vmatpush3.bf16.msra.mxu1 %v3401_v55 }
 0x1a9   : > { %3221 = vmatprep.subr.bf16.mxu1 %v3402_v45  ;;  %v3408_v45 = vld [vmem:[%s4188_s25 + $0x68] sm:$0xff]  }
 0x1ac   : > { %3222 = vmatpush3.bf16.msra.mxu1 %v3403_v27 }
 0x1ad   : > { %3223 = vmatprep.subr.bf16.mxu1 %v3404_v1  ;;  %v4244_v1 = vld [vmem:[#allocation2 + $0x28] sm:$0xff] }
 0x1b0   : > { %3224 = vmatpush3.bf16.msra.mxu1 %v3405_v37 }
 0x1b1   : > { %3225 = vmatprep.subr.bf16.mxu1 %v3406_v39 }
 0x1b4   : > { %3226 = vmatpush3.bf16.msra.mxu1 %v3407_v29 }
 0x1b5   : > { %3227 = vmatprep.subr.bf16.mxu1 %v3408_v45 }
 0x1b8   : > { %3228 = vmatpush3.bf16.msra.mxu1 %v3409_v14  ;;  %v3412_v14 = vld [vmem:[%s4188_s25 + $0x78] sm:$0xff]  }
 0x1bb   : > { %v1004_v7 = vpop.xlane.xlu0 %1003 }
 0x1bc   : > { %v4201_v61 = vmax.f32 %v4193_v5, %v1004_v7  ;;  %v4213_v7 = vld [vmem:[#allocation2 + $0x10] sm:$0xff] }
 0x1be   : > { %2412 = vst.msk [vmem:[#allocation2] sm:$0xff] %vm294_vm1, %v4201_v61  ;;  %1228 = vperm.xlu0 %3364, %v4201_v61  }
 0x1bf   : > { %v1007_v51 = vpop.xlane.xlu0 %1006 }
 0x1c0   : > { %v4210_v55 = vmax.f32 %v4197_v19, %v1007_v51 }
 0x1c2   : > { %2413 = vst.msk [vmem:[#allocation2 + $0x8] sm:$0xff] %vm294_vm1, %v4210_v55  ;;  %1233 = vperm.xlu1 %3365, %v4210_v55  }
 0x1c3   : > { %v1010_v27 = vpop.xlane.xlu1 %1009 }
 0x1c4   : > { %v4222_v51 = vmax.f32 %v4213_v7, %v1010_v27 }
 0x1c6   : > { %2414 = vst.msk [vmem:[#allocation2 + $0x10] sm:$0xff] %vm294_vm1, %v4222_v51  ;;  %1238 = vperm.xlu1 %3365, %v4222_v51  }
 0x1c7   : > { %v1013_v37 = vpop.xlane.xlu1 %1012 }
 0x1c8   : > { %v4234_v27 = vmax.f32 %v4225_v23, %v1013_v37  ;;  %v3410_v37 = vld [vmem:[%s4188_s25 + $0x70] sm:$0xff]  }
 0x1c9   : > { %3229 = vmatprep.subr.bf16.mxu1 %v3410_v37  ;;  %v3413_v37 = vld [vmem:[%s4188_s25 + $0x38] sm:$0xff]  }
 0x1ca   : > { %2415 = vst.msk [vmem:[#allocation2 + $0x18] sm:$0xff] %vm294_vm1, %v4234_v27  ;;  %1243 = vperm.xlu1 %3365, %v4234_v27   ;;  %3230 = vmatpush3.bf16.msra.mxu1 %v3411_v21 }
 0x1cb   : > { %v1016_v29 = vpop.xlane.xlu0 %1015  ;;  %3231 = vmatprep.subr.bf16.mxu1 %v3412_v14 }
 0x1cc   : > { %v4248_v38 = vmax.f32 %v4237_v33, %v1016_v29  ;;  %v4288_v29 = vld [vmem:[#allocation2 + $0x48] sm:$0xff] }
 0x1cd   : > { %v1019_v45 = vpop.xlane.xlu1 %1018 }
 0x1ce   : > { %2416 = vst.msk [vmem:[#allocation2 + $0x20] sm:$0xff] %vm294_vm1, %v4248_v38  ;;  %v4256_v17 = vmax.f32 %v4244_v1, %v1019_v45  ;;  %1248 = vperm.xlu1 %3365, %v4248_v38   ;;  %3232 = vmatpush3.bf16.msra.mxu1 %v3413_v37  ;;  %v4268_v45 = vld [vmem:[#allocation2 + $0x38] sm:$0xff] }
 0x1d0   : > { %2417 = vst.msk [vmem:[#allocation2 + $0x28] sm:$0xff] %vm294_vm1, %v4256_v17 }
 0x1d2   : > { %1253 = vperm.xlu1 %3365, %v4256_v17  }
 0x1d3   : > { %v1022_v39 = vpop.xlane.xlu0 %1021 }
 0x1d4   : > { %v4271_v10 = vmax.f32 %v4265_v6, %v1022_v39  ;;  %v4285_v39 = vld [vmem:[#allocation2 + $0x40] sm:$0xff] }
 0x1d5   : > { %v1025_v21 = vpop.xlane.xlu1 %1024 }
 0x1d6   : > { %2418 = vst.msk [vmem:[#allocation2 + $0x30] sm:$0xff] %vm294_vm1, %v4271_v10  ;;  %v4278_v59 = vmax.f32 %v4268_v45, %v1025_v21  ;;  %1258 = vperm.xlu1 %3365, %v4271_v10  }
 0x1d8   : > { %2419 = vst.msk [vmem:[#allocation2 + $0x38] sm:$0xff] %vm294_vm1, %v4278_v59 }
 0x1da   : > { %1263 = vperm.xlu1 %3365, %v4278_v59  }
 0x1db   : > { %v1028_v37 = vpop.xlane.xlu0 %1027 }
 0x1dc   : > { %v4291_v53 = vmax.f32 %v4285_v39, %v1028_v37  ;;  %v4306_v37 = vld [vmem:[#allocation2 + $0x50] sm:$0xff] }
 0x1dd   : > { %v1031_v21 = vpop.xlane.xlu1 %1030 }
 0x1de   : > { %2420 = vst.msk [vmem:[#allocation2 + $0x40] sm:$0xff] %vm294_vm1, %v4291_v53  ;;  %v4298_v14 = vmax.f32 %v4288_v29, %v1031_v21  ;;  %1268 = vperm.xlu1 %3365, %v4291_v53  }
 0x1e0   : > { %2421 = vst.msk [vmem:[#allocation2 + $0x48] sm:$0xff] %vm294_vm1, %v4298_v14  ;;  %1273 = vperm.xlu0 %3364, %v4298_v14  }
 0x1e3   : > { %v1034_v35 = vpop.xlane.xlu0 %1033 }
 0x1e4   : > { %v4311_v31 = vmax.f32 %v4306_v37, %v1034_v35  ;;  %v4326_v35 = vld [vmem:[#allocation2 + $0x60] sm:$0xff] }
 0x1e5   : > { %v1037_v21 = vpop.xlane.xlu1 %1036 }
 0x1e6   : > { %2422 = vst.msk [vmem:[#allocation2 + $0x50] sm:$0xff] %vm294_vm1, %v4311_v31  ;;  %v4318_v49 = vmax.f32 %v4308_v42, %v1037_v21  ;;  %1278 = vperm.xlu1 %3365, %v4311_v31  }
 0x1e8   : > { %2423 = vst.msk [vmem:[#allocation2 + $0x58] sm:$0xff] %vm294_vm1, %v4318_v49  ;;  %1283 = vperm.xlu0 %3364, %v4318_v49  }
 0x1eb   : > { %v1040_v18 = vpop.xlane.xlu0 %1039 }
 0x1ec   : > { %v4331_v16 = vmax.f32 %v4326_v35, %v1040_v18  ;;  %v4346_v18 = vld [vmem:[#allocation2 + $0x70] sm:$0xff] }
 0x1ed   : > { %v1043_v21 = vpop.xlane.xlu1 %1042 }
 0x1ee   : > { %2424 = vst.msk [vmem:[#allocation2 + $0x60] sm:$0xff] %vm294_vm1, %v4331_v16  ;;  %v4338_v28 = vmax.f32 %v4328_v25, %v1043_v21  ;;  %1288 = vperm.xlu1 %3365, %v4331_v16  }
 0x1f0   : > { %2425 = vst.msk [vmem:[#allocation2 + $0x68] sm:$0xff] %vm294_vm1, %v4338_v28  ;;  %1293 = vperm.xlu0 %3364, %v4338_v28  }
 0x1f3   : > { %v1046_v3 = vpop.xlane.xlu0 %1045 }
 0x1f4   : > { %v4351_v63 = vmax.f32 %v4346_v18, %v1046_v3  ;;  %v4366_v3 = vld [vmem:[#allocation2 + $0x80] sm:$0xff] }
 0x1f5   : > { %v1049_v21 = vpop.xlane.xlu1 %1048 }
 0x1f6   : > { %2426 = vst.msk [vmem:[#allocation2 + $0x70] sm:$0xff] %vm294_vm1, %v4351_v63  ;;  %v4358_v12 = vmax.f32 %v4348_v8, %v1049_v21  ;;  %1298 = vperm.xlu1 %3365, %v4351_v63  }
 0x1f8   : > { %2427 = vst.msk [vmem:[#allocation2 + $0x78] sm:$0xff] %vm294_vm1, %v4358_v12  ;;  %1303 = vperm.xlu0 %3364, %v4358_v12  }
 0x1fb   : > { %v1052_v50 = vpop.xlane.xlu0 %1051 }
 0x1fc   : > { %v4371_v46 = vmax.f32 %v4366_v3, %v1052_v50  ;;  %v4386_v50 = vld [vmem:[#allocation2 + $0x90] sm:$0xff] }
 0x1fd   : > { %v1055_v21 = vpop.xlane.xlu1 %1054 }
 0x1fe   : > { %2428 = vst.msk [vmem:[#allocation2 + $0x80] sm:$0xff] %vm294_vm1, %v4371_v46  ;;  %v4378_v60 = vmax.f32 %v4368_v56, %v1055_v21  ;;  %1308 = vperm.xlu1 %3365, %v4371_v46  }
 0x200   : > { %2429 = vst.msk [vmem:[#allocation2 + $0x88] sm:$0xff] %vm294_vm1, %v4378_v60  ;;  %1313 = vperm.xlu0 %3364, %v4378_v60  }
 0x203   : > { %v1058_v36 = vpop.xlane.xlu0 %1057 }
 0x204   : > { %v4391_v34 = vmax.f32 %v4386_v50, %v1058_v36  ;;  %v4406_v36 = vld [vmem:[#allocation2 + $0xa0] sm:$0xff] }
 0x205   : > { %v1061_v21 = vpop.xlane.xlu1 %1060 }
 0x206   : > { %2430 = vst.msk [vmem:[#allocation2 + $0x90] sm:$0xff] %vm294_vm1, %v4391_v34  ;;  %v4398_v43 = vmax.f32 %v4388_v40, %v1061_v21  ;;  %1318 = vperm.xlu1 %3365, %v4391_v34  }
 0x208   : > { %2431 = vst.msk [vmem:[#allocation2 + $0x98] sm:$0xff] %vm294_vm1, %v4398_v43  ;;  %1323 = vperm.xlu0 %3364, %v4398_v43  }
 0x20b   : > { %v1064_v26 = vpop.xlane.xlu0 %1063 }
 0x20c   : > { %v4411_v24 = vmax.f32 %v4406_v36, %v1064_v26  ;;  %v4426_v26 = vld [vmem:[#allocation2 + $0xb0] sm:$0xff] }
 0x20d   : > { %v1067_v21 = vpop.xlane.xlu1 %1066  ;;  %5337 = vst [vmem:[#allocation59_spill] sm:$0xff] %v4426_v26 }
 0x20e   : > { %2432 = vst.msk [vmem:[#allocation2 + $0xa0] sm:$0xff] %vm294_vm1, %v4411_v24  ;;  %v4418_v32 = vmax.f32 %v4408_v30, %v1067_v21  ;;  %1328 = vperm.xlu1 %3365, %v4411_v24  }
 0x210   : > { %2433 = vst.msk [vmem:[#allocation2 + $0xa8] sm:$0xff] %vm294_vm1, %v4418_v32  ;;  %1333 = vperm.xlu0 %3364, %v4418_v32  }
 0x213   : > { %v1070_v15 = vpop.xlane.xlu0 %1069 }
 0x214   : > { %v4431_v13 = vmax.f32 %v4426_v26, %v1070_v15  ;;  %v4446_v15 = vld [vmem:[#allocation2 + $0xc0] sm:$0xff] }
 0x215   : > { %v1073_v21 = vpop.xlane.xlu1 %1072  ;;  %5341 = vst [vmem:[#allocation63_spill] sm:$0xff] %v4446_v15 }
 0x216   : > { %5339 = vst [vmem:[#allocation61_spill] sm:$0xff] %v4431_v13  ;;  %2434 = vst.msk [vmem:[#allocation2 + $0xb0] sm:$0xff] %vm294_vm1, %v4431_v13  ;;  %v4438_v22 = vmax.f32 %v4428_v20, %v1073_v21  ;;  %1338 = vperm.xlu1 %3365, %v4431_v13   ;;  %v4464_v20 = vld [vmem:[#allocation2 + $0xd8] sm:$0xff] }
 0x217   : > { %5346 = vst [vmem:[#allocation68_spill] sm:$0xff] %v4464_v20 }
 0x218   : > { %5340 = vst [vmem:[#allocation62_spill] sm:$0xff] %v4438_v22  ;;  %2435 = vst.msk [vmem:[#allocation2 + $0xb8] sm:$0xff] %vm294_vm1, %v4438_v22  ;;  %1343 = vperm.xlu0 %3364, %v4438_v22  }
 0x21b   : > { %v1076_v4 = vpop.xlane.xlu0 %1075 }
 0x21c   : > { %v4451_v26 = vmax.f32 %v4446_v15, %v1076_v4 }
 0x21d   : > { %v1079_v21 = vpop.xlane.xlu1 %1078 }
 0x21e   : > { %5343 = vst [vmem:[#allocation65_spill] sm:$0xff] %v4451_v26  ;;  %2436 = vst.msk [vmem:[#allocation2 + $0xc0] sm:$0xff] %vm294_vm1, %v4451_v26  ;;  %v4456_v13 = vmax.f32 %v4448_v11, %v1079_v21  ;;  %1348 = vperm.xlu1 %3365, %v4451_v26   ;;  %v4478_v11 = vld [vmem:[#allocation2 + $0xe0] sm:$0xff]  ;;  %v4483_v26 = vld [vmem:[#allocation2 + $0xe8] sm:$0xff] }
 0x220   : > { %5344 = vst [vmem:[#allocation66_spill] sm:$0xff] %v4456_v13  ;;  %2437 = vst.msk [vmem:[#allocation2 + $0xc8] sm:$0xff] %vm294_vm1, %v4456_v13  ;;  %1353 = vperm.xlu0 %3364, %v4456_v13  }
 0x223   : > { %v1082_v22 = vpop.xlane.xlu0 %1081 }
 0x224   : > { %v4467_v4 = vmax.f32 %v4462_v9, %v1082_v22  ;;  %v5349_v22 = vsub.f32 %v4197_v19, %v4210_v55  ;;  %v5351_v19 = vsub.f32 %v4213_v7, %v4222_v51  ;;  %v4511_v7 = vld [vmem:[#allocation2 + $0xf8] sm:$0xff] }
 0x225   : > { %v1085_v15 = vpop.xlane.xlu1 %1084 }
 0x226   : > { %5347 = vst [vmem:[#allocation69_spill] sm:$0xff] %v4467_v4  ;;  %2438 = vst.msk [vmem:[#allocation2 + $0xd0] sm:$0xff] %vm294_vm1, %v4467_v4  ;;  %v4472_v21 = vmax.f32 %v4464_v20, %v1085_v15  ;;  %1358 = vperm.xlu1 %3365, %v4467_v4   ;;  %v1164_v9 = vmul.f32 1.442695, %v5349_v22  ;;  %v5350_v15 = vsub.f32 %v4193_v5, %v4201_v61  ;;  %v1166_v55 = vmul.f32 1.442695, %v5351_v19 }
 0x227   : > { %v4506_v5 = vld [vmem:[#allocation2 + $0xf0] sm:$0xff] }
 0x228   : > { %5348 = vst [vmem:[#allocation70_spill] sm:$0xff] %v4472_v21  ;;  %2439 = vst.msk [vmem:[#allocation2 + $0xd8] sm:$0xff] %vm294_vm1, %v4472_v21  ;;  %1363 = vperm.xlu0 %3364, %v4472_v21   ;;  %v1162_v20 = vmul.f32 1.442695, %v5350_v15  ;;  %3414 = vpow2.f32 %v1164_v9  ;;  %v5353_v9 = vsub.f32 %v4237_v33, %v4248_v38  ;;  %v5355_v33 = vsub.f32 %v4265_v6, %v4271_v10 }
 0x22a   : > { %3416 = vpow2.f32 %v1162_v20  ;;  %v5354_v20 = vsub.f32 %v4244_v1, %v4256_v17  ;;  %v1174_v38 = vmul.f32 1.442695, %v5355_v33  ;;  %v5356_v1 = vsub.f32 %v4268_v45, %v4278_v59 }
 0x22b   : > { %v1088_v13 = vpop.xlane.xlu0 %1087  ;;  %3418 = vpow2.f32 %v1166_v55 }
 0x22c   : > { %v4486_v2 = vmax.f32 %v4478_v11, %v1088_v13  ;;  %v5352_v13 = vsub.f32 %v4225_v23, %v4234_v27  ;;  %v1172_v15 = vmul.f32 1.442695, %v5354_v20  ;;  %v1176_v55 = vmul.f32 1.442695, %v5356_v1 }
 0x22d   : > { %v1091_v4 = vpop.xlane.xlu1 %1090 }
 0x22e   : > { %2440 = vst.msk [vmem:[#allocation2 + $0xe0] sm:$0xff] %vm294_vm1, %v4486_v2  ;;  %v4494_v21 = vmax.f32 %v4483_v26, %v1091_v4  ;;  %1368 = vperm.xlu1 %3365, %v4486_v2   ;;  %v1168_v61 = vmul.f32 1.442695, %v5352_v13  ;;  %v1170_v4 = vmul.f32 1.442695, %v5353_v9  ;;  %v5357_v13 = vsub.f32 %v4285_v39, %v4291_v53 }
 0x22f   : > { %v5360_v53 = vsub.f32 %v4308_v42, %v4318_v49 }
 0x230   : > { %2441 = vst.msk [vmem:[#allocation2 + $0xe8] sm:$0xff] %vm294_vm1, %v4494_v21  ;;  %1373 = vperm.xlu0 %3364, %v4494_v21   ;;  %3420 = vpow2.f32 %v1168_v61  ;;  %v1178_v6 = vmul.f32 1.442695, %v5357_v13  ;;  %v5358_v61 = vsub.f32 %v4288_v29, %v4298_v14 }
 0x231   : > { %3422 = vpow2.f32 %v1170_v4  ;;  %v5359_v4 = vsub.f32 %v4306_v37, %v4311_v31  ;;  %v1184_v45 = vmul.f32 1.442695, %v5360_v53  ;;  %v5361_v31 = vsub.f32 %v4326_v35, %v4331_v16 }
 0x232   : > { %v4533_v17 = vpop.eup %3414  ;;  %3424 = vpow2.f32 %v1172_v15  ;;  %v1180_v9 = vmul.f32 1.442695, %v5358_v61  ;;  %v5363_v35 = vsub.f32 %v4346_v18, %v4351_v63 }
 0x233   : > { %v1094_v22 = vpop.xlane.xlu0 %1093  ;;  %3426 = vpow2.f32 %v1174_v38  ;;  %v1186_v37 = vmul.f32 1.442695, %v5361_v31 }
 0x234   : > { %v4514_v51 = vmax.f32 %v4506_v5, %v1094_v22  ;;  %v4542_v10 = vpop.eup %3416  ;;  %v1182_v22 = vmul.f32 1.442695, %v5359_v4  ;;  %3428 = vpow2.f32 %v1176_v55  ;;  %v1190_v1 = vmul.f32 1.442695, %v5363_v35 }
 0x235   : > { %v1097_v23 = vpop.xlane.xlu1 %1096  ;;  %v4551_v59 = vpop.eup %3418  ;;  %3430 = vpow2.f32 %v1178_v6 }
 0x236   : > { %2442 = vst.msk [vmem:[#allocation2 + $0xf0] sm:$0xff] %vm294_vm1, %v4514_v51  ;;  %v4522_v27 = vmax.f32 %v4511_v7, %v1097_v23  ;;  %1378 = vperm.xlu1 %3365, %v4514_v51   ;;  %3432 = vpow2.f32 %v1180_v9  ;;  %v5365_v9 = vsub.f32 %v4366_v3, %v4371_v46 }
 0x237   : > { %3434 = vpow2.f32 %v1182_v22 }
 0x238   : > { %2443 = vst.msk [vmem:[#allocation2 + $0xf8] sm:$0xff] %vm294_vm1, %v4522_v27  ;;  %1383 = vperm.xlu0 %3364, %v4522_v27   ;;  %3436 = vpow2.f32 %v1184_v45  ;;  %v1194_v4 = vmul.f32 1.442695, %v5365_v9  ;;  %v5375_v9 = vld [vmem:[#allocation63_spill] sm:$0xff] }
 0x23a   : > { %1842 = vperm.xlu1 %3365, %v4533_v17   ;;  %v4559_v14 = vpop.eup %3420 }
 0x23b   : > { %v4565_v42 = vpop.eup %3422 }
 0x23c   : > { %1837 = vperm.xlu0 %3364, %v4542_v10   ;;  %v4573_v16 = vpop.eup %3424 }
 0x23d   : > { %v1229_v39 = vpop.permute.xlu0 %1228 }
 0x23e   : > { %v1386_v20 = vsub.f32 %v3829_v41, %v1229_v39  ;;  %v1387_v29 = vsub.f32 %v3863_v44, %v1229_v39  ;;  %1847 = vperm.xlu1 %3365, %v4551_v59   ;;  %v5362_v41 = vsub.f32 %v4328_v25, %v4338_v28  ;;  %v4579_v25 = vpop.eup %3426 }
 0x23f   : > { %v4587_v63 = vpop.eup %3428 }
 0x240   : > { %v1450_v15 = vmul.f32 1.442695, %v1386_v20  ;;  %v1452_v23 = vmul.f32 1.442695, %v1387_v29  ;;  %1852 = vperm.xlu0 %3364, %v4559_v14   ;;  %v1188_v44 = vmul.f32 1.442695, %v5362_v41  ;;  %v4589_v18 = vpop.eup %3430  ;;  %v5367_v29 = vsub.f32 %v4386_v50, %v4391_v34 }
 0x241   : > { %v1234_v49 = vpop.permute.xlu1 %1233  ;;  %v4595_v22 = vpop.eup %3432 }
 0x242   : > { %3438 = vpow2.f32 %v1450_v15  ;;  %v1388_v33 = vsub.f32 %v3865_v47, %v1234_v49  ;;  %v1389_v38 = vsub.f32 %v3867_v48, %v1234_v49  ;;  %1857 = vperm.xlu1 %3365, %v4565_v42   ;;  %v5364_v47 = vsub.f32 %v4348_v8, %v4358_v12  ;;  %v4600_v45 = vpop.eup %3434 }
 0x243   : > { %3440 = vpow2.f32 %v1452_v23  ;;  %v4605_v3 = vpop.eup %3436 }
 0x244   : > { %3442 = vpow2.f32 %v1186_v37  ;;  %v1454_v55 = vmul.f32 1.442695, %v1388_v33  ;;  %v1456_v13 = vmul.f32 1.442695, %v1389_v38  ;;  %1862 = vperm.xlu0 %3364, %v4573_v16   ;;  %v1192_v48 = vmul.f32 1.442695, %v5364_v47 }
 0x245   : > { %3444 = vpow2.f32 %v1188_v44  ;;  %v1239_v28 = vpop.permute.xlu1 %1238  ;;  %v5371_v47 = vld [vmem:[#allocation5_spill] sm:$0xff] }
 0x246   : > { %3446 = vpow2.f32 %v1454_v55  ;;  %v1390_v6 = vsub.f32 %v3873_v52, %v1239_v28  ;;  %v1391_v61 = vsub.f32 %v3875_v54, %v1239_v28  ;;  %1867 = vperm.xlu1 %3365, %v4579_v25   ;;  %v5366_v52 = vsub.f32 %v4368_v56, %v4378_v60  ;;  %v5372_v28 = vld [vmem:[#allocation6_spill] sm:$0xff] }
 0x247   : > { %3448 = vpow2.f32 %v1456_v13  ;;  %v1198_v56 = vmul.f32 1.442695, %v5367_v29  ;;  %v5380_v29 = vld [vmem:[#allocation62_spill] sm:$0xff] }
 0x248   : > { %3450 = vpow2.f32 %v1190_v1  ;;  %v1458_v8 = vmul.f32 1.442695, %v1390_v6  ;;  %v1460_v12 = vmul.f32 1.442695, %v1391_v61  ;;  %1872 = vperm.xlu0 %3364, %v4587_v63   ;;  %v1196_v54 = vmul.f32 1.442695, %v5366_v52 }
 0x249   : > { %3452 = vpow2.f32 %v1192_v48  ;;  %v1244_v53 = vpop.permute.xlu1 %1243  ;;  %v5374_v61 = vld [vmem:[#allocation65_spill] sm:$0xff] }
 0x24a   : > { %3454 = vpow2.f32 %v1458_v8  ;;  %v1392_v39 = vsub.f32 %v3877_v57, %v1244_v53  ;;  %v1393_v46 = vsub.f32 %v3879_v58, %v1244_v53  ;;  %1877 = vperm.xlu1 %3365, %v4589_v18   ;;  %v5368_v57 = vsub.f32 %v4388_v40, %v4398_v43  ;;  %v5376_v8 = vld [vmem:[#allocation59_spill] sm:$0xff] }
 0x24b   : > { %3456 = vpow2.f32 %v1460_v12  ;;  %v5369_v40 = vsub.f32 %v4406_v36, %v4411_v24  ;;  %v5377_v12 = vld [vmem:[#allocation61_spill] sm:$0xff] }
 0x24c   : > { %v3439_v20 = vpop.eup %3438  ;;  %3458 = vpow2.f32 %v1194_v4  ;;  %v1462_v60 = vmul.f32 1.442695, %v1392_v39  ;;  %v1464_v31 = vmul.f32 1.442695, %v1393_v46  ;;  %1882 = vperm.xlu0 %3364, %v4595_v22   ;;  %v1200_v58 = vmul.f32 1.442695, %v5368_v57 }
 0x24d   : > { %v3441_v37 = vpop.eup %3440  ;;  %3460 = vpow2.f32 %v1196_v54  ;;  %v1249_v15 = vpop.permute.xlu1 %1248  ;;  %v1202_v43 = vmul.f32 1.442695, %v5369_v40  ;;  %v1154_v4 = vsub.f32 %v5375_v9, %v5374_v61  ;;  %v5378_v52 = vsub.f32 %v5376_v8, %v5377_v12  ;;  %v5382_v57 = vld [vmem:[#allocation7_spill] sm:$0xff]  ;;  %v5390_v61 = vld [vmem:[#allocation70_spill] sm:$0xff]  ;;  %v5391_v9 = vld [vmem:[#allocation68_spill] sm:$0xff] }
 0x24e   : > { %v4614_v23 = vpop.eup %3442  ;;  %3462 = vpow2.f32 %v1462_v60  ;;  %v1394_v41 = vsub.f32 %v3885_v62, %v1249_v15  ;;  %v1395_v44 = vsub.f32 %v3887_v0, %v1249_v15  ;;  %1887 = vperm.xlu1 %3365, %v4600_v45   ;;  %v4619_v34 = vadd.f32 %v3441_v37, %v3439_v20  ;;  %v5383_v15 = vld [vmem:[#allocation8_spill] sm:$0xff]  ;;  %v5392_v8 = vld [vmem:[#allocation9_spill] sm:$0xff] }
 0x24f   : > { %v4621_v50 = vpop.eup %3444  ;;  %3464 = vpow2.f32 %v1464_v31  ;;  %v5370_v0 = vsub.f32 %v4408_v30, %v4418_v32  ;;  %v1206_v54 = vmul.f32 1.442695, %v5378_v52  ;;  %v1210_v40 = vmul.f32 1.442695, %v1154_v4  ;;  %v5393_v52 = vld [vmem:[#allocation10_spill] sm:$0xff] }
 0x250   : > { %v3447_v49 = vpop.eup %3446  ;;  %3466 = vpow2.f32 %v1198_v56  ;;  %v1466_v33 = vmul.f32 1.442695, %v1394_v41  ;;  %v1468_v38 = vmul.f32 1.442695, %v1395_v44  ;;  %1892 = vperm.xlu0 %3364, %v4605_v3   ;;  %v1157_v4 = vsub.f32 %v5391_v9, %v5390_v61 }
 0x251   : > { %v3449_v62 = vpop.eup %3448  ;;  %3468 = vpow2.f32 %v1200_v58  ;;  %v1204_v35 = vmul.f32 1.442695, %v5370_v0  ;;  %v1254_v1 = vpop.permute.xlu1 %1253  ;;  %v2027_v55 = vpack.c.bf16 %v3447_v49, %v3439_v20  ;;  %v5379_v20 = vld [vmem:[#allocation60_spill] sm:$0xff]  ;;  %v1159_v61 = vsub.f32 %v4483_v26, %v4494_v21 }
 0x252   : > { %v4630_v13 = vpop.eup %3450  ;;  %3470 = vpow2.f32 %v1466_v33  ;;  %v1396_v48 = vsub.f32 %v5371_v47, %v1254_v1  ;;  %v1397_v24 = vsub.f32 %v5372_v28, %v1254_v1  ;;  %1897 = vperm.xlu1 %3365, %v4614_v23   ;;  %v2028_v36 = vpack.c.bf16 %v3449_v62, %v3441_v37  ;;  %v5385_v33 = vld [vmem:[#allocation66_spill] sm:$0xff]  ;;  %v5387_v1 = vld [vmem:[#allocation69_spill] sm:$0xff] }
 0x253   : > { %v4635_v6 = vpop.eup %3452  ;;  %3472 = vpow2.f32 %v1468_v38  ;;  %v4639_v30 = vadd.f32 %v3449_v62, %v3447_v49  ;;  %v5381_v56 = vsub.f32 %v5379_v20, %v5380_v29  ;;  %v5386_v38 = vld [vmem:[#allocation64_spill] sm:$0xff]  ;;  %v1158_v20 = vsub.f32 %v4478_v11, %v4486_v2 }
 0x254   : > { %5373 = vst [vmem:[#allocation5_spill] sm:$0xff] %v4635_v6  ;;  %v3455_v32 = vpop.eup %3454  ;;  %3474 = vpow2.f32 %v1202_v43  ;;  %v1470_v53 = vmul.f32 1.442695, %v1396_v48  ;;  %v1472_v39 = vmul.f32 1.442695, %v1397_v24  ;;  %2219 = vmatprep.mubr.bf16.mxu1 %v2028_v36  ;;  %1902 = vperm.xlu0 %3364, %v4621_v50   ;;  %v1155_v62 = vsub.f32 %v5386_v38, %v5385_v33  ;;  %v5396_v2 = vld [vmem:[#allocation12_spill] sm:$0xff] }
 0x255   : > { %v3457_v46 = vpop.eup %3456  ;;  %3476 = vpow2.f32 %v1204_v35  ;;  %v1208_v60 = vmul.f32 1.442695, %v5381_v56  ;;  %2220 = vmatmul.mubr.bf16.vlgmr.msra.gmra.mrb[0].mxu1 %v2027_v55  ;;  %v1259_v31 = vpop.permute.xlu1 %1258  ;;  %v5388_v55 = vld [vmem:[#allocation67_spill] sm:$0xff]  ;;  %v1218_v33 = vmul.f32 1.442695, %v1158_v20 }
 0x256   : > { %v4648_v37 = vpop.eup %3458  ;;  %3478 = vpow2.f32 %v1470_v53  ;;  %v1398_v58 = vsub.f32 %v5382_v57, %v1259_v31  ;;  %v1399_v41 = vsub.f32 %v5383_v15, %v1259_v31  ;;  %1907 = vperm.xlu1 %3365, %v4630_v13   ;;  %v4653_v44 = vadd.f32 %v3457_v46, %v3455_v32  ;;  %v5398_v38 = vld [vmem:[#allocation11_spill] sm:$0xff] }
 0x257   : > { %v4655_v49 = vpop.eup %3460  ;;  %3480 = vpow2.f32 %v1472_v39  ;;  %v1156_v47 = vsub.f32 %v5388_v55, %v5387_v1  ;;  %v1212_v56 = vmul.f32 1.442695, %v1155_v62  ;;  %v5399_v55 = vld [vmem:[#allocation13_spill] sm:$0xff]  ;;  %v1220_v21 = vmul.f32 1.442695, %v1159_v61 }
 0x258   : > { %5384 = vst [vmem:[#allocation6_spill] sm:$0xff] %v4655_v49  ;;  %v3463_v43 = vpop.eup %3462  ;;  %3482 = vpow2.f32 %v1206_v54  ;;  %v1474_v0 = vmul.f32 1.442695, %v1398_v58  ;;  %1912 = vperm.xlu0 %3364, %v4635_v6   ;;  %v1476_v48 = vmul.f32 1.442695, %v1399_v41 }
 0x259   : > { %v3465_v35 = vpop.eup %3464  ;;  %3484 = vpow2.f32 %v1208_v60  ;;  %v1264_v28 = vpop.permute.xlu1 %1263  ;;  %v2029_v24 = vpack.c.bf16 %v3463_v43, %v3455_v32  ;;  %v1214_v58 = vmul.f32 1.442695, %v1156_v47  ;;  %v1216_v41 = vmul.f32 1.442695, %v1157_v4 }
 0x25a   : > { %v4662_v36 = vpop.eup %3466  ;;  %v1400_v12 = vsub.f32 %v5392_v8, %v1264_v28  ;;  %v1401_v54 = vsub.f32 %v5393_v52, %v1264_v28  ;;  %1917 = vperm.xlu1 %3365, %v4648_v37   ;;  %v2030_v53 = vpack.c.bf16 %v3465_v35, %v3457_v46  ;;  %3486 = vpow2.f32 %v1210_v40 }
 0x25b   : > { %5389 = vst [vmem:[#allocation65_spill] sm:$0xff] %v4662_v36  ;;  %v4669_v39 = vpop.eup %3468  ;;  %v4673_v29 = vadd.f32 %v3465_v35, %v3463_v43  ;;  %3488 = vpow2.f32 %v1474_v0 }
 0x25c   : > { %5394 = vst [vmem:[#allocation63_spill] sm:$0xff] %v4669_v39  ;;  %v3471_v32 = vpop.eup %3470  ;;  %v1478_v60 = vmul.f32 1.442695, %v1400_v12  ;;  %v1480_v31 = vmul.f32 1.442695, %v1401_v54  ;;  %2227 = vmatprep.mubr.bf16.mxu1 %v2030_v53  ;;  %1922 = vperm.xlu0 %3364, %v4655_v49   ;;  %3490 = vpow2.f32 %v1476_v48  ;;  %v5400_v48 = vld [vmem:[#allocation14_spill] sm:$0xff]  ;;  %v1160_v53 = vsub.f32 %v4506_v5, %v4514_v51 }
 0x25d   : > { %v3473_v57 = vpop.eup %3472  ;;  %2228 = vmatmul.mubr.bf16.gmra.mrb[4].mxu1 %v2029_v24  ;;  %v1269_v46 = vpop.permute.xlu1 %1268 }
 0x25e   : > { %v4676_v15 = vpop.eup %3474  ;;  %3492 = vpow2.f32 %v1478_v60  ;;  %v1403_v11 = vsub.f32 %v5396_v2, %v1269_v46  ;;  %1927 = vperm.xlu1 %3365, %v4662_v36   ;;  %v4680_v40 = vadd.f32 %v3473_v57, %v3471_v32  ;;  %v1402_v62 = vsub.f32 %v5398_v38, %v1269_v46 }
 0x25f   : > { %5395 = vst [vmem:[#allocation59_spill] sm:$0xff] %v4676_v15  ;;  %v4682_v43 = vpop.eup %3476  ;;  %3494 = vpow2.f32 %v1480_v31  ;;  %v1274_v0 = vpop.permute.xlu0 %1273  ;;  %v5404_v31 = vld [vmem:[#allocation16_spill] sm:$0xff]  ;;  %v1222_v51 = vmul.f32 1.442695, %v1160_v53 }
 0x260   : > { %5397 = vst [vmem:[#allocation61_spill] sm:$0xff] %v4682_v43  ;;  %v3479_v35 = vpop.eup %3478  ;;  %3496 = vpow2.f32 %v1212_v56  ;;  %v1484_v1 = vmul.f32 1.442695, %v1403_v11  ;;  %v1404_v47 = vsub.f32 %v5399_v55, %v1274_v0  ;;  %v1405_v28 = vsub.f32 %v5400_v48, %v1274_v0  ;;  %1932 = vperm.xlu0 %3364, %v4669_v39   ;;  %v5432_v39 = vld [vmem:[#allocation37_spill] sm:$0xff] }
 0x261   : > { %v3481_v24 = vpop.eup %3480  ;;  %3498 = vpow2.f32 %v1214_v58  ;;  %v2031_v9 = vpack.c.bf16 %v3479_v35, %v3471_v32  ;;  %v1482_v20 = vmul.f32 1.442695, %v1402_v62  ;;  %v5407_v62 = vld [vmem:[#allocation18_spill] sm:$0xff] }
 0x262   : > { %v4690_v4 = vpop.eup %3482  ;;  %3500 = vpow2.f32 %v1216_v41  ;;  %v1486_v8 = vmul.f32 1.442695, %v1404_v47  ;;  %v1488_v12 = vmul.f32 1.442695, %v1405_v28  ;;  %1937 = vperm.xlu1 %3365, %v4676_v15   ;;  %v2032_v52 = vpack.c.bf16 %v3481_v24, %v3473_v57  ;;  %v5405_v41 = vld [vmem:[#allocation15_spill] sm:$0xff] }
 0x263   : > { %5401 = vst [vmem:[#allocation60_spill] sm:$0xff] %v4690_v4  ;;  %v4693_v54 = vpop.eup %3484  ;;  %3502 = vpow2.f32 %v1218_v33  ;;  %v4697_v56 = vadd.f32 %v3481_v24, %v3479_v35  ;;  %v5406_v33 = vld [vmem:[#allocation17_spill] sm:$0xff] }
 0x264   : > { %5402 = vst [vmem:[#allocation62_spill] sm:$0xff] %v4693_v54  ;;  %3504 = vpow2.f32 %v1484_v1  ;;  %2235 = vmatprep.mubr.bf16.mxu1 %v2032_v52  ;;  %1942 = vperm.xlu0 %3364, %v4682_v43   ;;  %v4700_v26 = vpop.eup %3486 }
 0x265   : > { %5403 = vst [vmem:[#allocation7_spill] sm:$0xff] %v4700_v26  ;;  %3506 = vpow2.f32 %v1488_v12  ;;  %2236 = vmatmul.mubr.bf16.gmra.mrb[8].mxu1 %v2031_v9  ;;  %v1279_v32 = vpop.permute.xlu1 %1278  ;;  %v4702_v60 = vpop.eup %3488 }
 0x266   : > { %3508 = vpow2.f32 %v1486_v8  ;;  %v1407_v57 = vsub.f32 %v5404_v31, %v1279_v32  ;;  %1947 = vperm.xlu1 %3365, %v4690_v4   ;;  %v4706_v5 = vpop.eup %3490  ;;  %v1406_v2 = vsub.f32 %v5405_v41, %v1279_v32  ;;  %v5413_v31 = vld [vmem:[#allocation19_spill] sm:$0xff]  ;;  %v5414_v41 = vld [vmem:[#allocation21_spill] sm:$0xff] }
 0x267   : > { %3510 = vpow2.f32 %v1482_v20  ;;  %v1284_v58 = vpop.permute.xlu0 %1283  ;;  %v5412_v20 = vld [vmem:[#allocation20_spill] sm:$0xff] }
 0x268   : > { %v3493_v46 = vpop.eup %3492  ;;  %v1492_v11 = vmul.f32 1.442695, %v1407_v57  ;;  %v1408_v38 = vsub.f32 %v5406_v33, %v1284_v58  ;;  %v1409_v0 = vsub.f32 %v5407_v62, %v1284_v58  ;;  %1952 = vperm.xlu0 %3364, %v4693_v54   ;;  %3512 = vpow2.f32 %v1220_v21 }
 0x269   : > { %v3495_v35 = vpop.eup %3494  ;;  %v2033_v1 = vpack.c.bf16 %v3493_v46, %v4702_v60  ;;  %3514 = vpow2.f32 %v1222_v51  ;;  %v1490_v8 = vmul.f32 1.442695, %v1406_v2 }
 0x26a   : > { %v4713_v55 = vpop.eup %3496  ;;  %v1494_v47 = vmul.f32 1.442695, %v1408_v38  ;;  %v1496_v48 = vmul.f32 1.442695, %v1409_v0  ;;  %1957 = vperm.xlu1 %3365, %v4700_v26   ;;  %v2034_v28 = vpack.c.bf16 %v3495_v35, %v4706_v5  ;;  %v4719_v61 = vadd.f32 %v3495_v35, %v3493_v46 }
 0x26b   : > { %5408 = vst [vmem:[#allocation8_spill] sm:$0xff] %v4713_v55  ;;  %v4717_v24 = vpop.eup %3498  ;;  %3516 = vpow2.f32 %v1492_v11  ;;  %v5415_v11 = vld [vmem:[#allocation22_spill] sm:$0xff] }
 0x26c   : > { %5409 = vst [vmem:[#allocation66_spill] sm:$0xff] %v4717_v24  ;;  %v4721_v9 = vpop.eup %3500  ;;  %2243 = vmatprep.mubr.bf16.mxu1 %v2034_v28  ;;  %1962 = vperm.xlu0 %3364, %v4713_v55   ;;  %3518 = vpow2.f32 %v1496_v48 }
 0x26d   : > { %5410 = vst [vmem:[#allocation64_spill] sm:$0xff] %v4721_v9  ;;  %v4724_v12 = vpop.eup %3502  ;;  %2244 = vmatmul.mubr.bf16.gmra.mrb[12].mxu1 %v2033_v1  ;;  %v1289_v52 = vpop.permute.xlu1 %1288  ;;  %3520 = vpow2.f32 %v1494_v47 }
 0x26e   : > { %5411 = vst [vmem:[#allocation69_spill] sm:$0xff] %v4724_v12  ;;  %v4726_v53 = vpop.eup %3504  ;;  %v1411_v21 = vsub.f32 %v5412_v20, %v1289_v52  ;;  %1967 = vperm.xlu1 %3365, %v4717_v24   ;;  %v1410_v57 = vsub.f32 %v5413_v31, %v1289_v52  ;;  %3522 = vpow2.f32 %v1490_v8  ;;  %v5418_v20 = vld [vmem:[#allocation24_spill] sm:$0xff]  ;;  %v5428_v24 = vld [vmem:[#allocation33_spill] sm:$0xff] }
 0x26f   : > { %v4730_v32 = vpop.eup %3506  ;;  %v1294_v51 = vpop.permute.xlu0 %1293 }
 0x270   : > { %v4733_v58 = vpop.eup %3508  ;;  %v1500_v46 = vmul.f32 1.442695, %v1411_v21  ;;  %v1412_v2 = vsub.f32 %v5414_v41, %v1294_v51  ;;  %v1413_v33 = vsub.f32 %v5415_v11, %v1294_v51  ;;  %1972 = vperm.xlu0 %3364, %v4721_v9   ;;  %v2036_v62 = vpack.c.bf16 %v4730_v32, %v4726_v53  ;;  %v5420_v11 = vld [vmem:[#allocation25_spill] sm:$0xff] }
 0x271   : > { %v4738_v38 = vpop.eup %3510  ;;  %v1498_v47 = vmul.f32 1.442695, %v1410_v57  ;;  %v5424_v9 = vld [vmem:[#allocation29_spill] sm:$0xff] }
 0x272   : > { %v1502_v0 = vmul.f32 1.442695, %v1412_v2  ;;  %v1504_v35 = vmul.f32 1.442695, %v1413_v33  ;;  %1977 = vperm.xlu1 %3365, %v4724_v12   ;;  %v4743_v1 = vpop.eup %3512  ;;  %2251 = vmatprep.mubr.bf16.mxu1 %v2036_v62  ;;  %v2035_v48 = vpack.c.bf16 %v4733_v58, %v4738_v38  ;;  %3524 = vpow2.f32 %v1500_v46  ;;  %v5419_v46 = vld [vmem:[#allocation23_spill] sm:$0xff]  ;;  %v5421_v62 = vld [vmem:[#allocation26_spill] sm:$0xff] }
 0x273   : > { %5416 = vst [vmem:[#allocation67_spill] sm:$0xff] %v4743_v1  ;;  %v4748_v28 = vpop.eup %3514 }
 0x274   : > { %1982 = vperm.xlu0 %3364, %v4743_v1   ;;  %5417 = vst [vmem:[#allocation70_spill] sm:$0xff] %v4748_v28  ;;  %3526 = vpow2.f32 %v1504_v35 }
 0x275   : > { %2252 = vmatmul.mubr.bf16.gmra.mrb[16].mxu1 %v2035_v48  ;;  %v1299_v8 = vpop.permute.xlu1 %1298  ;;  %v4750_v52 = vpop.eup %3516  ;;  %3528 = vpow2.f32 %v1502_v0 }
 0x276   : > { %v1415_v21 = vsub.f32 %v5418_v20, %v1299_v8  ;;  %1987 = vperm.xlu1 %3365, %v4748_v28   ;;  %v4754_v31 = vpop.eup %3518  ;;  %3530 = vpow2.f32 %v1498_v47  ;;  %v1414_v41 = vsub.f32 %v5419_v46, %v1299_v8 }
 0x277   : > { %v1304_v57 = vpop.permute.xlu0 %1303  ;;  %v4756_v51 = vpop.eup %3520  ;;  %v2038_v0 = vpack.c.bf16 %v4754_v31, %v4750_v52 }
 0x278   : > { %v1508_v2 = vmul.f32 1.442695, %v1415_v21  ;;  %v1416_v33 = vsub.f32 %v5420_v11, %v1304_v57  ;;  %v1417_v35 = vsub.f32 %v5421_v62, %v1304_v57  ;;  %v4763_v48 = vpop.eup %3522  ;;  %v1506_v1 = vmul.f32 1.442695, %v1414_v41  ;;  %v5422_v57 = vld [vmem:[#allocation28_spill] sm:$0xff]  ;;  %v5423_v62 = vld [vmem:[#allocation27_spill] sm:$0xff] }
 0x279   : > { %2259 = vmatprep.mubr.bf16.mxu1 %v2038_v0  ;;  %v2037_v47 = vpack.c.bf16 %v4756_v51, %v4763_v48 }
 0x27a   : > { %v1510_v20 = vmul.f32 1.442695, %v1416_v33  ;;  %v1512_v19 = vmul.f32 1.442695, %v1417_v35  ;;  %3532 = vpow2.f32 %v1508_v2  ;;  %v5425_v2 = vld [vmem:[#allocation30_spill] sm:$0xff] }
 0x27c   : > { %3534 = vpow2.f32 %v1512_v19  ;;  %v4767_v21 = vpop.eup %3524 }
 0x27d   : > { %2260 = vmatmul.mubr.bf16.gmra.mrb[20].mxu1 %v2037_v47  ;;  %v1309_v8 = vpop.permute.xlu1 %1308  ;;  %3536 = vpow2.f32 %v1510_v20 }
 0x27e   : > { %v1419_v46 = vsub.f32 %v5422_v57, %v1309_v8  ;;  %v4770_v11 = vpop.eup %3526  ;;  %v1418_v28 = vsub.f32 %v5423_v62, %v1309_v8  ;;  %3538 = vpow2.f32 %v1506_v1 }
 0x27f   : > { %v1314_v33 = vpop.permute.xlu0 %1313  ;;  %v4773_v35 = vpop.eup %3528  ;;  %v2040_v20 = vpack.c.bf16 %v4770_v11, %v4767_v21 }
 0x280   : > { %v1516_v0 = vmul.f32 1.442695, %v1419_v46  ;;  %v1420_v41 = vsub.f32 %v5424_v9, %v1314_v33  ;;  %v1421_v19 = vsub.f32 %v5425_v2, %v1314_v33  ;;  %v4777_v47 = vpop.eup %3530  ;;  %v1514_v55 = vmul.f32 1.442695, %v1418_v28  ;;  %v5426_v9 = vld [vmem:[#allocation32_spill] sm:$0xff]  ;;  %v5427_v28 = vld [vmem:[#allocation31_spill] sm:$0xff] }
 0x281   : > { %2267 = vmatprep.mubr.bf16.mxu1 %v2040_v20  ;;  %v2039_v8 = vpack.c.bf16 %v4773_v35, %v4777_v47 }
 0x282   : > { %v1518_v12 = vmul.f32 1.442695, %v1420_v41  ;;  %v1520_v57 = vmul.f32 1.442695, %v1421_v19  ;;  %3540 = vpow2.f32 %v1516_v0  ;;  %v5429_v0 = vld [vmem:[#allocation34_spill] sm:$0xff] }
 0x284   : > { %3542 = vpow2.f32 %v1520_v57  ;;  %v4783_v46 = vpop.eup %3532 }
 0x285   : > { %2268 = vmatmul.mubr.bf16.gmra.mrb[24].mxu1 %v2039_v8  ;;  %v1319_v1 = vpop.permute.xlu1 %1318  ;;  %3544 = vpow2.f32 %v1518_v12 }
 0x286   : > { %v1423_v62 = vsub.f32 %v5426_v9, %v1319_v1  ;;  %v4786_v33 = vpop.eup %3534  ;;  %3546 = vpow2.f32 %v1514_v55  ;;  %v1422_v19 = vsub.f32 %v5427_v28, %v1319_v1 }
 0x287   : > { %v1324_v2 = vpop.permute.xlu0 %1323  ;;  %v4788_v41 = vpop.eup %3536  ;;  %v2042_v8 = vpack.c.bf16 %v4786_v33, %v4783_v46 }
 0x288   : > { %v1524_v20 = vmul.f32 1.442695, %v1423_v62  ;;  %v1424_v54 = vsub.f32 %v5428_v24, %v1324_v2  ;;  %v1425_v57 = vsub.f32 %v5429_v0, %v1324_v2  ;;  %v4795_v26 = vpop.eup %3538  ;;  %v1522_v43 = vmul.f32 1.442695, %v1422_v19  ;;  %v5430_v24 = vld [vmem:[#allocation36_spill] sm:$0xff]  ;;  %v5431_v0 = vld [vmem:[#allocation35_spill] sm:$0xff] }
 0x289   : > { %2275 = vmatprep.mubr.bf16.mxu1 %v2042_v8  ;;  %v2041_v55 = vpack.c.bf16 %v4788_v41, %v4795_v26 }
 0x28a   : > { %v1526_v12 = vmul.f32 1.442695, %v1424_v54  ;;  %v1528_v9 = vmul.f32 1.442695, %v1425_v57  ;;  %3548 = vpow2.f32 %v1524_v20  ;;  %v5433_v20 = vld [vmem:[#allocation38_spill] sm:$0xff] }
 0x28c   : > { %3550 = vpow2.f32 %v1528_v9  ;;  %v4799_v62 = vpop.eup %3540 }
 0x28d   : > { %2276 = vmatmul.mubr.bf16.gmra.mrb[28].mxu1 %v2041_v55  ;;  %v1329_v1 = vpop.permute.xlu1 %1328  ;;  %3552 = vpow2.f32 %v1526_v12 }
 0x28e   : > { %v1427_v2 = vsub.f32 %v5430_v24, %v1329_v1  ;;  %v4802_v28 = vpop.eup %3542  ;;  %v1426_v4 = vsub.f32 %v5431_v0, %v1329_v1  ;;  %3554 = vpow2.f32 %v1522_v43 }
 0x28f   : > { %v1334_v54 = vpop.permute.xlu0 %1333  ;;  %v4805_v57 = vpop.eup %3544  ;;  %v2044_v12 = vpack.c.bf16 %v4802_v28, %v4799_v62 }
 0x290   : > { %v1532_v8 = vmul.f32 1.442695, %v1427_v2  ;;  %v1428_v19 = vsub.f32 %v5432_v39, %v1334_v54  ;;  %v1429_v9 = vsub.f32 %v5433_v20, %v1334_v54  ;;  %v4809_v55 = vpop.eup %3546  ;;  %v1530_v49 = vmul.f32 1.442695, %v1426_v4  ;;  %v5434_v2 = vld [vmem:[#allocation40_spill] sm:$0xff] }
 0x291   : > { %2283 = vmatprep.mubr.bf16.mxu1 %v2044_v12  ;;  %v2043_v1 = vpack.c.bf16 %v4805_v57, %v4809_v55 }
 0x292   : > { %v1534_v15 = vmul.f32 1.442695, %v1428_v19  ;;  %v1536_v24 = vmul.f32 1.442695, %v1429_v9  ;;  %3556 = vpow2.f32 %v1532_v8  ;;  %v5436_v8 = vld [vmem:[#allocation41_spill] sm:$0xff] }
 0x293   : > { %1646 = vadd.xlane.f32.xlu0 %v4639_v30  ;;  %v5435_v30 = vld [vmem:[#allocation39_spill] sm:$0xff] }
 0x294   : > { %3558 = vpow2.f32 %v1536_v24  ;;  %v4816_v43 = vpop.eup %3548  ;;  %v5437_v24 = vld [vmem:[#allocation42_spill] sm:$0xff] }
 0x295   : > { %2284 = vmatmul.mubr.bf16.gmra.mrb[32].mxu1 %v2043_v1  ;;  %v1339_v39 = vpop.permute.xlu1 %1338  ;;  %3560 = vpow2.f32 %v1534_v15 }
 0x296   : > { %v1431_v0 = vsub.f32 %v5434_v2, %v1339_v39  ;;  %v4819_v54 = vpop.eup %3550  ;;  %3562 = vpow2.f32 %v1530_v49  ;;  %v1430_v20 = vsub.f32 %v5435_v30, %v1339_v39  ;;  %v5438_v30 = vld [vmem:[#allocation44_spill] sm:$0xff] }
 0x297   : > { %v1344_v19 = vpop.permute.xlu0 %1343  ;;  %1649 = vadd.xlane.f32.xlu0 %v4653_v44  ;;  %v4822_v4 = vpop.eup %3552  ;;  %v2046_v15 = vpack.c.bf16 %v4819_v54, %v4816_v43 }
 0x298   : > { %v1540_v9 = vmul.f32 1.442695, %v1431_v0  ;;  %v1432_v12 = vsub.f32 %v5436_v8, %v1344_v19  ;;  %v1433_v1 = vsub.f32 %v5437_v24, %v1344_v19  ;;  %v4829_v36 = vpop.eup %3554  ;;  %v1538_v49 = vmul.f32 1.442695, %v1430_v20 }
 0x299   : > { %2291 = vmatprep.mubr.bf16.mxu1 %v2046_v15  ;;  %v2045_v44 = vpack.c.bf16 %v4822_v4, %v4829_v36  ;;  %v1660_v0 = vadd.f32 %v4706_v5, %v4702_v60  ;;  %v5441_v60 = vld [vmem:[#allocation46_spill] sm:$0xff] }
 0x29a   : > { %v1542_v2 = vmul.f32 1.442695, %v1432_v12  ;;  %v1544_v6 = vmul.f32 1.442695, %v1433_v1  ;;  %1643 = vadd.xlane.f32.xlu1 %v4619_v34  ;;  %3564 = vpow2.f32 %v1540_v9  ;;  %v5440_v9 = vld [vmem:[#allocation45_spill] sm:$0xff] }
 0x29b   : > { %1655 = vadd.xlane.f32.xlu0 %v4680_v40  ;;  %v5439_v40 = vld [vmem:[#allocation43_spill] sm:$0xff] }
 0x29c   : > { %3566 = vpow2.f32 %v1544_v6  ;;  %v4837_v19 = vpop.eup %3556 }
 0x29d   : > { %2292 = vmatmul.mubr.bf16.gmra.mrb[36].mxu1 %v2045_v44  ;;  %v1349_v39 = vpop.permute.xlu1 %1348  ;;  %3568 = vpow2.f32 %v1542_v2 }
 0x29e   : > { %v1435_v8 = vsub.f32 %v5438_v30, %v1349_v39  ;;  %1652 = vadd.xlane.f32.xlu1 %v4673_v29  ;;  %v4841_v34 = vpop.eup %3558  ;;  %v1434_v12 = vsub.f32 %v5439_v40, %v1349_v39  ;;  %3570 = vpow2.f32 %v1538_v49  ;;  %v1666_v29 = vadd.f32 %v4738_v38, %v4726_v53  ;;  %v5442_v53 = vld [vmem:[#allocation48_spill] sm:$0xff] }
 0x29f   : > { %v1354_v24 = vpop.permute.xlu0 %1353  ;;  %1661 = vadd.xlane.f32.xlu0 %v1660_v0  ;;  %v4844_v20 = vpop.eup %3560  ;;  %v2048_v2 = vpack.c.bf16 %v4841_v34, %v4837_v19 }
 0x2a0   : > { %v1548_v6 = vmul.f32 1.442695, %v1435_v8  ;;  %v1436_v1 = vsub.f32 %v5440_v9, %v1354_v24  ;;  %v1437_v5 = vsub.f32 %v5441_v60, %v1354_v24  ;;  %v4848_v15 = vpop.eup %3562  ;;  %v1546_v0 = vmul.f32 1.442695, %v1434_v12  ;;  %v5443_v9 = vld [vmem:[#allocation47_spill] sm:$0xff] }
 0x2a1   : > { %2299 = vmatprep.mubr.bf16.mxu1 %v2048_v2  ;;  %v2047_v49 = vpack.c.bf16 %v4844_v20, %v4848_v15  ;;  %v1672_v8 = vadd.f32 %v4763_v48, %v4750_v52  ;;  %v1669_v24 = vadd.f32 %v4733_v58, %v4730_v32  ;;  %v5444_v48 = vld [vmem:[#allocation49_spill] sm:$0xff] }
 0x2a2   : > { %v1550_v44 = vmul.f32 1.442695, %v1436_v1  ;;  %v1552_v39 = vmul.f32 1.442695, %v1437_v5  ;;  %1658 = vadd.xlane.f32.xlu1 %v4697_v56  ;;  %3572 = vpow2.f32 %v1548_v6  ;;  %v5445_v5 = vld [vmem:[#allocation50_spill] sm:$0xff] }
 0x2a3   : > { %1667 = vadd.xlane.f32.xlu0 %v1666_v29  ;;  %v1678_v29 = vadd.f32 %v4777_v47, %v4767_v21  ;;  %v1684_v21 = vadd.f32 %v4795_v26, %v4783_v46  ;;  %v5448_v26 = vld [vmem:[#allocation53_spill] sm:$0xff] }
 0x2a4   : > { %3574 = vpow2.f32 %v1552_v39  ;;  %v4859_v40 = vpop.eup %3564 }
 0x2a5   : > { %2300 = vmatmul.mubr.bf16.gmra.mrb[40].mxu1 %v2047_v49  ;;  %v1359_v30 = vpop.permute.xlu1 %1358  ;;  %3576 = vpow2.f32 %v1550_v44  ;;  %v1675_v49 = vadd.f32 %v4756_v51, %v4754_v31  ;;  %v1681_v31 = vadd.f32 %v4773_v35, %v4770_v11  ;;  %v1687_v35 = vadd.f32 %v4788_v41, %v4786_v33  ;;  %v5451_v33 = vld [vmem:[#allocation55_spill] sm:$0xff] }
 0x2a6   : > { %v1439_v38 = vsub.f32 %v5442_v53, %v1359_v30  ;;  %1664 = vadd.xlane.f32.xlu1 %v4719_v61  ;;  %v4863_v56 = vpop.eup %3566  ;;  %3578 = vpow2.f32 %v1546_v0  ;;  %v1438_v1 = vsub.f32 %v5443_v9, %v1359_v30 }
 0x2a7   : > { %v1364_v12 = vpop.permute.xlu0 %1363  ;;  %1673 = vadd.xlane.f32.xlu0 %v1672_v8  ;;  %v4867_v6 = vpop.eup %3568  ;;  %v2050_v61 = vpack.c.bf16 %v4863_v56, %v4859_v40  ;;  %v5446_v8 = vld [vmem:[#allocation52_spill] sm:$0xff] }
 0x2a8   : > { %v1556_v52 = vmul.f32 1.442695, %v1439_v38  ;;  %v1440_v60 = vsub.f32 %v5444_v48, %v1364_v12  ;;  %v1441_v2 = vsub.f32 %v5445_v5, %v1364_v12  ;;  %v4876_v44 = vpop.eup %3570  ;;  %v1554_v58 = vmul.f32 1.442695, %v1438_v1  ;;  %v5447_v12 = vld [vmem:[#allocation51_spill] sm:$0xff] }
 0x2a9   : > { %2307 = vmatprep.mubr.bf16.mxu1 %v2050_v61  ;;  %v2049_v32 = vpack.c.bf16 %v4867_v6, %v4876_v44 }
 0x2aa   : > { %v1558_v39 = vmul.f32 1.442695, %v1440_v60  ;;  %v1560_v0 = vmul.f32 1.442695, %v1441_v2  ;;  %1670 = vadd.xlane.f32.xlu1 %v1669_v24  ;;  %3580 = vpow2.f32 %v1556_v52  ;;  %v5449_v52 = vld [vmem:[#allocation54_spill] sm:$0xff]  ;;  %v1690_v2 = vadd.f32 %v4809_v55, %v4799_v62  ;;  %v5450_v62 = vld [vmem:[#allocation56_spill] sm:$0xff] }
 0x2ab   : > { %1679 = vadd.xlane.f32.xlu0 %v1678_v29 }
 0x2ac   : > { %3582 = vpow2.f32 %v1560_v0  ;;  %v4884_v47 = vpop.eup %3572 }
 0x2ad   : > { %2308 = vmatmul.mubr.bf16.gmra.mrb[44].mxu1 %v2049_v32  ;;  %v1369_v30 = vpop.permute.xlu1 %1368  ;;  %3584 = vpow2.f32 %v1558_v39  ;;  %v1696_v32 = vadd.f32 %v4829_v36, %v4816_v43 }
 0x2ae   : > { %v1443_v53 = vsub.f32 %v5446_v8, %v1369_v30  ;;  %1676 = vadd.xlane.f32.xlu1 %v1675_v49  ;;  %v4887_v38 = vpop.eup %3574  ;;  %v1442_v24 = vsub.f32 %v5447_v12, %v1369_v30  ;;  %3586 = vpow2.f32 %v1554_v58  ;;  %v5452_v12 = vld [vmem:[#allocation57_spill] sm:$0xff] }
 0x2af   : > { %v1374_v9 = vpop.permute.xlu0 %1373  ;;  %1685 = vadd.xlane.f32.xlu0 %v1684_v21  ;;  %v4892_v51 = vpop.eup %3576  ;;  %v2052_v5 = vpack.c.bf16 %v4887_v38, %v4884_v47  ;;  %v1693_v21 = vadd.f32 %v4805_v57, %v4802_v28  ;;  %v1699_v57 = vadd.f32 %v4822_v4, %v4819_v54  ;;  %v1711_v4 = vadd.f32 %v4867_v6, %v4863_v56 }
 0x2b0   : > { %v1564_v1 = vmul.f32 1.442695, %v1443_v53  ;;  %v1444_v46 = vsub.f32 %v5448_v26, %v1374_v9  ;;  %v1445_v48 = vsub.f32 %v5449_v52, %v1374_v9  ;;  %v3579_v60 = vpop.eup %3578  ;;  %v1562_v39 = vmul.f32 1.442695, %v1442_v24  ;;  %v5453_v9 = vld [vmem:[#allocation58_spill] sm:$0xff] }
 0x2b1   : > { %2315 = vmatprep.mubr.bf16.mxu1 %v2052_v5  ;;  %v2051_v11 = vpack.c.bf16 %v4892_v51, %v3579_v60 }
 0x2b2   : > { %v1566_v61 = vmul.f32 1.442695, %v1444_v46  ;;  %v1568_v29 = vmul.f32 1.442695, %v1445_v48  ;;  %1682 = vadd.xlane.f32.xlu1 %v1681_v31  ;;  %3588 = vpow2.f32 %v1564_v1  ;;  %v1702_v31 = vadd.f32 %v4848_v15, %v4837_v19 }
 0x2b3   : > { %1691 = vadd.xlane.f32.xlu0 %v1690_v2  ;;  %v1708_v48 = vadd.f32 %v4876_v44, %v4859_v40 }
 0x2b4   : > { %3590 = vpow2.f32 %v1568_v29  ;;  %v3581_v58 = vpop.eup %3580 }
 0x2b5   : > { %2316 = vmatmul.mubr.bf16.gmra.mrb[48].mxu1 %v2051_v11  ;;  %v1379_v0 = vpop.permute.xlu1 %1378  ;;  %3592 = vpow2.f32 %v1566_v61  ;;  %v1705_v61 = vadd.f32 %v4844_v20, %v4841_v34  ;;  %v1717_v20 = vadd.f32 %v4892_v51, %v4887_v38 }
 0x2b6   : > { %v1447_v55 = vsub.f32 %v5450_v62, %v1379_v0  ;;  %1688 = vadd.xlane.f32.xlu1 %v1687_v35  ;;  %v3583_v49 = vpop.eup %3582  ;;  %3594 = vpow2.f32 %v1562_v39  ;;  %v1446_v41 = vsub.f32 %v5451_v33, %v1379_v0  ;;  %v1714_v39 = vadd.f32 %v3579_v60, %v4884_v47 }
 0x2b7   : > { %v1384_v30 = vpop.permute.xlu0 %1383  ;;  %1697 = vadd.xlane.f32.xlu0 %v1696_v32  ;;  %v3585_v8 = vpop.eup %3584  ;;  %v2054_v43 = vpack.c.bf16 %v3583_v49, %v3581_v58  ;;  %v5454_v33 = vsub.f32 %v4511_v7, %v4522_v27 }
 0x2b8   : > { %v1572_v53 = vmul.f32 1.442695, %v1447_v55  ;;  %v1448_v24 = vsub.f32 %v5452_v12, %v1384_v30  ;;  %v1449_v36 = vsub.f32 %v5453_v9, %v1384_v30  ;;  %v3587_v1 = vpop.eup %3586  ;;  %v1570_v28 = vmul.f32 1.442695, %v1446_v41 }
 0x2b9   : > { %2323 = vmatprep.mubr.bf16.mxu1 %v2054_v43  ;;  %v2053_v52 = vpack.c.bf16 %v3585_v8, %v3587_v1  ;;  %v1720_v40 = vadd.f32 %v3587_v1, %v3581_v58  ;;  %v4926_v47 = vpop.permute.xlu1 %1842  ;;  %v1723_v6 = vadd.f32 %v3585_v8, %v3583_v49  ;;  %v1224_v41 = vmul.f32 1.442695, %v5454_v33 }
 0x2ba   : > { %v1574_v26 = vmul.f32 1.442695, %v1448_v24  ;;  %v1576_v46 = vmul.f32 1.442695, %v1449_v36  ;;  %1694 = vadd.xlane.f32.xlu1 %v1693_v21  ;;  %3596 = vpow2.f32 %v1572_v53 }
 0x2bb   : > { %1703 = vadd.xlane.f32.xlu0 %v1702_v31  ;;  %v4922_v0 = vpop.permute.xlu0 %1837 }
 0x2bc   : > { %3598 = vpow2.f32 %v1576_v46  ;;  %v3589_v5 = vpop.eup %3588 }
 0x2bd   : > { %2324 = vmatmul.mubr.bf16.gmra.mrb[52].mxu1 %v2053_v52  ;;  %3600 = vpow2.f32 %v1574_v26  ;;  %v4930_v55 = vpop.permute.xlu1 %1847 }
 0x2be   : > { %1700 = vadd.xlane.f32.xlu1 %v1699_v57  ;;  %v3591_v19 = vpop.eup %3590  ;;  %3602 = vpow2.f32 %v1570_v28 }
 0x2bf   : > { %1709 = vadd.xlane.f32.xlu0 %v1708_v48  ;;  %v3593_v15 = vpop.eup %3592  ;;  %v2056_v2 = vpack.c.bf16 %v3591_v19, %v3589_v5  ;;  %v4928_v62 = vpop.permute.xlu0 %1852  ;;  %3604 = vpow2.f32 %v1224_v41 }
 0x2c0   : > { %v3595_v29 = vpop.eup %3594  ;;  %v1729_v30 = vadd.f32 %v3593_v15, %v3591_v19 }
 0x2c1   : > { %2331 = vmatprep.mubr.bf16.mxu1 %v2056_v2  ;;  %v2055_v54 = vpack.c.bf16 %v3593_v15, %v3595_v29  ;;  %v1726_v60 = vadd.f32 %v3595_v29, %v3589_v5  ;;  %v4934_v21 = vpop.permute.xlu1 %1857 }
 0x2c2   : > { %1706 = vadd.xlane.f32.xlu1 %v1705_v61 }
 0x2c3   : > { %1715 = vadd.xlane.f32.xlu0 %v1714_v39  ;;  %v4932_v38 = vpop.permute.xlu0 %1862  ;;  %v1579_v39 = vld [vmem:[#allocation3 + $0x8] sm:$0xff] }
 0x2c4   : > { %v3597_v44 = vpop.eup %3596 }
 0x2c5   : > { %2332 = vmatmul.mubr.bf16.gmra.mrb[56].mxu1 %v2055_v54  ;;  %v4941_v8 = vpop.permute.xlu1 %1867 }
 0x2c6   : > { %1712 = vadd.xlane.f32.xlu1 %v1711_v4  ;;  %v3599_v11 = vpop.eup %3598  ;;  %v1611_v4 = vmul.f32 %v4533_v17, %v1579_v39 }
 0x2c7   : > { %1721 = vadd.xlane.f32.xlu0 %v1720_v40  ;;  %v3601_v35 = vpop.eup %3600  ;;  %v2058_v34 = vpack.c.bf16 %v3599_v11, %v3597_v44  ;;  %v4939_v49 = vpop.permute.xlu0 %1872 }
 0x2c8   : > { %v3603_v32 = vpop.eup %3602  ;;  %v1735_v51 = vadd.f32 %v3601_v35, %v3599_v11 }
 0x2c9   : > { %2339 = vmatprep.mubr.bf16.mxu1 %v2058_v34  ;;  %v2057_v56 = vpack.c.bf16 %v3601_v35, %v3603_v32  ;;  %v1732_v58 = vadd.f32 %v3603_v32, %v3597_v44  ;;  %v4945_v12 = vpop.permute.xlu1 %1877  ;;  %v4947_v24 = vpop.eup %3604  ;;  %v1580_v44 = vld [vmem:[#allocation3 + $0x10] sm:$0xff]  ;;  %v1582_v32 = vld [vmem:[#allocation3 + $0x20] sm:$0xff] }
 0x2ca   : > { %1718 = vadd.xlane.f32.xlu1 %v1717_v20  ;;  %v1612_v34 = vmul.f32 %v4551_v59, %v1580_v44  ;;  %v1578_v20 = vld [vmem:[#allocation3] sm:$0xff]  ;;  %v1614_v17 = vmul.f32 %v4565_v42, %v1582_v32 }
 0x2cb   : > { %1727 = vadd.xlane.f32.xlu0 %v1726_v60  ;;  %v4943_v53 = vpop.permute.xlu0 %1882 }
 0x2cd   : > { %2340 = vmatmul.mubr.bf16.gmra.mrb[60].mxu1 %v2057_v56  ;;  %v4952_v36 = vpop.permute.xlu1 %1887 }
 0x2ce   : > { %1724 = vadd.xlane.f32.xlu1 %v1723_v6  ;;  %v1610_v6 = vmul.f32 %v4542_v10, %v1578_v20 }
 0x2cf   : > { %1733 = vadd.xlane.f32.xlu0 %v1732_v58  ;;  %v4950_v9 = vpop.permute.xlu0 %1892  ;;  %v1803_v58 = vld [vmem:[#allocation4] sm:$0xff] }
 0x2d0   : > { %v1995_v44 = vmul.f32 %v4922_v0, %v1803_v58 }
 0x2d1   : > { %v4956_v27 = vpop.permute.xlu1 %1897 }
 0x2d2   : > { %1730 = vadd.xlane.f32.xlu1 %v1729_v30 }
 0x2d3   : > { %v4954_v7 = vpop.permute.xlu0 %1902 }
 0x2d5   : > { %v4960_v31 = vpop.permute.xlu1 %1907 }
 0x2d6   : > { %1736 = vadd.xlane.f32.xlu1 %v1735_v51  ;;  %v1581_v51 = vld [vmem:[#allocation3 + $0x18] sm:$0xff] }
 0x2d7   : > { %v4958_v43 = vpop.permute.xlu0 %1912  ;;  %v1613_v20 = vmul.f32 %v4559_v14, %v1581_v51 }
 0x2d9   : > { %v4964_v26 = vpop.permute.xlu1 %1917 }
 0x2db   : > { %v4962_v1 = vpop.permute.xlu0 %1922 }
 0x2dd   : > { %v4968_v52 = vpop.permute.xlu1 %1927 }
 0x2df   : > { %v4966_v46 = vpop.permute.xlu0 %1932 }
 0x2e1   : > { %v4972_v57 = vpop.permute.xlu1 %1937 }
 0x2e3   : > { %v4970_v28 = vpop.permute.xlu0 %1942 }
 0x2e5   : > { %1992 = vperm.xlu0 %3364, %v4947_v24   ;;  %v4976_v5 = vpop.permute.xlu1 %1947 }
 0x2e7   : > { %v4974_v48 = vpop.permute.xlu0 %1952 }
 0x2e9   : > { %v4980_v15 = vpop.permute.xlu1 %1957 }
 0x2eb   : > { %v4978_v19 = vpop.permute.xlu0 %1962 }
 0x2ed   : > { %v4984_v61 = vpop.permute.xlu1 %1967 }
 0x2ef   : > { %v4982_v2 = vpop.permute.xlu0 %1972 }
 0x2f1   : > { %v4988_v54 = vpop.permute.xlu1 %1977 }
 0x2f3   : > { %v4986_v29 = vpop.permute.xlu0 %1982 }
 0x2f5   : > { %v4991_v35 = vpop.permute.xlu1 %1987 }
 0x2f6   : > { %5455 = vst [vmem:[#allocation68_spill] sm:$0xff] %v4991_v35 }
 0x320   : > { %v1647_v40 = vpop.xlane.xlu0 %1646 }
 0x321   : > { %v1739_v11 = vadd.f32 %v1647_v40, %v1611_v4  ;;  %v1584_v4 = vld [vmem:[#allocation3 + $0x30] sm:$0xff]  ;;  %v1804_v40 = vld [vmem:[#allocation4 + $0x8] sm:$0xff] }
 0x322   : > { %v1616_v32 = vmul.f32 %v4579_v25, %v1584_v4 }
 0x323   : > { %1772 = vst.msk [vmem:[#allocation3 + $0x8] sm:$0xff] %vm294_vm1, %v1739_v11 }
 0x324   : > { %v1650_v60 = vpop.xlane.xlu0 %1649 }
 0x325   : > { %v1740_v56 = vadd.f32 %v1650_v60, %v1612_v34 }
 0x327   : > { %1773 = vst.msk [vmem:[#allocation3 + $0x10] sm:$0xff] %vm294_vm1, %v1740_v56  ;;  %v1644_v30 = vpop.xlane.xlu1 %1643  ;;  %v1583_v56 = vld [vmem:[#allocation3 + $0x28] sm:$0xff] }
 0x328   : > { %v3233_v33 = vpop.f32.mrb[0].mxu1  ;;  %v1738_v41 = vadd.f32 %v1644_v30, %v1610_v6  ;;  %v1656_v39 = vpop.xlane.xlu0 %1655  ;;  %v1996_v6 = vmul.f32 %v4926_v47, %v1804_v40  ;;  %v1615_v14 = vmul.f32 %v4573_v16, %v1583_v56  ;;  %v1585_v47 = vld [vmem:[#allocation3 + $0x38] sm:$0xff] }
 0x329   : > { %v3234_v11 = vpop.f32.mrb[1].mxu1  ;;  %v1742_v59 = vadd.f32 %v1656_v39, %v1614_v17  ;;  %v1586_v39 = vld [vmem:[#allocation3 + $0x40] sm:$0xff] }
 0x32a   : > { %v2448_v35 = vld [vmem:[#allocation3 + $0x8] sm:$0xff]  ;;  %1771 = vst.msk [vmem:[#allocation3] sm:$0xff] %vm294_vm1, %v1738_v41  ;;  %v3235_v10 = vadd.f32 %v3234_v11, %v3233_v33  ;;  %v3236_v34 = vpop.f32.mrb[2].mxu1  ;;  %v1618_v51 = vmul.f32 %v4589_v18, %v1586_v39  ;;  %v1617_v18 = vmul.f32 %v4587_v63, %v1585_v47 }
 0x32b   : > { %3606 = vrcp.f32 %v2448_v35  ;;  %1775 = vst.msk [vmem:[#allocation3 + $0x20] sm:$0xff] %vm294_vm1, %v1742_v59  ;;  %v3237_v42 = vpop.f32.mrb[3].mxu1  ;;  %v1653_v60 = vpop.xlane.xlu1 %1652  ;;  %v1805_v35 = vld [vmem:[#allocation4 + $0x10] sm:$0xff] }
 0x32c   : > { %v2348_v30 = vadd.f32 %v3235_v10, %v1995_v44  ;;  %v3238_v17 = vadd.f32 %v3237_v42, %v3236_v34  ;;  %v1741_v0 = vadd.f32 %v1653_v60, %v1613_v20  ;;  %v1662_v58 = vpop.xlane.xlu0 %1661  ;;  %v1588_v59 = vld [vmem:[#allocation3 + $0x50] sm:$0xff]  ;;  %v1806_v44 = vld [vmem:[#allocation4 + $0x18] sm:$0xff]  ;;  %v1997_v42 = vmul.f32 %v4930_v55, %v1805_v35 }
 0x32d   : > { %v1744_v41 = vadd.f32 %v1662_v58, %v1616_v32 }
 0x32e   : > { %2380 = vst.msk [vmem:[#allocation4] sm:$0xff] %vm359_vm0, %v2348_v30  ;;  %v2349_v33 = vadd.f32 %v3238_v17, %v1996_v6  ;;  %v2449_v16 = vld [vmem:[#allocation3 + $0x10] sm:$0xff]  ;;  %v1620_v30 = vmul.f32 %v4600_v45, %v1588_v59  ;;  %v1587_v17 = vld [vmem:[#allocation3 + $0x48] sm:$0xff] }
 0x32f   : > { %1774 = vst.msk [vmem:[#allocation3 + $0x18] sm:$0xff] %vm294_vm1, %v1741_v0  ;;  %1777 = vst.msk [vmem:[#allocation3 + $0x30] sm:$0xff] %vm294_vm1, %v1744_v41  ;;  %v1659_v25 = vpop.xlane.xlu1 %1658  ;;  %v1998_v0 = vmul.f32 %v4928_v62, %v1806_v44  ;;  %v1619_v45 = vmul.f32 %v4595_v22, %v1587_v17  ;;  %v1807_v62 = vld [vmem:[#allocation4 + $0x20] sm:$0xff]  ;;  %v1591_v17 = vld [vmem:[#allocation3 + $0x68] sm:$0xff] }
 0x330   : > { %2381 = vst.msk [vmem:[#allocation4 + $0x8] sm:$0xff] %vm359_vm0, %v2349_v33  ;;  %v3239_v4 = vpop.f32.mrb[4].mxu1  ;;  %v1743_v40 = vadd.f32 %v1659_v25, %v1615_v14  ;;  %v1668_v11 = vpop.xlane.xlu0 %1667  ;;  %v1590_v33 = vld [vmem:[#allocation3 + $0x60] sm:$0xff]  ;;  %v1999_v22 = vmul.f32 %v4934_v21, %v1807_v62  ;;  %v1593_v62 = vld [vmem:[#allocation3 + $0x78] sm:$0xff] }
 0x331   : > { %v2447_v10 = vld [vmem:[#allocation3] sm:$0xff]  ;;  %v3240_v34 = vpop.f32.mrb[5].mxu1  ;;  %v1746_v20 = vadd.f32 %v1668_v11, %v1618_v51 }
 0x332   : > { %3608 = vrcp.f32 %v2447_v10  ;;  %1776 = vst.msk [vmem:[#allocation3 + $0x28] sm:$0xff] %vm294_vm1, %v1743_v40  ;;  %v3241_v60 = vadd.f32 %v3240_v34, %v3239_v4  ;;  %v3242_v32 = vpop.f32.mrb[6].mxu1  ;;  %v2451_v51 = vld [vmem:[#allocation3 + $0x20] sm:$0xff]  ;;  %v1622_v4 = vmul.f32 %v4614_v23, %v1590_v33  ;;  %v1589_v40 = vld [vmem:[#allocation3 + $0x58] sm:$0xff]  ;;  %v1592_v10 = vld [vmem:[#allocation3 + $0x70] sm:$0xff] }
 0x333   : > { %1779 = vst.msk [vmem:[#allocation3 + $0x40] sm:$0xff] %vm294_vm1, %v1746_v20  ;;  %v3243_v56 = vpop.f32.mrb[7].mxu1  ;;  %v1665_v6 = vpop.xlane.xlu1 %1664  ;;  %3610 = vrcp.f32 %v2449_v16  ;;  %v1808_v34 = vld [vmem:[#allocation4 + $0x28] sm:$0xff]  ;;  %v1594_v33 = vld [vmem:[#allocation3 + $0x80] sm:$0xff] }
 0x334   : > { %v2350_v58 = vadd.f32 %v3241_v60, %v1997_v42  ;;  %v3244_v39 = vadd.f32 %v3243_v56, %v3242_v32  ;;  %v1745_v55 = vadd.f32 %v1665_v6, %v1617_v18  ;;  %v1674_v41 = vpop.xlane.xlu0 %1673  ;;  %v1621_v18 = vmul.f32 %v4605_v3, %v1589_v40 }
 0x335   : > { %v3607_v14 = vpop.eup %3606  ;;  %v1748_v25 = vadd.f32 %v1674_v41, %v1620_v30  ;;  %v1624_v30 = vmul.f32 %v4630_v13, %v1592_v10  ;;  %v1623_v13 = vmul.f32 %v4621_v50, %v1591_v17 }
 0x336   : > { %v2450_v35 = vld [vmem:[#allocation3 + $0x18] sm:$0xff]  ;;  %2382 = vst.msk [vmem:[#allocation4 + $0x10] sm:$0xff] %vm359_vm0, %v2350_v58  ;;  %v2351_v63 = vadd.f32 %v3244_v39, %v1998_v0  ;;  %2550 = vperm.xlu0 %3364, %v3607_v14   ;;  %v2453_v60 = vld [vmem:[#allocation3 + $0x30] sm:$0xff]  ;;  %v2000_v58 = vmul.f32 %v4932_v38, %v1808_v34 }
 0x337   : > { %3612 = vrcp.f32 %v2450_v35  ;;  %1778 = vst.msk [vmem:[#allocation3 + $0x38] sm:$0xff] %vm294_vm1, %v1745_v55  ;;  %1781 = vst.msk [vmem:[#allocation3 + $0x50] sm:$0xff] %vm294_vm1, %v1748_v25  ;;  %v1671_v47 = vpop.xlane.xlu1 %1670  ;;  %v1809_v38 = vld [vmem:[#allocation4 + $0x30] sm:$0xff] }
 0x338   : > { %2383 = vst.msk [vmem:[#allocation4 + $0x18] sm:$0xff] %vm359_vm0, %v2351_v63  ;;  %v3245_v11 = vpop.f32.mrb[8].mxu1  ;;  %v1747_v59 = vadd.f32 %v1671_v47, %v1619_v45  ;;  %v1680_v44 = vpop.xlane.xlu0 %1679  ;;  %3614 = vrcp.f32 %v2451_v51  ;;  %v1626_v45 = vmul.f32 %v4648_v37, %v1594_v33 }
 0x339   : > { %v2452_v20 = vld [vmem:[#allocation3 + $0x28] sm:$0xff]  ;;  %v3246_v42 = vpop.f32.mrb[9].mxu1  ;;  %v1750_v16 = vadd.f32 %v1680_v44, %v1622_v4  ;;  %v1810_v44 = vld [vmem:[#allocation4 + $0x38] sm:$0xff] }
 0x33a   : > { %3616 = vrcp.f32 %v2452_v20  ;;  %1780 = vst.msk [vmem:[#allocation3 + $0x48] sm:$0xff] %vm294_vm1, %v1747_v59  ;;  %v3247_v32 = vadd.f32 %v3246_v42, %v3245_v11  ;;  %v3248_v23 = vpop.f32.mrb[10].mxu1  ;;  %v2455_v3 = vld [vmem:[#allocation3 + $0x40] sm:$0xff]  ;;  %v1596_v59 = vld [vmem:[#allocation3 + $0x90] sm:$0xff]  ;;  %v2001_v20 = vmul.f32 %v4941_v8, %v1809_v38 }
 0x33b   : > { %1783 = vst.msk [vmem:[#allocation3 + $0x60] sm:$0xff] %vm294_vm1, %v1750_v16  ;;  %v3249_v56 = vpop.f32.mrb[11].mxu1  ;;  %v1677_v6 = vpop.xlane.xlu1 %1676  ;;  %3618 = vrcp.f32 %v2453_v60  ;;  %v5459_v38 = vld [vmem:[#allocation59_spill] sm:$0xff] }
 0x33c   : > { %v3609_v0 = vpop.eup %3608  ;;  %v2352_v39 = vadd.f32 %v3247_v32, %v1999_v22  ;;  %v3250_v21 = vadd.f32 %v3249_v56, %v3248_v23  ;;  %v1749_v55 = vadd.f32 %v1677_v6, %v1621_v18  ;;  %v1686_v41 = vpop.xlane.xlu0 %1685  ;;  %v5456_v22 = vld [vmem:[#allocation5_spill] sm:$0xff] }
 0x33d   : > { %v1752_v35 = vadd.f32 %v1686_v41, %v1624_v30  ;;  %2545 = vperm.xlu1 %3365, %v3609_v0   ;;  %v3611_v51 = vpop.eup %3610  ;;  %v1625_v60 = vmul.f32 %v5456_v22, %v1593_v62  ;;  %v5457_v56 = vld [vmem:[#allocation65_spill] sm:$0xff]  ;;  %v1595_v30 = vld [vmem:[#allocation3 + $0x88] sm:$0xff]  ;;  %v2002_v0 = vmul.f32 %v4939_v49, %v1810_v44 }
 0x33e   : > { %v2454_v14 = vld [vmem:[#allocation3 + $0x38] sm:$0xff]  ;;  %2384 = vst.msk [vmem:[#allocation4 + $0x20] sm:$0xff] %vm359_vm0, %v2352_v39  ;;  %v2353_v25 = vadd.f32 %v3250_v21, %v2000_v58  ;;  %v2457_v42 = vld [vmem:[#allocation3 + $0x50] sm:$0xff]  ;;  %v1628_v6 = vmul.f32 %v5457_v56, %v1596_v59  ;;  %v1812_v59 = vld [vmem:[#allocation4 + $0x48] sm:$0xff] }
 0x33f   : > { %3620 = vrcp.f32 %v2454_v14  ;;  %1782 = vst.msk [vmem:[#allocation3 + $0x58] sm:$0xff] %vm294_vm1, %v1749_v55  ;;  %1785 = vst.msk [vmem:[#allocation3 + $0x70] sm:$0xff] %vm294_vm1, %v1752_v35  ;;  %v1683_v63 = vpop.xlane.xlu1 %1682  ;;  %v1598_v55 = vld [vmem:[#allocation3 + $0xa0] sm:$0xff] }
 0x340   : > { %2385 = vst.msk [vmem:[#allocation4 + $0x28] sm:$0xff] %vm359_vm0, %v2353_v25  ;;  %v3251_v4 = vpop.f32.mrb[12].mxu1  ;;  %v1751_v40 = vadd.f32 %v1683_v63, %v1623_v13  ;;  %v1692_v11 = vpop.xlane.xlu0 %1691  ;;  %3622 = vrcp.f32 %v2455_v3  ;;  %v5458_v3 = vld [vmem:[#allocation6_spill] sm:$0xff]  ;;  %v1811_v13 = vld [vmem:[#allocation4 + $0x40] sm:$0xff]  ;;  %v1630_v63 = vmul.f32 %v5459_v38, %v1598_v55 }
 0x341   : > { %v3613_v47 = vpop.eup %3612  ;;  %v2456_v10 = vld [vmem:[#allocation3 + $0x48] sm:$0xff]  ;;  %v3252_v34 = vpop.f32.mrb[13].mxu1  ;;  %v1754_v50 = vadd.f32 %v1692_v11, %v1626_v45  ;;  %2555 = vperm.xlu1 %3365, %v3611_v51   ;;  %v1627_v25 = vmul.f32 %v5458_v3, %v1595_v30  ;;  %v1597_v45 = vld [vmem:[#allocation3 + $0x98] sm:$0xff]  ;;  %v1600_v11 = vld [vmem:[#allocation3 + $0xb0] sm:$0xff] }
 0x342   : > { %2560 = vperm.xlu0 %3364, %v3613_v47   ;;  %3624 = vrcp.f32 %v2456_v10  ;;  %1784 = vst.msk [vmem:[#allocation3 + $0x68] sm:$0xff] %vm294_vm1, %v1751_v40  ;;  %v3253_v37 = vadd.f32 %v3252_v34, %v3251_v4  ;;  %v3254_v16 = vpop.f32.mrb[14].mxu1  ;;  %v3615_v32 = vpop.eup %3614  ;;  %v2459_v14 = vld [vmem:[#allocation3 + $0x60] sm:$0xff]  ;;  %v1813_v3 = vld [vmem:[#allocation4 + $0x50] sm:$0xff] }
 0x343   : > { %1787 = vst.msk [vmem:[#allocation3 + $0x80] sm:$0xff] %vm294_vm1, %v1754_v50  ;;  %v3255_v23 = vpop.f32.mrb[15].mxu1  ;;  %v1689_v18 = vpop.xlane.xlu1 %1688  ;;  %3626 = vrcp.f32 %v2457_v42  ;;  %v2003_v50 = vmul.f32 %v4945_v12, %v1811_v13 }
 0x344   : > { %v3617_v17 = vpop.eup %3616  ;;  %v2354_v8 = vadd.f32 %v3253_v37, %v2001_v20  ;;  %v3256_v58 = vadd.f32 %v3255_v23, %v3254_v16  ;;  %v1753_v39 = vadd.f32 %v1689_v18, %v1625_v60  ;;  %v1698_v21 = vpop.xlane.xlu0 %1697  ;;  %v5460_v16 = vld [vmem:[#allocation63_spill] sm:$0xff]  ;;  %v5461_v18 = vld [vmem:[#allocation60_spill] sm:$0xff] }
 0x345   : > { %v1756_v33 = vadd.f32 %v1698_v21, %v1628_v6  ;;  %2565 = vperm.xlu1 %3365, %v3615_v32   ;;  %v3619_v49 = vpop.eup %3618  ;;  %v1629_v22 = vmul.f32 %v5460_v16, %v1597_v45  ;;  %v1632_v56 = vmul.f32 %v5461_v18, %v1600_v11  ;;  %v1599_v6 = vld [vmem:[#allocation3 + $0xa8] sm:$0xff] }
 0x346   : > { %v2458_v41 = vld [vmem:[#allocation3 + $0x58] sm:$0xff]  ;;  %2570 = vperm.xlu0 %3364, %v3617_v17   ;;  %2386 = vst.msk [vmem:[#allocation4 + $0x30] sm:$0xff] %vm359_vm0, %v2354_v8  ;;  %v2355_v35 = vadd.f32 %v3256_v58, %v2002_v0  ;;  %v2461_v20 = vld [vmem:[#allocation3 + $0x70] sm:$0xff]  ;;  %v2004_v17 = vmul.f32 %v4943_v53, %v1812_v59 }
 0x347   : > { %3628 = vrcp.f32 %v2458_v41  ;;  %1786 = vst.msk [vmem:[#allocation3 + $0x78] sm:$0xff] %vm294_vm1, %v1753_v39  ;;  %1789 = vst.msk [vmem:[#allocation3 + $0x90] sm:$0xff] %vm294_vm1, %v1756_v33  ;;  %v1695_v51 = vpop.xlane.xlu1 %1694  ;;  %v1602_v39 = vld [vmem:[#allocation3 + $0xc0] sm:$0xff] }
 0x348   : > { %2387 = vst.msk [vmem:[#allocation4 + $0x38] sm:$0xff] %vm359_vm0, %v2355_v35  ;;  %v3257_v47 = vpop.f32.mrb[16].mxu1  ;;  %v1755_v4 = vadd.f32 %v1695_v51, %v1627_v25  ;;  %v1704_v40 = vpop.xlane.xlu0 %1703  ;;  %3630 = vrcp.f32 %v2459_v14  ;;  %v5462_v14 = vld [vmem:[#allocation61_spill] sm:$0xff]  ;;  %v1601_v51 = vld [vmem:[#allocation3 + $0xb8] sm:$0xff] }
 0x349   : > { %v3621_v62 = vpop.eup %3620  ;;  %v2460_v44 = vld [vmem:[#allocation3 + $0x68] sm:$0xff]  ;;  %v3258_v10 = vpop.f32.mrb[17].mxu1  ;;  %v1758_v34 = vadd.f32 %v1704_v40, %v1630_v63  ;;  %2575 = vperm.xlu1 %3365, %v3619_v49   ;;  %v1631_v35 = vmul.f32 %v5462_v14, %v1599_v6  ;;  %v5463_v49 = vld [vmem:[#allocation7_spill] sm:$0xff]  ;;  %v5467_v14 = vld [vmem:[#allocation69_spill] sm:$0xff] }
 0x34a   : > { %2580 = vperm.xlu0 %3364, %v3621_v62   ;;  %3632 = vrcp.f32 %v2460_v44  ;;  %1788 = vst.msk [vmem:[#allocation3 + $0x88] sm:$0xff] %vm294_vm1, %v1755_v4  ;;  %v3259_v42 = vadd.f32 %v3258_v10, %v3257_v47  ;;  %v3260_v37 = vpop.f32.mrb[18].mxu1  ;;  %v3623_v60 = vpop.eup %3622  ;;  %v2463_v41 = vld [vmem:[#allocation3 + $0x80] sm:$0xff]  ;;  %v1634_v13 = vmul.f32 %v5463_v49, %v1602_v39  ;;  %v1604_v47 = vld [vmem:[#allocation3 + $0xd0] sm:$0xff]  ;;  %v1814_v4 = vld [vmem:[#allocation4 + $0x58] sm:$0xff]  ;;  %v2005_v44 = vmul.f32 %v4952_v36, %v1813_v3 }
 0x34b   : > { %1791 = vst.msk [vmem:[#allocation3 + $0xa0] sm:$0xff] %vm294_vm1, %v1758_v34  ;;  %v3261_v32 = vpop.f32.mrb[19].mxu1  ;;  %v1701_v23 = vpop.xlane.xlu1 %1700  ;;  %3634 = vrcp.f32 %v2461_v20  ;;  %v5464_v20 = vld [vmem:[#allocation62_spill] sm:$0xff] }
 0x34c   : > { %v3625_v30 = vpop.eup %3624  ;;  %v2356_v12 = vadd.f32 %v3259_v42, %v2003_v50  ;;  %v3262_v0 = vadd.f32 %v3261_v32, %v3260_v37  ;;  %v1757_v8 = vadd.f32 %v1701_v23, %v1629_v22  ;;  %v1710_v58 = vpop.xlane.xlu0 %1709  ;;  %v1633_v42 = vmul.f32 %v5464_v20, %v1601_v51  ;;  %v1603_v23 = vld [vmem:[#allocation3 + $0xc8] sm:$0xff]  ;;  %v1608_v51 = vld [vmem:[#allocation3 + $0xf0] sm:$0xff] }
 0x34d   : > { %v1760_v55 = vadd.f32 %v1710_v58, %v1632_v56  ;;  %2585 = vperm.xlu1 %3365, %v3623_v60   ;;  %v3627_v53 = vpop.eup %3626  ;;  %v5465_v60 = vld [vmem:[#allocation66_spill] sm:$0xff]  ;;  %v2006_v56 = vmul.f32 %v4950_v9, %v1814_v4 }
 0x34e   : > { %v2462_v21 = vld [vmem:[#allocation3 + $0x78] sm:$0xff]  ;;  %2590 = vperm.xlu0 %3364, %v3625_v30   ;;  %2388 = vst.msk [vmem:[#allocation4 + $0x40] sm:$0xff] %vm359_vm0, %v2356_v12  ;;  %v2357_v33 = vadd.f32 %v3262_v0, %v2004_v17  ;;  %v2465_v10 = vld [vmem:[#allocation3 + $0x90] sm:$0xff]  ;;  %v1636_v32 = vmul.f32 %v5465_v60, %v1604_v47  ;;  %v1606_v12 = vld [vmem:[#allocation3 + $0xe0] sm:$0xff] }
 0x34f   : > { %3636 = vrcp.f32 %v2462_v21  ;;  %1790 = vst.msk [vmem:[#allocation3 + $0x98] sm:$0xff] %vm294_vm1, %v1757_v8  ;;  %1793 = vst.msk [vmem:[#allocation3 + $0xb0] sm:$0xff] %vm294_vm1, %v1760_v55  ;;  %v1707_v25 = vpop.xlane.xlu1 %1706  ;;  %v5466_v21 = vld [vmem:[#allocation8_spill] sm:$0xff]  ;;  %v5469_v20 = vld [vmem:[#allocation70_spill] sm:$0xff] }
 0x350   : > { %2389 = vst.msk [vmem:[#allocation4 + $0x48] sm:$0xff] %vm359_vm0, %v2357_v33  ;;  %v3263_v63 = vpop.f32.mrb[20].mxu1  ;;  %v1759_v45 = vadd.f32 %v1707_v25, %v1631_v35  ;;  %v1716_v62 = vpop.xlane.xlu0 %1715  ;;  %3638 = vrcp.f32 %v2463_v41  ;;  %v1635_v55 = vmul.f32 %v5466_v21, %v1603_v23  ;;  %v1815_v41 = vld [vmem:[#allocation4 + $0x60] sm:$0xff]  ;;  %v1638_v35 = vmul.f32 %v5467_v14, %v1606_v12 }
 0x351   : > { %v3629_v38 = vpop.eup %3628  ;;  %v2464_v40 = vld [vmem:[#allocation3 + $0x88] sm:$0xff]  ;;  %v3264_v11 = vpop.f32.mrb[21].mxu1  ;;  %v1762_v59 = vadd.f32 %v1716_v62, %v1634_v13  ;;  %2595 = vperm.xlu1 %3365, %v3627_v53   ;;  %v1605_v53 = vld [vmem:[#allocation3 + $0xd8] sm:$0xff]  ;;  %v2007_v47 = vmul.f32 %v4956_v27, %v1815_v41 }
 0x352   : > { %2600 = vperm.xlu0 %3364, %v3629_v38   ;;  %3640 = vrcp.f32 %v2464_v40  ;;  %1792 = vst.msk [vmem:[#allocation3 + $0xa8] sm:$0xff] %vm294_vm1, %v1759_v45  ;;  %v3265_v34 = vadd.f32 %v3264_v11, %v3263_v63  ;;  %v3266_v50 = vpop.f32.mrb[22].mxu1  ;;  %v3631_v37 = vpop.eup %3630  ;;  %v2467_v58 = vld [vmem:[#allocation3 + $0xa0] sm:$0xff]  ;;  %v1816_v38 = vld [vmem:[#allocation4 + $0x68] sm:$0xff] }
 0x353   : > { %1795 = vst.msk [vmem:[#allocation3 + $0xc0] sm:$0xff] %vm294_vm1, %v1762_v59  ;;  %v3267_v16 = vpop.f32.mrb[23].mxu1  ;;  %v1713_v22 = vpop.xlane.xlu1 %1712  ;;  %3642 = vrcp.f32 %v2465_v10  ;;  %v5468_v59 = vld [vmem:[#allocation64_spill] sm:$0xff] }
 0x354   : > { %v3633_v18 = vpop.eup %3632  ;;  %v2358_v36 = vadd.f32 %v3265_v34, %v2005_v44  ;;  %v3268_v6 = vadd.f32 %v3267_v16, %v3266_v50  ;;  %v1761_v30 = vadd.f32 %v1713_v22, %v1633_v42  ;;  %v1722_v17 = vpop.xlane.xlu0 %1721  ;;  %v1637_v44 = vmul.f32 %v5468_v59, %v1605_v53  ;;  %v1820_v59 = vld [vmem:[#allocation4 + $0x88] sm:$0xff] }
 0x355   : > { %v1764_v8 = vadd.f32 %v1722_v17, %v1636_v32  ;;  %2605 = vperm.xlu1 %3365, %v3631_v37   ;;  %v3635_v9 = vpop.eup %3634  ;;  %v1640_v42 = vmul.f32 %v5469_v20, %v1608_v51  ;;  %v1607_v37 = vld [vmem:[#allocation3 + $0xe8] sm:$0xff]  ;;  %v2008_v22 = vmul.f32 %v4954_v7, %v1816_v38  ;;  %v1817_v7 = vld [vmem:[#allocation4 + $0x70] sm:$0xff] }
 0x356   : > { %v2466_v0 = vld [vmem:[#allocation3 + $0x98] sm:$0xff]  ;;  %2610 = vperm.xlu0 %3364, %v3633_v18   ;;  %2390 = vst.msk [vmem:[#allocation4 + $0x50] sm:$0xff] %vm359_vm0, %v2358_v36  ;;  %v2359_v39 = vadd.f32 %v3268_v6, %v2006_v56  ;;  %v2469_v4 = vld [vmem:[#allocation3 + $0xb0] sm:$0xff] }
 0x357   : > { %3644 = vrcp.f32 %v2466_v0  ;;  %1794 = vst.msk [vmem:[#allocation3 + $0xb8] sm:$0xff] %vm294_vm1, %v1761_v30  ;;  %1797 = vst.msk [vmem:[#allocation3 + $0xd0] sm:$0xff] %vm294_vm1, %v1764_v8  ;;  %v1719_v33 = vpop.xlane.xlu1 %1718  ;;  %v5470_v30 = vld [vmem:[#allocation67_spill] sm:$0xff]  ;;  %v1609_v8 = vld [vmem:[#allocation3 + $0xf8] sm:$0xff] }
 0x358   : > { %2391 = vst.msk [vmem:[#allocation4 + $0x58] sm:$0xff] %vm359_vm0, %v2359_v39  ;;  %v3269_v25 = vpop.f32.mrb[24].mxu1  ;;  %v1763_v49 = vadd.f32 %v1719_v33, %v1635_v55  ;;  %v1728_v13 = vpop.xlane.xlu0 %1727  ;;  %3646 = vrcp.f32 %v2467_v58  ;;  %v1639_v17 = vmul.f32 %v5470_v30, %v1607_v37  ;;  %v1818_v55 = vld [vmem:[#allocation4 + $0x78] sm:$0xff]  ;;  %v2009_v33 = vmul.f32 %v4960_v31, %v1817_v7 }
 0x359   : > { %v3637_v3 = vpop.eup %3636  ;;  %v2468_v63 = vld [vmem:[#allocation3 + $0xa8] sm:$0xff]  ;;  %v3270_v45 = vpop.f32.mrb[25].mxu1  ;;  %v1766_v62 = vadd.f32 %v1728_v13, %v1638_v35  ;;  %2615 = vperm.xlu1 %3365, %v3635_v9   ;;  %v2010_v38 = vmul.f32 %v4958_v43, %v1818_v55  ;;  %v1822_v30 = vld [vmem:[#allocation4 + $0x98] sm:$0xff] }
 0x35a   : > { %2620 = vperm.xlu0 %3364, %v3637_v3   ;;  %3648 = vrcp.f32 %v2468_v63  ;;  %1796 = vst.msk [vmem:[#allocation3 + $0xc8] sm:$0xff] %vm294_vm1, %v1763_v49  ;;  %v3271_v40 = vadd.f32 %v3270_v45, %v3269_v25  ;;  %v3272_v11 = vpop.f32.mrb[26].mxu1  ;;  %v3639_v10 = vpop.eup %3638  ;;  %v2471_v36 = vld [vmem:[#allocation3 + $0xc0] sm:$0xff]  ;;  %v1641_v3 = vmul.f32 %v4947_v24, %v1609_v8 }
 0x35b   : > { %1799 = vst.msk [vmem:[#allocation3 + $0xe0] sm:$0xff] %vm294_vm1, %v1766_v62  ;;  %v3273_v34 = vpop.f32.mrb[27].mxu1  ;;  %v1725_v50 = vpop.xlane.xlu1 %1724  ;;  %3650 = vrcp.f32 %v2469_v4 }
 0x35c   : > { %v3641_v16 = vpop.eup %3640  ;;  %v2360_v27 = vadd.f32 %v3271_v40, %v2007_v47  ;;  %v3274_v60 = vadd.f32 %v3273_v34, %v3272_v11  ;;  %v1765_v32 = vadd.f32 %v1725_v50, %v1637_v44  ;;  %v1734_v23 = vpop.xlane.xlu0 %1733  ;;  %v1819_v40 = vld [vmem:[#allocation4 + $0x80] sm:$0xff] }
 0x35d   : > { %v1768_v56 = vadd.f32 %v1734_v23, %v1640_v42  ;;  %2625 = vperm.xlu1 %3365, %v3639_v10   ;;  %v3643_v12 = vpop.eup %3642  ;;  %v2011_v34 = vmul.f32 %v4964_v26, %v1819_v40 }
 0x35e   : > { %v2470_v18 = vld [vmem:[#allocation3 + $0xb8] sm:$0xff]  ;;  %2630 = vperm.xlu0 %3364, %v3641_v16   ;;  %2392 = vst.msk [vmem:[#allocation4 + $0x60] sm:$0xff] %vm359_vm0, %v2360_v27  ;;  %v2361_v6 = vadd.f32 %v3274_v60, %v2008_v22  ;;  %v2473_v14 = vld [vmem:[#allocation3 + $0xd0] sm:$0xff]  ;;  %v2012_v27 = vmul.f32 %v4962_v1, %v1820_v59 }
 0x35f   : > { %3652 = vrcp.f32 %v2470_v18  ;;  %1798 = vst.msk [vmem:[#allocation3 + $0xd8] sm:$0xff] %vm294_vm1, %v1765_v32  ;;  %1801 = vst.msk [vmem:[#allocation3 + $0xf0] sm:$0xff] %vm294_vm1, %v1768_v56  ;;  %v1731_v0 = vpop.xlane.xlu1 %1730  ;;  %v1821_v56 = vld [vmem:[#allocation4 + $0x90] sm:$0xff] }
 0x360   : > { %2393 = vst.msk [vmem:[#allocation4 + $0x68] sm:$0xff] %vm359_vm0, %v2361_v6  ;;  %v3275_v39 = vpop.f32.mrb[28].mxu1  ;;  %v1767_v21 = vadd.f32 %v1731_v0, %v1639_v17  ;;  %3654 = vrcp.f32 %v2471_v36  ;;  %v2013_v1 = vmul.f32 %v4968_v52, %v1821_v56 }
 0x361   : > { %v3645_v58 = vpop.eup %3644  ;;  %v2472_v9 = vld [vmem:[#allocation3 + $0xc8] sm:$0xff]  ;;  %v3276_v41 = vpop.f32.mrb[29].mxu1  ;;  %2635 = vperm.xlu1 %3365, %v3643_v12  }
 0x362   : > { %2640 = vperm.xlu0 %3364, %v3645_v58   ;;  %3656 = vrcp.f32 %v2472_v9  ;;  %1800 = vst.msk [vmem:[#allocation3 + $0xe8] sm:$0xff] %vm294_vm1, %v1767_v21  ;;  %v3277_v35 = vadd.f32 %v3276_v41, %v3275_v39  ;;  %v3278_v53 = vpop.f32.mrb[30].mxu1  ;;  %v3647_v25 = vpop.eup %3646  ;;  %v2475_v31 = vld [vmem:[#allocation3 + $0xe0] sm:$0xff]  ;;  %v2014_v39 = vmul.f32 %v4966_v46, %v1822_v30 }
 0x363   : > { %v3279_v49 = vpop.f32.mrb[31].mxu1  ;;  %v1737_v13 = vpop.xlane.xlu1 %1736  ;;  %3658 = vrcp.f32 %v2473_v14 }
 0x364   : > { %v3649_v51 = vpop.eup %3648  ;;  %v2362_v63 = vadd.f32 %v3277_v35, %v2009_v33  ;;  %v3280_v45 = vadd.f32 %v3279_v49, %v3278_v53  ;;  %v1769_v62 = vadd.f32 %v1737_v13, %v1641_v3  ;;  %v1823_v33 = vld [vmem:[#allocation4 + $0xa0] sm:$0xff]  ;;  %v1824_v35 = vld [vmem:[#allocation4 + $0xa8] sm:$0xff] }
 0x365   : > { %2645 = vperm.xlu1 %3365, %v3647_v25   ;;  %v3651_v24 = vpop.eup %3650  ;;  %v2015_v3 = vmul.f32 %v4972_v57, %v1823_v33  ;;  %v2016_v13 = vmul.f32 %v4970_v28, %v1824_v35 }
 0x366   : > { %v2474_v47 = vld [vmem:[#allocation3 + $0xd8] sm:$0xff]  ;;  %2650 = vperm.xlu0 %3364, %v3649_v51   ;;  %2394 = vst.msk [vmem:[#allocation4 + $0x70] sm:$0xff] %vm359_vm0, %v2362_v63  ;;  %v2363_v4 = vadd.f32 %v3280_v45, %v2010_v38  ;;  %v2477_v50 = vld [vmem:[#allocation3 + $0xf0] sm:$0xff] }
 0x367   : > { %3660 = vrcp.f32 %v2474_v47  ;;  %1802 = vst.msk [vmem:[#allocation3 + $0xf8] sm:$0xff] %vm294_vm1, %v1769_v62  ;;  %v1825_v45 = vld [vmem:[#allocation4 + $0xb0] sm:$0xff]  ;;  %v1826_v47 = vld [vmem:[#allocation4 + $0xb8] sm:$0xff] }
 0x368   : > { %2395 = vst.msk [vmem:[#allocation4 + $0x78] sm:$0xff] %vm359_vm0, %v2363_v4  ;;  %v3281_v43 = vpop.f32.mrb[32].mxu1  ;;  %3662 = vrcp.f32 %v2475_v31  ;;  %v2017_v4 = vmul.f32 %v4976_v5, %v1825_v45 }
 0x369   : > { %v3653_v11 = vpop.eup %3652  ;;  %v2476_v44 = vld [vmem:[#allocation3 + $0xe8] sm:$0xff]  ;;  %v3282_v10 = vpop.f32.mrb[33].mxu1  ;;  %2655 = vperm.xlu1 %3365, %v3651_v24  }
 0x36a   : > { %2660 = vperm.xlu0 %3364, %v3653_v11   ;;  %3664 = vrcp.f32 %v2476_v44  ;;  %v3283_v20 = vadd.f32 %v3282_v10, %v3281_v43  ;;  %v3284_v42 = vpop.f32.mrb[34].mxu1  ;;  %v3655_v37 = vpop.eup %3654  ;;  %v2018_v11 = vmul.f32 %v4974_v48, %v1826_v47  ;;  %v1827_v44 = vld [vmem:[#allocation4 + $0xc0] sm:$0xff] }
 0x36b   : > { %v3285_v16 = vpop.f32.mrb[35].mxu1  ;;  %3666 = vrcp.f32 %v2477_v50  ;;  %v2511_v47 = vld [vmem:[#allocation4] sm:$0xff] }
 0x36c   : > { %v3657_v22 = vpop.eup %3656  ;;  %v2364_v60 = vadd.f32 %v3283_v20, %v2011_v34  ;;  %v3286_v32 = vadd.f32 %v3285_v16, %v3284_v42  ;;  %v1828_v34 = vld [vmem:[#allocation4 + $0xc8] sm:$0xff]  ;;  %v2019_v20 = vmul.f32 %v4980_v15, %v1827_v44 }
 0x36d   : > { %2665 = vperm.xlu1 %3365, %v3655_v37   ;;  %v3659_v26 = vpop.eup %3658  ;;  %v2020_v16 = vmul.f32 %v4978_v19, %v1828_v34  ;;  %v2516_v34 = vld [vmem:[#allocation4 + $0x28] sm:$0xff] }
 0x36e   : > { %v2478_v23 = vld [vmem:[#allocation3 + $0xf8] sm:$0xff]  ;;  %2670 = vperm.xlu0 %3364, %v3657_v22   ;;  %2396 = vst.msk [vmem:[#allocation4 + $0x80] sm:$0xff] %vm359_vm0, %v2364_v60  ;;  %v2365_v18 = vadd.f32 %v3286_v32, %v2012_v27  ;;  %v1829_v60 = vld [vmem:[#allocation4 + $0xd0] sm:$0xff] }
 0x36f   : > { %3668 = vrcp.f32 %v2478_v23  ;;  %v1830_v23 = vld [vmem:[#allocation4 + $0xd8] sm:$0xff] }
 0x370   : > { %2397 = vst.msk [vmem:[#allocation4 + $0x88] sm:$0xff] %vm359_vm0, %v2365_v18  ;;  %v3287_v6 = vpop.f32.mrb[36].mxu1 }
 0x371   : > { %v3661_v36 = vpop.eup %3660  ;;  %v3288_v17 = vpop.f32.mrb[37].mxu1  ;;  %2675 = vperm.xlu1 %3365, %v3659_v26   ;;  %v2021_v26 = vmul.f32 %v4984_v61, %v1829_v60  ;;  %v2517_v60 = vld [vmem:[#allocation4 + $0x30] sm:$0xff] }
 0x372   : > { %2680 = vperm.xlu0 %3364, %v3661_v36   ;;  %v3289_v12 = vadd.f32 %v3288_v17, %v3287_v6  ;;  %v3290_v7 = vpop.f32.mrb[38].mxu1  ;;  %v3663_v0 = vpop.eup %3662  ;;  %v2022_v6 = vmul.f32 %v4982_v2, %v1830_v23 }
 0x373   : > { %v3291_v8 = vpop.f32.mrb[39].mxu1 }
 0x374   : > { %v3665_v58 = vpop.eup %3664  ;;  %v2366_v21 = vadd.f32 %v3289_v12, %v2013_v1  ;;  %v3292_v55 = vadd.f32 %v3291_v8, %v3290_v7  ;;  %v1831_v1 = vld [vmem:[#allocation4 + $0xe0] sm:$0xff]  ;;  %v1832_v7 = vld [vmem:[#allocation4 + $0xe8] sm:$0xff] }
 0x375   : > { %2685 = vperm.xlu1 %3365, %v3663_v0   ;;  %v3667_v41 = vpop.eup %3666  ;;  %v2023_v8 = vmul.f32 %v4988_v54, %v1831_v1 }
 0x376   : > { %2690 = vperm.xlu0 %3364, %v3665_v58   ;;  %2398 = vst.msk [vmem:[#allocation4 + $0x90] sm:$0xff] %vm359_vm0, %v2366_v21  ;;  %v2367_v9 = vadd.f32 %v3292_v55, %v2014_v39  ;;  %v2024_v21 = vmul.f32 %v4986_v29, %v1832_v7  ;;  %v2522_v7 = vld [vmem:[#allocation4 + $0x58] sm:$0xff] }
 0x378   : > { %2399 = vst.msk [vmem:[#allocation4 + $0x98] sm:$0xff] %vm359_vm0, %v2367_v9  ;;  %v3293_v52 = vpop.f32.mrb[40].mxu1 }
 0x379   : > { %v3669_v14 = vpop.eup %3668  ;;  %v3294_v53 = vpop.f32.mrb[41].mxu1  ;;  %2695 = vperm.xlu1 %3365, %v3667_v41   ;;  %v1833_v41 = vld [vmem:[#allocation4 + $0xf0] sm:$0xff] }
 0x37a   : > { %2700 = vperm.xlu0 %3364, %v3669_v14   ;;  %v3295_v46 = vadd.f32 %v3294_v53, %v3293_v52  ;;  %v3296_v25 = vpop.f32.mrb[42].mxu1  ;;  %v1834_v14 = vld [vmem:[#allocation4 + $0xf8] sm:$0xff]  ;;  %v1993_v52 = vpop.permute.xlu0 %1992 }
 0x37b   : > { %v3297_v49 = vpop.f32.mrb[43].mxu1  ;;  %v5471_v53 = vld [vmem:[#allocation68_spill] sm:$0xff] }
 0x37c   : > { %v2368_v51 = vadd.f32 %v3295_v46, %v2015_v3  ;;  %v3298_v38 = vadd.f32 %v3297_v49, %v3296_v25  ;;  %v2025_v54 = vmul.f32 %v5471_v53, %v1833_v41  ;;  %v2026_v49 = vmul.f32 %v1993_v52, %v1834_v14  ;;  %v2523_v41 = vld [vmem:[#allocation4 + $0x60] sm:$0xff] }
 0x37e   : > { %2400 = vst.msk [vmem:[#allocation4 + $0xa0] sm:$0xff] %vm359_vm0, %v2368_v51  ;;  %v2369_v63 = vadd.f32 %v3298_v38, %v2016_v13 }
 0x380   : > { %2401 = vst.msk [vmem:[#allocation4 + $0xa8] sm:$0xff] %vm359_vm0, %v2369_v63  ;;  %v3299_v62 = vpop.f32.mrb[44].mxu1  ;;  %v2512_v63 = vld [vmem:[#allocation4 + $0x8] sm:$0xff] }
 0x381   : > { %v3300_v31 = vpop.f32.mrb[45].mxu1 }
 0x382   : > { %v3301_v24 = vadd.f32 %v3300_v31, %v3299_v62  ;;  %v3302_v57 = vpop.f32.mrb[46].mxu1 }
 0x383   : > { %v3303_v40 = vpop.f32.mrb[47].mxu1 }
 0x384   : > { %v2370_v43 = vadd.f32 %v3301_v24, %v2017_v4  ;;  %v3304_v28 = vadd.f32 %v3303_v40, %v3302_v57  ;;  %v2514_v57 = vld [vmem:[#allocation4 + $0x18] sm:$0xff] }
 0x386   : > { %2402 = vst.msk [vmem:[#allocation4 + $0xb0] sm:$0xff] %vm359_vm0, %v2370_v43  ;;  %v2371_v59 = vadd.f32 %v3304_v28, %v2018_v11  ;;  %v2513_v11 = vld [vmem:[#allocation4 + $0x10] sm:$0xff] }
 0x388   : > { %2403 = vst.msk [vmem:[#allocation4 + $0xb8] sm:$0xff] %vm359_vm0, %v2371_v59  ;;  %v3305_v10 = vpop.f32.mrb[48].mxu1 }
 0x389   : > { %v3306_v50 = vpop.f32.mrb[49].mxu1 }
 0x38a   : > { %v3307_v42 = vadd.f32 %v3306_v50, %v3305_v10  ;;  %v3308_v5 = vpop.f32.mrb[50].mxu1 }
 0x38b   : > { %v3309_v37 = vpop.f32.mrb[51].mxu1 }
 0x38c   : > { %v2372_v22 = vadd.f32 %v3307_v42, %v2019_v20  ;;  %v3310_v48 = vadd.f32 %v3309_v37, %v3308_v5  ;;  %v2515_v20 = vld [vmem:[#allocation4 + $0x20] sm:$0xff] }
 0x38e   : > { %2404 = vst.msk [vmem:[#allocation4 + $0xc0] sm:$0xff] %vm359_vm0, %v2372_v22  ;;  %v2373_v27 = vadd.f32 %v3310_v48, %v2020_v16  ;;  %v2518_v48 = vld [vmem:[#allocation4 + $0x38] sm:$0xff] }
 0x390   : > { %2405 = vst.msk [vmem:[#allocation4 + $0xc8] sm:$0xff] %vm359_vm0, %v2373_v27  ;;  %v3311_v32 = vpop.f32.mrb[52].mxu1 }
 0x391   : > { %v3312_v18 = vpop.f32.mrb[53].mxu1 }
 0x392   : > { %v3313_v56 = vadd.f32 %v3312_v18, %v3311_v32  ;;  %v3314_v15 = vpop.f32.mrb[54].mxu1 }
 0x393   : > { %v3315_v36 = vpop.f32.mrb[55].mxu1 }
 0x394   : > { %v2374_v30 = vadd.f32 %v3313_v56, %v2021_v26  ;;  %v3316_v19 = vadd.f32 %v3315_v36, %v3314_v15  ;;  %v2520_v15 = vld [vmem:[#allocation4 + $0x48] sm:$0xff] }
 0x396   : > { %2406 = vst.msk [vmem:[#allocation4 + $0xd0] sm:$0xff] %vm359_vm0, %v2374_v30  ;;  %v2375_v17 = vadd.f32 %v3316_v19, %v2022_v6  ;;  %v2519_v6 = vld [vmem:[#allocation4 + $0x40] sm:$0xff] }
 0x398   : > { %2407 = vst.msk [vmem:[#allocation4 + $0xd8] sm:$0xff] %vm359_vm0, %v2375_v17  ;;  %v3317_v12 = vpop.f32.mrb[56].mxu1 }
 0x399   : > { %v3318_v0 = vpop.f32.mrb[57].mxu1 }
 0x39a   : > { %v3319_v58 = vadd.f32 %v3318_v0, %v3317_v12  ;;  %v3320_v61 = vpop.f32.mrb[58].mxu1 }
 0x39b   : > { %v3321_v39 = vpop.f32.mrb[59].mxu1 }
 0x39c   : > { %v2376_v55 = vadd.f32 %v3319_v58, %v2023_v8  ;;  %v3322_v2 = vadd.f32 %v3321_v39, %v3320_v61  ;;  %v2521_v8 = vld [vmem:[#allocation4 + $0x50] sm:$0xff] }
 0x39e   : > { %2408 = vst.msk [vmem:[#allocation4 + $0xe0] sm:$0xff] %vm359_vm0, %v2376_v55  ;;  %v2377_v9 = vadd.f32 %v3322_v2, %v2024_v21  ;;  %v2524_v2 = vld [vmem:[#allocation4 + $0x68] sm:$0xff] }
 0x3a0   : > { %2409 = vst.msk [vmem:[#allocation4 + $0xe8] sm:$0xff] %vm359_vm0, %v2377_v9  ;;  %v3323_v33 = vpop.f32.mrb[60].mxu1 }
 0x3a1   : > { %v3324_v35 = vpop.f32.mrb[61].mxu1 }
 0x3a2   : > { %v3325_v3 = vadd.f32 %v3324_v35, %v3323_v33  ;;  %v3326_v46 = vpop.f32.mrb[62].mxu1 }
 0x3a3   : > { %v3327_v25 = vpop.f32.mrb[63].mxu1 }
 0x3a4   : > { %v2378_v29 = vadd.f32 %v3325_v3, %v2025_v54  ;;  %v3328_v13 = vadd.f32 %v3327_v25, %v3326_v46  ;;  %v2526_v54 = vld [vmem:[#allocation4 + $0x78] sm:$0xff]  ;;  %v2525_v46 = vld [vmem:[#allocation4 + $0x70] sm:$0xff] }
 0x3a6   : > { %2410 = vst.msk [vmem:[#allocation4 + $0xf0] sm:$0xff] %vm359_vm0, %v2378_v29  ;;  %v2379_v51 = vadd.f32 %v3328_v13, %v2026_v49 }
 0x3a8   : > { %2411 = vst.msk [vmem:[#allocation4 + $0xf8] sm:$0xff] %vm359_vm0, %v2379_v51 }
 0x3b5   : > { %v2551_v38 = vpop.permute.xlu0 %2550 }
 0x3b6   : > { %v2704_v45 = vmul.f32 %v2551_v38, %v2512_v63  ;;  %v2528_v38 = vld [vmem:[#allocation4 + $0x88] sm:$0xff] }
 0x3b8   : > { %v3138_v62 = vpack.c.bf16 %v2704_v45, %v2704_v45  ;;  %v2527_v45 = vld [vmem:[#allocation4 + $0x80] sm:$0xff] }
 0x3ba   : > { %2865 = vst.msk [vmem:[%s5123_s28 + $0x4] sm:$0xf] %vm2863_vm2, %v3138_v62 }
 0x3bc   : > { %v2546_v31 = vpop.permute.xlu1 %2545 }
 0x3bd   : > { %v2703_v4 = vmul.f32 %v2546_v31, %v2511_v47 }
 0x3bf   : > { %v3137_v24 = vpack.c.bf16 %v2703_v4, %v2703_v4 }
 0x3c0   : > { %v2556_v43 = vpop.permute.xlu1 %2555 }
 0x3c1   : > { %v2561_v40 = vpop.permute.xlu0 %2560  ;;  %2864 = vst.msk [vmem:[%s5123_s28] sm:$0xf] %vm2863_vm2, %v3137_v24  ;;  %v2705_v59 = vmul.f32 %v2556_v43, %v2513_v11  ;;  %v2529_v11 = vld [vmem:[#allocation4 + $0x90] sm:$0xff] }
 0x3c2   : > { %v2706_v28 = vmul.f32 %v2561_v40, %v2514_v57  ;;  %v2530_v57 = vld [vmem:[#allocation4 + $0x98] sm:$0xff] }
 0x3c3   : > { %v3139_v10 = vpack.c.bf16 %v2705_v59, %v2705_v59 }
 0x3c4   : > { %v3140_v44 = vpack.c.bf16 %v2706_v28, %v2706_v28  ;;  %v2566_v42 = vpop.permute.xlu1 %2565 }
 0x3c5   : > { %v2571_v50 = vpop.permute.xlu0 %2570  ;;  %2866 = vst.msk [vmem:[%s5123_s28 + $0x8] sm:$0xf] %vm2863_vm2, %v3139_v10  ;;  %v2707_v37 = vmul.f32 %v2566_v42, %v2515_v20  ;;  %v2531_v20 = vld [vmem:[#allocation4 + $0xa0] sm:$0xff] }
 0x3c6   : > { %2867 = vst.msk [vmem:[%s5123_s28 + $0xc] sm:$0xf] %vm2863_vm2, %v3140_v44  ;;  %v2708_v5 = vmul.f32 %v2571_v50, %v2516_v34  ;;  %v2532_v34 = vld [vmem:[#allocation4 + $0xa8] sm:$0xff] }
 0x3c7   : > { %v3141_v22 = vpack.c.bf16 %v2707_v37, %v2707_v37 }
 0x3c8   : > { %v3142_v16 = vpack.c.bf16 %v2708_v5, %v2708_v5  ;;  %v2576_v32 = vpop.permute.xlu1 %2575 }
 0x3c9   : > { %v2581_v27 = vpop.permute.xlu0 %2580  ;;  %2868 = vst.msk [vmem:[%s5123_s28 + $0x10] sm:$0xf] %vm2863_vm2, %v3141_v22  ;;  %v2709_v18 = vmul.f32 %v2576_v32, %v2517_v60  ;;  %v2533_v60 = vld [vmem:[#allocation4 + $0xb0] sm:$0xff] }
 0x3ca   : > { %2869 = vst.msk [vmem:[%s5123_s28 + $0x14] sm:$0xf] %vm2863_vm2, %v3142_v16  ;;  %v2710_v23 = vmul.f32 %v2581_v27, %v2518_v48  ;;  %v2534_v48 = vld [vmem:[#allocation4 + $0xb8] sm:$0xff] }
 0x3cb   : > { %v3143_v56 = vpack.c.bf16 %v2709_v18, %v2709_v18 }
 0x3cc   : > { %v3144_v26 = vpack.c.bf16 %v2710_v23, %v2710_v23  ;;  %v2586_v30 = vpop.permute.xlu1 %2585 }
 0x3cd   : > { %v2591_v36 = vpop.permute.xlu0 %2590  ;;  %2870 = vst.msk [vmem:[%s5123_s28 + $0x18] sm:$0xf] %vm2863_vm2, %v3143_v56  ;;  %v2711_v17 = vmul.f32 %v2586_v30, %v2519_v6  ;;  %v2535_v6 = vld [vmem:[#allocation4 + $0xc0] sm:$0xff] }
 0x3ce   : > { %2871 = vst.msk [vmem:[%s5123_s28 + $0x1c] sm:$0xf] %vm2863_vm2, %v3144_v26  ;;  %v2712_v19 = vmul.f32 %v2591_v36, %v2520_v15  ;;  %v2536_v15 = vld [vmem:[#allocation4 + $0xc8] sm:$0xff] }
 0x3cf   : > { %v3145_v12 = vpack.c.bf16 %v2711_v17, %v2711_v17 }
 0x3d0   : > { %v3146_v1 = vpack.c.bf16 %v2712_v19, %v2712_v19  ;;  %v2596_v58 = vpop.permute.xlu1 %2595 }
 0x3d1   : > { %v2601_v0 = vpop.permute.xlu0 %2600  ;;  %2872 = vst.msk [vmem:[%s5123_s28 + $0x20] sm:$0xf] %vm2863_vm2, %v3145_v12  ;;  %v2713_v39 = vmul.f32 %v2596_v58, %v2521_v8  ;;  %v2537_v8 = vld [vmem:[#allocation4 + $0xd0] sm:$0xff] }
 0x3d2   : > { %2873 = vst.msk [vmem:[%s5123_s28 + $0x24] sm:$0xf] %vm2863_vm2, %v3146_v1  ;;  %v2714_v61 = vmul.f32 %v2601_v0, %v2522_v7  ;;  %v2538_v7 = vld [vmem:[#allocation4 + $0xd8] sm:$0xff] }
 0x3d3   : > { %v3147_v55 = vpack.c.bf16 %v2713_v39, %v2713_v39 }
 0x3d4   : > { %v3148_v21 = vpack.c.bf16 %v2714_v61, %v2714_v61  ;;  %v2606_v33 = vpop.permute.xlu1 %2605 }
 0x3d5   : > { %v2611_v9 = vpop.permute.xlu0 %2610  ;;  %2874 = vst.msk [vmem:[%s5123_s28 + $0x28] sm:$0xf] %vm2863_vm2, %v3147_v55  ;;  %v2715_v52 = vmul.f32 %v2606_v33, %v2523_v41  ;;  %v2539_v41 = vld [vmem:[#allocation4 + $0xe0] sm:$0xff] }
 0x3d6   : > { %2875 = vst.msk [vmem:[%s5123_s28 + $0x2c] sm:$0xf] %vm2863_vm2, %v3148_v21  ;;  %v2716_v14 = vmul.f32 %v2611_v9, %v2524_v2  ;;  %v2540_v2 = vld [vmem:[#allocation4 + $0xe8] sm:$0xff] }
 0x3d7   : > { %v3149_v53 = vpack.c.bf16 %v2715_v52, %v2715_v52 }
 0x3d8   : > { %v3150_v35 = vpack.c.bf16 %v2716_v14, %v2716_v14  ;;  %v2616_v25 = vpop.permute.xlu1 %2615 }
 0x3d9   : > { %v2621_v3 = vpop.permute.xlu0 %2620  ;;  %2876 = vst.msk [vmem:[%s5123_s28 + $0x30] sm:$0xf] %vm2863_vm2, %v3149_v53  ;;  %v2717_v29 = vmul.f32 %v2616_v25, %v2525_v46  ;;  %v2541_v46 = vld [vmem:[#allocation4 + $0xf0] sm:$0xff] }
 0x3da   : > { %2877 = vst.msk [vmem:[%s5123_s28 + $0x34] sm:$0xf] %vm2863_vm2, %v3150_v35  ;;  %v2718_v49 = vmul.f32 %v2621_v3, %v2526_v54  ;;  %v2542_v54 = vld [vmem:[#allocation4 + $0xf8] sm:$0xff] }
 0x3db   : > { %v3151_v51 = vpack.c.bf16 %v2717_v29, %v2717_v29 }
 0x3dc   : > { %v3152_v13 = vpack.c.bf16 %v2718_v49, %v2718_v49  ;;  %v2626_v62 = vpop.permute.xlu1 %2625 }
 0x3dd   : > { %v2631_v63 = vpop.permute.xlu0 %2630  ;;  %2878 = vst.msk [vmem:[%s5123_s28 + $0x38] sm:$0xf] %vm2863_vm2, %v3151_v51  ;;  %v2719_v31 = vmul.f32 %v2626_v62, %v2527_v45 }
 0x3de   : > { %2879 = vst.msk [vmem:[%s5123_s28 + $0x3c] sm:$0xf] %vm2863_vm2, %v3152_v13  ;;  %v2720_v47 = vmul.f32 %v2631_v63, %v2528_v38 }
 0x3df   : > { %v3153_v24 = vpack.c.bf16 %v2719_v31, %v2719_v31 }
 0x3e0   : > { %v3154_v4 = vpack.c.bf16 %v2720_v47, %v2720_v47  ;;  %v2636_v43 = vpop.permute.xlu1 %2635 }
 0x3e1   : > { %v2641_v40 = vpop.permute.xlu0 %2640  ;;  %2880 = vst.msk [vmem:[%s5123_s28 + $0x40] sm:$0xf] %vm2863_vm2, %v3153_v24  ;;  %v2721_v59 = vmul.f32 %v2636_v43, %v2529_v11 }
 0x3e2   : > { %2881 = vst.msk [vmem:[%s5123_s28 + $0x44] sm:$0xf] %vm2863_vm2, %v3154_v4  ;;  %v2722_v28 = vmul.f32 %v2641_v40, %v2530_v57 }
 0x3e3   : > { %v3155_v10 = vpack.c.bf16 %v2721_v59, %v2721_v59 }
 0x3e4   : > { %v3156_v44 = vpack.c.bf16 %v2722_v28, %v2722_v28  ;;  %v2646_v42 = vpop.permute.xlu1 %2645 }
 0x3e5   : > { %v2651_v50 = vpop.permute.xlu0 %2650  ;;  %2882 = vst.msk [vmem:[%s5123_s28 + $0x48] sm:$0xf] %vm2863_vm2, %v3155_v10  ;;  %v2723_v37 = vmul.f32 %v2646_v42, %v2531_v20 }
 0x3e6   : > { %2883 = vst.msk [vmem:[%s5123_s28 + $0x4c] sm:$0xf] %vm2863_vm2, %v3156_v44  ;;  %v2724_v5 = vmul.f32 %v2651_v50, %v2532_v34 }
 0x3e7   : > { %v3157_v22 = vpack.c.bf16 %v2723_v37, %v2723_v37 }
 0x3e8   : > { %v3158_v16 = vpack.c.bf16 %v2724_v5, %v2724_v5  ;;  %v2656_v32 = vpop.permute.xlu1 %2655 }
 0x3e9   : > { %v2661_v27 = vpop.permute.xlu0 %2660  ;;  %2884 = vst.msk [vmem:[%s5123_s28 + $0x50] sm:$0xf] %vm2863_vm2, %v3157_v22  ;;  %v2725_v18 = vmul.f32 %v2656_v32, %v2533_v60 }
 0x3ea   : > { %2885 = vst.msk [vmem:[%s5123_s28 + $0x54] sm:$0xf] %vm2863_vm2, %v3158_v16  ;;  %v2726_v23 = vmul.f32 %v2661_v27, %v2534_v48 }
 0x3eb   : > { %v3159_v56 = vpack.c.bf16 %v2725_v18, %v2725_v18 }
 0x3ec   : > { %v3160_v26 = vpack.c.bf16 %v2726_v23, %v2726_v23  ;;  %v2666_v30 = vpop.permute.xlu1 %2665 }
 0x3ed   : > { %v2671_v36 = vpop.permute.xlu0 %2670  ;;  %2886 = vst.msk [vmem:[%s5123_s28 + $0x58] sm:$0xf] %vm2863_vm2, %v3159_v56  ;;  %v2727_v17 = vmul.f32 %v2666_v30, %v2535_v6 }
 0x3ee   : > { %2887 = vst.msk [vmem:[%s5123_s28 + $0x5c] sm:$0xf] %vm2863_vm2, %v3160_v26  ;;  %v2728_v19 = vmul.f32 %v2671_v36, %v2536_v15 }
 0x3ef   : > { %v3161_v12 = vpack.c.bf16 %v2727_v17, %v2727_v17 }
 0x3f0   : > { %v3162_v1 = vpack.c.bf16 %v2728_v19, %v2728_v19  ;;  %v2676_v58 = vpop.permute.xlu1 %2675 }
 0x3f1   : > { %v2681_v0 = vpop.permute.xlu0 %2680  ;;  %2888 = vst.msk [vmem:[%s5123_s28 + $0x60] sm:$0xf] %vm2863_vm2, %v3161_v12  ;;  %v2729_v39 = vmul.f32 %v2676_v58, %v2537_v8 }
 0x3f2   : > { %2889 = vst.msk [vmem:[%s5123_s28 + $0x64] sm:$0xf] %vm2863_vm2, %v3162_v1  ;;  %v2730_v61 = vmul.f32 %v2681_v0, %v2538_v7 }
 0x3f3   : > { %v3163_v55 = vpack.c.bf16 %v2729_v39, %v2729_v39 }
 0x3f4   : > { %v3164_v21 = vpack.c.bf16 %v2730_v61, %v2730_v61  ;;  %v2686_v33 = vpop.permute.xlu1 %2685 }
 0x3f5   : > { %v2691_v9 = vpop.permute.xlu0 %2690  ;;  %2890 = vst.msk [vmem:[%s5123_s28 + $0x68] sm:$0xf] %vm2863_vm2, %v3163_v55  ;;  %v2731_v52 = vmul.f32 %v2686_v33, %v2539_v41 }
 0x3f6   : > { %2891 = vst.msk [vmem:[%s5123_s28 + $0x6c] sm:$0xf] %vm2863_vm2, %v3164_v21  ;;  %v2732_v14 = vmul.f32 %v2691_v9, %v2540_v2 }
 0x3f7   : > { %v3165_v53 = vpack.c.bf16 %v2731_v52, %v2731_v52 }
 0x3f8   : > { %v3166_v35 = vpack.c.bf16 %v2732_v14, %v2732_v14  ;;  %v2696_v25 = vpop.permute.xlu1 %2695 }
 0x3f9   : > { %v2701_v3 = vpop.permute.xlu0 %2700  ;;  %2892 = vst.msk [vmem:[%s5123_s28 + $0x70] sm:$0xf] %vm2863_vm2, %v3165_v53  ;;  %v2733_v29 = vmul.f32 %v2696_v25, %v2541_v46 }
 0x3fa   : > { %2893 = vst.msk [vmem:[%s5123_s28 + $0x74] sm:$0xf] %vm2863_vm2, %v3166_v35  ;;  %v2734_v49 = vmul.f32 %v2701_v3, %v2542_v54 }
 0x3fb   : > { %v3167_v51 = vpack.c.bf16 %v2733_v29, %v2733_v29 }
 0x3fc   : > { %v3168_v13 = vpack.c.bf16 %v2734_v49, %v2734_v49 }
 0x3fd   : > { %2894 = vst.msk [vmem:[%s5123_s28 + $0x78] sm:$0xf] %vm2863_vm2, %v3167_v51 }
 0x3fe   : > { %2895 = vst.msk [vmem:[%s5123_s28 + $0x7c] sm:$0xf] %vm2863_vm2, %v3168_v13 }
 0x3ff PF: > { %s13_s14 = sadd.s32 1, %s3692_s14   ;;  %s5472_s12 = smov %s3688_s13 }
 0x400   : > { %p10_p5 = scmp.ge.s32.totalorder %s13_s14, 6   ;;  %s5473_s13 = smov %s5475_s15 }
 0x402   :  { %12 = sbr.rel (!%p10_p5) target bundleno = 2 (0x2), region = 76 }

</bundles_post_ra>
